<compile_context>
chip_gen: v7x
topology: tpu7x:2x2x1
jax: 0.10.0
libtpu: 0.0.40
codegen_flags: <defaults>
</compile_context>

<pallas_src>
import jax
import jax.numpy as jnp
from jax.experimental import pallas as pl
from jax.experimental.pallas import tpu as pltpu


def _fold_bn(gamma, beta, mean, var, eps=1e-5):
    scale = gamma / jnp.sqrt(var + eps)
    shift = beta - mean * scale
    return scale, shift


def _branch2_kernel(x_ref, w1_ref, w3_ref, pk_ref, o_ref, ypad_ref):
    """Fused ShuffleNet-v2 branch2 (stride=1) for a batch block.

    x_ref   : (Nb, H, W, Cb)        unpadded NHWC activations (input dtype)
    w1_ref  : (Cb, Cb)  f32         first 1x1 conv weights, (in, out)
    w3_ref  : (Cb, Cb)  f32         second 1x1 conv weights, (in, out)
    pk_ref  : (16, Cb)  f32         rows 0..8 = depthwise taps (ky*3+kx),
                                    9..14 = BN1/BN2/BN3 folded scale,shift
    o_ref   : (Nb, H, W, Cb)
    ypad_ref: (Nb, H+2, W+9, Cb) f32 VMEM scratch; interior lives at
              [:, 1:H+1, 8:8+W, :] so the interior store is sublane-aligned,
              with zero columns at 7 (left halo) and 8+W (right halo).
    """
    Nb, H, W, Cb = x_ref.shape

    # ---- 1x1 conv (MXU) + BN + ReLU -------------------------------------
    x2d = x_ref[...].reshape(Nb * H * W, Cb).astype(jnp.float32)
    y = jnp.dot(x2d, w1_ref[...], preferred_element_type=jnp.float32)
    y = jnp.maximum(y * pk_ref[9] + pk_ref[10], 0.0)

    # ---- place into zeroed scratch: ring stays true zero ----------------
    ypad_ref[...] = jnp.zeros_like(ypad_ref)
    ypad_ref[:, 1:H + 1, 8:8 + W, :] = y.reshape(Nb, H, W, Cb)

    # ---- depthwise 3x3, stride 1, pad 1 + BN -----------------------------
    yp = ypad_ref[...]
    acc = jnp.zeros((Nb, H, W, Cb), jnp.float32)
    for ky in range(3):
        for kx in range(3):
            acc = acc + yp[:, ky:ky + H, kx + 7:kx + 7 + W, :] * pk_ref[3 * ky + kx]
    z = acc * pk_ref[11] + pk_ref[12]

    # ---- 1x1 conv (MXU) + BN + ReLU --------------------------------------
    o = jnp.dot(z.reshape(Nb * H * W, Cb), w3_ref[...],
                preferred_element_type=jnp.float32)
    o = jnp.maximum(o * pk_ref[13] + pk_ref[14], 0.0)
    o_ref[...] = o.reshape(Nb, H, W, Cb).astype(o_ref.dtype)


def _pick_batch_block(N, per_image_bytes, target_bytes=1 << 20):
    """Batch elements per grid step: ~1 MiB blocks, keep >=2 steps when possible."""
    nb = max(1, min(N, target_bytes // max(per_image_bytes, 1)))
    if N >= 4:
        nb = min(nb, N // 4)      # keep several grid points (pipelining / 2 TCs)
    elif N > 1:
        nb = 1                    # N in {2,3}: at least 2 grid steps
    while N % nb:
        nb -= 1
    return int(nb)


def shuffle_block_forward(x, params, stride=1):
    """Shuffle_Block.forward for NCHW input `x` (stride=1 path)."""
    if stride != 1:
        # TODO(synk): stride>1 (branch1 + strided depthwise) not implemented.
        raise NotImplementedError("Only the stride=1 Shuffle_Block path is implemented.")

    N, C, H, W = x.shape
    Cb = C // 2
    dtype = x.dtype
    itemsize = x.dtype.itemsize

    # x.chunk(2, dim=1): x1 is passthrough, x2 feeds branch2.
    x1 = x[:, :Cb]                                              # (N, Cb, H, W)
    x2_nhwc = jnp.transpose(x[:, Cb:], (0, 2, 3, 1))            # (N, H, W, Cb), no pad

    s1, b1 = _fold_bn(*params["bn1"])
    s2, b2 = _fold_bn(*params["bn2"])
    s3, b3 = _fold_bn(*params["bn3"])

    w1_io = params["w1"].T.astype(jnp.float32)                  # (in, out)
    w3_io = params["w3"].T.astype(jnp.float32)
    dw_k = jnp.transpose(params["dw"], (1, 2, 0)).reshape(9, Cb).astype(jnp.float32)
    packed = jnp.concatenate(
        [dw_k]
        + [v.reshape(1, Cb).astype(jnp.float32) for v in (s1, b1, s2, b2, s3, b3)]
        + [jnp.zeros((1, Cb), jnp.float32)],
        axis=0)                                                  # (16, Cb)

    nb = _pick_batch_block(N, H * W * Cb * itemsize)
    grid = (N // nb,)

    # Explicit VMEM budget (valid for v7x's 64 MiB as well as v5e/v6e).
    est = (2 * nb * H * W * Cb * itemsize          # double-buffered input block
           + 2 * nb * H * W * Cb * itemsize        # double-buffered output block
           + nb * (H + 2) * (W + 9) * Cb * 4       # padded scratch
           + 6 * nb * H * W * Cb * 4               # live f32 intermediates
           + 2 * Cb * Cb * 4 + 16 * Cb * 4)        # weights + packed vectors
    vmem_limit = int(min(max(4 * est, 32 * 1024 * 1024), 64 * 1024 * 1024))

    full2 = lambda n: (0, 0)
    b2_nhwc = pl.pallas_call(
        _branch2_kernel,
        out_shape=jax.ShapeDtypeStruct((N, H, W, Cb), dtype),
        grid_spec=pltpu.PrefetchScalarGridSpec(
            num_scalar_prefetch=0,
            grid=grid,
            in_specs=[
                pl.BlockSpec((nb, H, W, Cb), lambda n: (n, 0, 0, 0)),  # activations
                pl.BlockSpec((Cb, Cb), full2),                         # w1 (in, out)
                pl.BlockSpec((Cb, Cb), full2),                         # w3 (in, out)
                pl.BlockSpec((16, Cb), full2),                         # dw taps + BN
            ],
            out_specs=pl.BlockSpec((nb, H, W, Cb), lambda n: (n, 0, 0, 0)),
            scratch_shapes=[pltpu.VMEM((nb, H + 2, W + 9, Cb), jnp.float32)],
        ),
        compiler_params=pltpu.CompilerParams(
            dimension_semantics=("parallel",),
            vmem_limit_bytes=vmem_limit,
        ),
    )(x2_nhwc, w1_io, w3_io, packed)

    # cat((x1, branch2(x2)), dim=1) followed by channel_shuffle(groups=2)
    # == interleave channels: [x1_0, b2_0, x1_1, b2_1, ...].
    b2_nchw = jnp.transpose(b2_nhwc, (0, 3, 1, 2)).astype(dtype)
    out = jnp.stack([x1, b2_nchw], axis=2).reshape(N, 2 * Cb, H, W)
    return out


# ------------------------- pure-JAX reference -------------------------------
def _bn_ref(v, gamma, beta, mean, var, eps=1e-5):
    s = gamma / jnp.sqrt(var + eps)
    b = beta - mean * s
    return v * s[None, :, None, None] + b[None, :, None, None]


def shuffle_block_reference(x, params, stride=1):
    assert stride == 1
    N, C, H, W = x.shape
    Cb = C // 2
    x1, x2 = x[:, :Cb], x[:, Cb:]
    y = jnp.einsum("oi,nihw->nohw", params["w1"], x2)
    y = jax.nn.relu(_bn_ref(y, *params["bn1"]))
    y = jax.lax.conv_general_dilated(
        y, params["dw"][:, None],
        window_strides=(1, 1), padding=((1, 1), (1, 1)),
        dimension_numbers=("NCHW", "OIHW", "NCHW"),
        feature_group_count=Cb)
    y = _bn_ref(y, *params["bn2"])
    y = jnp.einsum("oi,nihw->nohw", params["w3"], y)
    y = jax.nn.relu(_bn_ref(y, *params["bn3"]))
    out = jnp.concatenate([x1, y], axis=1)
    out = out.reshape(N, 2, Cb, H, W).transpose(0, 2, 1, 3, 4).reshape(N, 2 * Cb, H, W)
    return out


if __name__ == "__main__":
    # stride=1 Shuffle_Block requires inp == 2 * branch_features.
    N, C, H, W = 2, 4, 16, 16
    Cb = C // 2

    key = jax.random.PRNGKey(0)
    ks = jax.random.split(key, 8)
    x = jax.random.normal(ks[0], (N, C, H, W), dtype=jnp.float32)

    def bn_params(k):
        k1, k2, k3, k4 = jax.random.split(k, 4)
        gamma = 1.0 + 0.1 * jax.random.normal(k1, (Cb,), jnp.float32)
        beta = 0.1 * jax.random.normal(k2, (Cb,), jnp.float32)
        mean = 0.1 * jax.random.normal(k3, (Cb,), jnp.float32)
        var = jax.random.uniform(k4, (Cb,), jnp.float32, 0.5, 1.5)
        return (gamma, beta, mean, var)

    params = {
        "w1": 0.5 * jax.random.normal(ks[1], (Cb, Cb), jnp.float32),    # (out, in)
        "bn1": bn_params(ks[2]),
        "dw": 0.5 * jax.random.normal(ks[3], (Cb, 3, 3), jnp.float32),  # depthwise
        "bn2": bn_params(ks[4]),
        "w3": 0.5 * jax.random.normal(ks[5], (Cb, Cb), jnp.float32),    # (out, in)
        "bn3": bn_params(ks[6]),
    }

    y = shuffle_block_forward(x, params, stride=1)
    jax.block_until_ready(y)

    ref = shuffle_block_reference(x, params, stride=1)
    assert y.shape == (N, C, H, W) and y.dtype == x.dtype
    err = float(jnp.max(jnp.abs(y - ref)))
    assert jnp.allclose(y, ref, atol=2e-3, rtol=2e-3), err

    print("KERNEL_OK")
</pallas_src>

<mosaic_0001>
module attributes {stable_mosaic.version = 11 : i64} {
  func.func @_branch2_kernel(%arg0: i32, %arg1: memref<1x16x16x2xf32, #tpu.memory_space<vmem>>, %arg2: memref<2x2xf32, #tpu.memory_space<vmem>>, %arg3: memref<2x2xf32, #tpu.memory_space<vmem>>, %arg4: memref<16x2xf32, #tpu.memory_space<vmem>>, %arg5: memref<1x16x16x2xf32, #tpu.memory_space<vmem>>, %arg6: memref<1x18x25x2xf32, #tpu.memory_space<vmem>>) attributes {dimension_semantics = [#tpu.dimension_semantics<parallel>], iteration_bounds = array<i64: 2>, scalar_prefetch = 0 : i64, scratch_operands = 1 : i64, tpu.core_type = #tpu.core_type<tc>, window_params = [{transform_indices = @transform_0, window_bounds = array<i64: 1, 16, 16, 2>}, {pipeline_mode = #tpu.pipeline_mode<synchronous>, transform_indices = @transform_1, window_bounds = array<i64: 2, 2>}, {pipeline_mode = #tpu.pipeline_mode<synchronous>, transform_indices = @transform_2, window_bounds = array<i64: 2, 2>}, {pipeline_mode = #tpu.pipeline_mode<synchronous>, transform_indices = @transform_3, window_bounds = array<i64: 16, 2>}, {transform_indices = @transform_4, window_bounds = array<i64: 1, 16, 16, 2>}]} {
    %c0 = arith.constant 0 : index
    %c0_0 = arith.constant 0 : index
    %c0_1 = arith.constant 0 : index
    %c0_2 = arith.constant 0 : index
    %0 = vector.load %arg1[%c0, %c0_0, %c0_1, %c0_2] : memref<1x16x16x2xf32, #tpu.memory_space<vmem>>, vector<1x16x16x2xf32>
    %1 = vector.shape_cast %0 : vector<1x16x16x2xf32> to vector<256x2xf32>
    %c0_3 = arith.constant 0 : index
    %c0_4 = arith.constant 0 : index
    %2 = vector.load %arg2[%c0_3, %c0_4] : memref<2x2xf32, #tpu.memory_space<vmem>>, vector<2x2xf32>
    %cst = arith.constant dense<0.000000e+00> : vector<256x2xf32>
    %3 = tpu.matmul %1, %2, %cst {dimension_numbers = #tpu.dot_dimension_numbers<[1], [0], [0], [1], [0, 0, 1, 1], [], []>} : vector<256x2xf32>, vector<2x2xf32>, vector<256x2xf32> -> vector<256x2xf32>
    %c9 = arith.constant 9 : index
    %c0_5 = arith.constant 0 : index
    %4 = vector.load %arg4[%c9, %c0_5] : memref<16x2xf32, #tpu.memory_space<vmem>>, vector<1x2xf32>
    %5 = vector.shape_cast %4 : vector<1x2xf32> to vector<2xf32>
    %6 = vector.shape_cast %5 : vector<2xf32> to vector<1x2xf32>
    %7 = vector.broadcast %6 : vector<1x2xf32> to vector<256x2xf32>
    %8 = arith.mulf %3, %7 : vector<256x2xf32>
    %c10 = arith.constant 10 : index
    %c0_6 = arith.constant 0 : index
    %9 = vector.load %arg4[%c10, %c0_6] : memref<16x2xf32, #tpu.memory_space<vmem>>, vector<1x2xf32>
    %10 = vector.shape_cast %9 : vector<1x2xf32> to vector<2xf32>
    %11 = vector.shape_cast %10 : vector<2xf32> to vector<1x2xf32>
    %12 = vector.broadcast %11 : vector<1x2xf32> to vector<256x2xf32>
    %13 = arith.addf %8, %12 : vector<256x2xf32>
    %cst_7 = arith.constant 0.000000e+00 : f32
    %14 = vector.broadcast %cst_7 : f32 to vector<256x2xf32>
    %15 = arith.maximumf %13, %14 : vector<256x2xf32>
    %cst_8 = arith.constant 0.000000e+00 : f32
    %16 = vector.broadcast %cst_8 : f32 to vector<1x18x25x2xf32>
    %c0_9 = arith.constant 0 : index
    %c0_10 = arith.constant 0 : index
    %c0_11 = arith.constant 0 : index
    %c0_12 = arith.constant 0 : index
    %17 = vector.load %arg6[%c0_9, %c0_10, %c0_11, %c0_12] : memref<1x18x25x2xf32, #tpu.memory_space<vmem>>, vector<1x18x25x2xf32>
    tpu.vector_store %arg6[%c0_9, %c0_10, %c0_11, %c0_12], %16 {strides = array<i32>} : memref<1x18x25x2xf32, #tpu.memory_space<vmem>>, vector<1x18x25x2xf32>,
    %18 = vector.shape_cast %15 : vector<256x2xf32> to vector<1x16x16x2xf32>
    %c0_13 = arith.constant 0 : index
    %c1 = arith.constant 1 : index
    %c8 = arith.constant 8 : index
    %c0_14 = arith.constant 0 : index
    %19 = vector.load %arg6[%c0_13, %c1, %c8, %c0_14] : memref<1x18x25x2xf32, #tpu.memory_space<vmem>>, vector<1x16x16x2xf32>
    tpu.vector_store %arg6[%c0_13, %c1, %c8, %c0_14], %18 {strides = array<i32>} : memref<1x18x25x2xf32, #tpu.memory_space<vmem>>, vector<1x16x16x2xf32>,
    %c0_15 = arith.constant 0 : index
    %c0_16 = arith.constant 0 : index
    %c0_17 = arith.constant 0 : index
    %c0_18 = arith.constant 0 : index
    %20 = vector.load %arg6[%c0_15, %c0_16, %c0_17, %c0_18] : memref<1x18x25x2xf32, #tpu.memory_space<vmem>>, vector<1x18x25x2xf32>
    %cst_19 = arith.constant 0.000000e+00 : f32
    %21 = vector.broadcast %cst_19 : f32 to vector<1x16x16x2xf32>
    %22 = vector.extract_strided_slice %20 {offsets = [0, 0, 7, 0], sizes = [1, 16, 16, 2], strides = [1, 1, 1, 1]} : vector<1x18x25x2xf32> to vector<1x16x16x2xf32>
    %c0_20 = arith.constant 0 : index
    %c0_21 = arith.constant 0 : index
    %23 = vector.load %arg4[%c0_20, %c0_21] : memref<16x2xf32, #tpu.memory_space<vmem>>, vector<1x2xf32>
    %24 = vector.shape_cast %23 : vector<1x2xf32> to vector<2xf32>
    %25 = vector.shape_cast %24 : vector<2xf32> to vector<1x1x1x2xf32>
    %26 = vector.broadcast %25 : vector<1x1x1x2xf32> to vector<1x16x16x2xf32>
    %27 = arith.mulf %22, %26 : vector<1x16x16x2xf32>
    %28 = arith.addf %21, %27 : vector<1x16x16x2xf32>
    %29 = vector.extract_strided_slice %20 {offsets = [0, 0, 8, 0], sizes = [1, 16, 16, 2], strides = [1, 1, 1, 1]} : vector<1x18x25x2xf32> to vector<1x16x16x2xf32>
    %c1_22 = arith.constant 1 : index
    %c0_23 = arith.constant 0 : index
    %30 = vector.load %arg4[%c1_22, %c0_23] : memref<16x2xf32, #tpu.memory_space<vmem>>, vector<1x2xf32>
    %31 = vector.shape_cast %30 : vector<1x2xf32> to vector<2xf32>
    %32 = vector.shape_cast %31 : vector<2xf32> to vector<1x1x1x2xf32>
    %33 = vector.broadcast %32 : vector<1x1x1x2xf32> to vector<1x16x16x2xf32>
    %34 = arith.mulf %29, %33 : vector<1x16x16x2xf32>
    %35 = arith.addf %28, %34 : vector<1x16x16x2xf32>
    %36 = vector.extract_strided_slice %20 {offsets = [0, 0, 9, 0], sizes = [1, 16, 16, 2], strides = [1, 1, 1, 1]} : vector<1x18x25x2xf32> to vector<1x16x16x2xf32>
    %c2 = arith.constant 2 : index
    %c0_24 = arith.constant 0 : index
    %37 = vector.load %arg4[%c2, %c0_24] : memref<16x2xf32, #tpu.memory_space<vmem>>, vector<1x2xf32>
    %38 = vector.shape_cast %37 : vector<1x2xf32> to vector<2xf32>
    %39 = vector.shape_cast %38 : vector<2xf32> to vector<1x1x1x2xf32>
    %40 = vector.broadcast %39 : vector<1x1x1x2xf32> to vector<1x16x16x2xf32>
    %41 = arith.mulf %36, %40 : vector<1x16x16x2xf32>
    %42 = arith.addf %35, %41 : vector<1x16x16x2xf32>
    %43 = vector.extract_strided_slice %20 {offsets = [0, 1, 7, 0], sizes = [1, 16, 16, 2], strides = [1, 1, 1, 1]} : vector<1x18x25x2xf32> to vector<1x16x16x2xf32>
    %c3 = arith.constant 3 : index
    %c0_25 = arith.constant 0 : index
    %44 = vector.load %arg4[%c3, %c0_25] : memref<16x2xf32, #tpu.memory_space<vmem>>, vector<1x2xf32>
    %45 = vector.shape_cast %44 : vector<1x2xf32> to vector<2xf32>
    %46 = vector.shape_cast %45 : vector<2xf32> to vector<1x1x1x2xf32>
    %47 = vector.broadcast %46 : vector<1x1x1x2xf32> to vector<1x16x16x2xf32>
    %48 = arith.mulf %43, %47 : vector<1x16x16x2xf32>
    %49 = arith.addf %42, %48 : vector<1x16x16x2xf32>
    %50 = vector.extract_strided_slice %20 {offsets = [0, 1, 8, 0], sizes = [1, 16, 16, 2], strides = [1, 1, 1, 1]} : vector<1x18x25x2xf32> to vector<1x16x16x2xf32>
    %c4 = arith.constant 4 : index
    %c0_26 = arith.constant 0 : index
    %51 = vector.load %arg4[%c4, %c0_26] : memref<16x2xf32, #tpu.memory_space<vmem>>, vector<1x2xf32>
    %52 = vector.shape_cast %51 : vector<1x2xf32> to vector<2xf32>
    %53 = vector.shape_cast %52 : vector<2xf32> to vector<1x1x1x2xf32>
    %54 = vector.broadcast %53 : vector<1x1x1x2xf32> to vector<1x16x16x2xf32>
    %55 = arith.mulf %50, %54 : vector<1x16x16x2xf32>
    %56 = arith.addf %49, %55 : vector<1x16x16x2xf32>
    %57 = vector.extract_strided_slice %20 {offsets = [0, 1, 9, 0], sizes = [1, 16, 16, 2], strides = [1, 1, 1, 1]} : vector<1x18x25x2xf32> to vector<1x16x16x2xf32>
    %c5 = arith.constant 5 : index
    %c0_27 = arith.constant 0 : index
    %58 = vector.load %arg4[%c5, %c0_27] : memref<16x2xf32, #tpu.memory_space<vmem>>, vector<1x2xf32>
    %59 = vector.shape_cast %58 : vector<1x2xf32> to vector<2xf32>
    %60 = vector.shape_cast %59 : vector<2xf32> to vector<1x1x1x2xf32>
    %61 = vector.broadcast %60 : vector<1x1x1x2xf32> to vector<1x16x16x2xf32>
    %62 = arith.mulf %57, %61 : vector<1x16x16x2xf32>
    %63 = arith.addf %56, %62 : vector<1x16x16x2xf32>
    %64 = vector.extract_strided_slice %20 {offsets = [0, 2, 7, 0], sizes = [1, 16, 16, 2], strides = [1, 1, 1, 1]} : vector<1x18x25x2xf32> to vector<1x16x16x2xf32>
    %c6 = arith.constant 6 : index
    %c0_28 = arith.constant 0 : index
    %65 = vector.load %arg4[%c6, %c0_28] : memref<16x2xf32, #tpu.memory_space<vmem>>, vector<1x2xf32>
    %66 = vector.shape_cast %65 : vector<1x2xf32> to vector<2xf32>
    %67 = vector.shape_cast %66 : vector<2xf32> to vector<1x1x1x2xf32>
    %68 = vector.broadcast %67 : vector<1x1x1x2xf32> to vector<1x16x16x2xf32>
    %69 = arith.mulf %64, %68 : vector<1x16x16x2xf32>
    %70 = arith.addf %63, %69 : vector<1x16x16x2xf32>
    %71 = vector.extract_strided_slice %20 {offsets = [0, 2, 8, 0], sizes = [1, 16, 16, 2], strides = [1, 1, 1, 1]} : vector<1x18x25x2xf32> to vector<1x16x16x2xf32>
    %c7 = arith.constant 7 : index
    %c0_29 = arith.constant 0 : index
    %72 = vector.load %arg4[%c7, %c0_29] : memref<16x2xf32, #tpu.memory_space<vmem>>, vector<1x2xf32>
    %73 = vector.shape_cast %72 : vector<1x2xf32> to vector<2xf32>
    %74 = vector.shape_cast %73 : vector<2xf32> to vector<1x1x1x2xf32>
    %75 = vector.broadcast %74 : vector<1x1x1x2xf32> to vector<1x16x16x2xf32>
    %76 = arith.mulf %71, %75 : vector<1x16x16x2xf32>
    %77 = arith.addf %70, %76 : vector<1x16x16x2xf32>
    %78 = vector.extract_strided_slice %20 {offsets = [0, 2, 9, 0], sizes = [1, 16, 16, 2], strides = [1, 1, 1, 1]} : vector<1x18x25x2xf32> to vector<1x16x16x2xf32>
    %c8_30 = arith.constant 8 : index
    %c0_31 = arith.constant 0 : index
    %79 = vector.load %arg4[%c8_30, %c0_31] : memref<16x2xf32, #tpu.memory_space<vmem>>, vector<1x2xf32>
    %80 = vector.shape_cast %79 : vector<1x2xf32> to vector<2xf32>
    %81 = vector.shape_cast %80 : vector<2xf32> to vector<1x1x1x2xf32>
    %82 = vector.broadcast %81 : vector<1x1x1x2xf32> to vector<1x16x16x2xf32>
    %83 = arith.mulf %78, %82 : vector<1x16x16x2xf32>
    %84 = arith.addf %77, %83 : vector<1x16x16x2xf32>
    %c11 = arith.constant 11 : index
    %c0_32 = arith.constant 0 : index
    %85 = vector.load %arg4[%c11, %c0_32] : memref<16x2xf32, #tpu.memory_space<vmem>>, vector<1x2xf32>
    %86 = vector.shape_cast %85 : vector<1x2xf32> to vector<2xf32>
    %87 = vector.shape_cast %86 : vector<2xf32> to vector<1x1x1x2xf32>
    %88 = vector.broadcast %87 : vector<1x1x1x2xf32> to vector<1x16x16x2xf32>
    %89 = arith.mulf %84, %88 : vector<1x16x16x2xf32>
    %c12 = arith.constant 12 : index
    %c0_33 = arith.constant 0 : index
    %90 = vector.load %arg4[%c12, %c0_33] : memref<16x2xf32, #tpu.memory_space<vmem>>, vector<1x2xf32>
    %91 = vector.shape_cast %90 : vector<1x2xf32> to vector<2xf32>
    %92 = vector.shape_cast %91 : vector<2xf32> to vector<1x1x1x2xf32>
    %93 = vector.broadcast %92 : vector<1x1x1x2xf32> to vector<1x16x16x2xf32>
    %94 = arith.addf %89, %93 : vector<1x16x16x2xf32>
    %95 = vector.shape_cast %94 : vector<1x16x16x2xf32> to vector<256x2xf32>
    %c0_34 = arith.constant 0 : index
    %c0_35 = arith.constant 0 : index
    %96 = vector.load %arg3[%c0_34, %c0_35] : memref<2x2xf32, #tpu.memory_space<vmem>>, vector<2x2xf32>
    %cst_36 = arith.constant dense<0.000000e+00> : vector<256x2xf32>
    %97 = tpu.matmul %95, %96, %cst_36 {dimension_numbers = #tpu.dot_dimension_numbers<[1], [0], [0], [1], [0, 0, 1, 1], [], []>} : vector<256x2xf32>, vector<2x2xf32>, vector<256x2xf32> -> vector<256x2xf32>
    %c13 = arith.constant 13 : index
    %c0_37 = arith.constant 0 : index
    %98 = vector.load %arg4[%c13, %c0_37] : memref<16x2xf32, #tpu.memory_space<vmem>>, vector<1x2xf32>
    %99 = vector.shape_cast %98 : vector<1x2xf32> to vector<2xf32>
    %100 = vector.shape_cast %99 : vector<2xf32> to vector<1x2xf32>
    %101 = vector.broadcast %100 : vector<1x2xf32> to vector<256x2xf32>
    %102 = arith.mulf %97, %101 : vector<256x2xf32>
    %c14 = arith.constant 14 : index
    %c0_38 = arith.constant 0 : index
    %103 = vector.load %arg4[%c14, %c0_38] : memref<16x2xf32, #tpu.memory_space<vmem>>, vector<1x2xf32>
    %104 = vector.shape_cast %103 : vector<1x2xf32> to vector<2xf32>
    %105 = vector.shape_cast %104 : vector<2xf32> to vector<1x2xf32>
    %106 = vector.broadcast %105 : vector<1x2xf32> to vector<256x2xf32>
    %107 = arith.addf %102, %106 : vector<256x2xf32>
    %cst_39 = arith.constant 0.000000e+00 : f32
    %108 = vector.broadcast %cst_39 : f32 to vector<256x2xf32>
    %109 = arith.maximumf %107, %108 : vector<256x2xf32>
    %110 = vector.shape_cast %109 : vector<256x2xf32> to vector<1x16x16x2xf32>
    %c0_40 = arith.constant 0 : index
    %c0_41 = arith.constant 0 : index
    %c0_42 = arith.constant 0 : index
    %c0_43 = arith.constant 0 : index
    %111 = vector.load %arg5[%c0_40, %c0_41, %c0_42, %c0_43] : memref<1x16x16x2xf32, #tpu.memory_space<vmem>>, vector<1x16x16x2xf32>
    tpu.vector_store %arg5[%c0_40, %c0_41, %c0_42, %c0_43], %110 {strides = array<i32>} : memref<1x16x16x2xf32, #tpu.memory_space<vmem>>, vector<1x16x16x2xf32>,
    return
  }
  func.func @transform_0(%arg0: i32) -> (i32, i32, i32, i32) {
    %c0_i32 = arith.constant 0 : i32
    %c0_i32_0 = arith.constant 0 : i32
    %c0_i32_1 = arith.constant 0 : i32
    %c0_i32_2 = arith.constant 0 : i32
    return %arg0, %c0_i32, %c0_i32_0, %c0_i32_1 : i32, i32, i32, i32
  }
  func.func @transform_1(%arg0: i32) -> (i32, i32) {
    %c0_i32 = arith.constant 0 : i32
    %c0_i32_0 = arith.constant 0 : i32
    %c0_i32_1 = arith.constant 0 : i32
    return %c0_i32, %c0_i32_0 : i32, i32
  }
  func.func @transform_2(%arg0: i32) -> (i32, i32) {
    %c0_i32 = arith.constant 0 : i32
    %c0_i32_0 = arith.constant 0 : i32
    %c0_i32_1 = arith.constant 0 : i32
    return %c0_i32, %c0_i32_0 : i32, i32
  }
  func.func @transform_3(%arg0: i32) -> (i32, i32) {
    %c0_i32 = arith.constant 0 : i32
    %c0_i32_0 = arith.constant 0 : i32
    %c0_i32_1 = arith.constant 0 : i32
    return %c0_i32, %c0_i32_0 : i32, i32
  }
  func.func @transform_4(%arg0: i32) -> (i32, i32, i32, i32) {
    %c0_i32 = arith.constant 0 : i32
    %c0_i32_0 = arith.constant 0 : i32
    %c0_i32_1 = arith.constant 0 : i32
    %c0_i32_2 = arith.constant 0 : i32
    return %arg0, %c0_i32, %c0_i32_0, %c0_i32_1 : i32, i32, i32, i32
  }
}

</mosaic_0001>

<bundles_post_ra>
// kernel: tpu_custom_call.1
= control target key start
LH: loop header
LB: loop body
LE: loop exit
PB: predicated region body
PF: predicated region fallthrough
CT: control target
= control target key end

     0   :  { %s3665_s15 = smov 0   ;;  %s6136_s0 = inlined_call_operand.vmem [shape: f32[2,16,16,2], index: 0, kind: input, shape index: {}]   ;;  %s6137_s1 = inlined_call_operand.vmem [shape: f32[2,2], index: 1, kind: input, shape index: {}]   ;;  %s6138_s2 = inlined_call_operand.vmem [shape: f32[2,2], index: 2, kind: input, shape index: {}]   ;;  %s6139_s3 = inlined_call_operand.vmem [shape: f32[16,2], index: 3, kind: input, shape index: {}]   ;;  %s6140_s4 = inlined_call_operand.vmem [shape: f32[2,16,16,2], index: 4, kind: output, shape index: {}]  }
   0x1 LB: > { %s3337_s16 = sadd.s32 4294967295, %s3637_s15   ;;  %p3341_p0 = scmp.ge.s32.totalorder %s3637_s15, 1  ;;  %s3637_s15 = sphi %s3665_s15, %s14_s15  }
   0x2   : > { %p162_p1 = scmp.lt.s32.totalorder %s3637_s15, 3 }
   0x4   : > { %p163_p2 = pnand %p3341_p0, %p162_p1 }
   0x6   : > { %166 = sbr.rel (%p163_p2) target bundleno = 819 (0x333), region = 36 }
   0xd   : > { %v230_v0 = vld [vmem:[%s6137_s1] sm:$0x3]  ;;  %vm328_vm0 = vcmask 1041408   ;;  %p188_p3 = scmp.lt.s32.totalorder %s3337_s16, 1  ;;  %vm231_vm1 = vcmask 15360   ;;  %v3639_v33 = vmov 0.0  }
   0xe   : > { %3497 = vmatprep.subr.msk.mxu0 %vm328_vm0, %v230_v0  ;;  %670 = vst.msk [vmem:[#allocation2 + $0x30] sm:$0xff] %vm231_vm1, %v3639_v33  ;;  %663 = vst.msk [vmem:[#allocation2] sm:$0xff] %vm231_vm1, %v3639_v33  ;;  %vm666_vm2 = vcmask 8192   ;;  %v2851_v34 = vld [vmem:[%s6138_s2] sm:$0x3]  ;;  %vm1011_vm3 = vcmask 1046528  }
   0xf   : > { %3498 = vmatpush3.msk.msra.mxu0 %vm328_vm0, %v230_v0  ;;  %s6229_s16 = smov (!%p188_p3, %s3337_s16), 1  ;;  %664 = vst.msk [vmem:[#allocation2 + $0x8] sm:$0xff] %vm231_vm1, %v3639_v33  ;;  %665 = vst.msk [vmem:[#allocation2 + $0x10] sm:$0xff] %vm231_vm1, %v3639_v33  ;;  %3547 = vmatprep.subr.msk.mxu1 %vm328_vm0, %v2851_v34  ;;  %v3904_v37 = vld [vmem:[%s6139_s3 + $0x1] ss:$0 sm:$0xff]  ;;  %vm1257_vm4 = vcmask 1045504  }
  0x10   : > { %s3429_s19 = sshll.u32 %s6229_s16, 8  ;;  %668 = vst.msk [vmem:[#allocation2 + $0x20] sm:$0xff] %vm231_vm1, %v3639_v33  ;;  %669 = vst.msk [vmem:[#allocation2 + $0x28] sm:$0xff] %vm231_vm1, %v3639_v33  ;;  %3548 = vmatpush3.msk.msra.mxu1 %vm328_vm0, %v2851_v34  ;;  %v3911_v40 = vld [vmem:[%s6139_s3 + $0x2] ss:$0 sm:$0xff]  ;;  %vm2770_vm5 = vcmask 1040384  }
  0x11   : > { %s3686_s22 = scalar_lea.vmem %s6136_s0, %s3429_s19  ;;  %672 = vst.msk [vmem:[#allocation2 + $0x40] sm:$0xff] %vm231_vm1, %v3639_v33  ;;  %673 = vst.msk [vmem:[#allocation2 + $0x48] sm:$0xff] %vm231_vm1, %v3639_v33  ;;  %v3916_v42 = vld [vmem:[%s6139_s3] ss:$0 sm:$0xff]  ;;  %v3927_v56 = vld [vmem:[%s6139_s3 + $0x3] ss:$0 sm:$0xff]  ;;  %s5992_s12 = scalar_lea.vmem %s6140_s4, %s3429_s19 }
  0x12   : > { %v198_v1 = vld [vmem:[%s3686_s22] sm:$0xff]  ;;  %v199_v2 = vld [vmem:[%s3686_s22 + $0x8] sm:$0xff]  ;;  %v200_v3 = vld [vmem:[%s3686_s22 + $0x10] sm:$0xff]  ;;  %674 = vst.msk [vmem:[#allocation2 + $0x50] sm:$0xff] %vm231_vm1, %v3639_v33 }
  0x13   : > { %3499 = vmatprep.mubr.msk.f32.mxu0 %vm231_vm1, %v198_v1  ;;  %v201_v4 = vld [vmem:[%s3686_s22 + $0x18] sm:$0xff]  ;;  %v202_v5 = vld [vmem:[%s3686_s22 + $0x20] sm:$0xff]  ;;  %v203_v6 = vld [vmem:[%s3686_s22 + $0x28] sm:$0xff]  ;;  %676 = vst.msk [vmem:[#allocation2 + $0x60] sm:$0xff] %vm231_vm1, %v3639_v33 }
  0x14   : > { %3500 = vmatmul.mubr.msk.f32.vlgmr.msra.gmra.mrb[0].mxu0 %vm231_vm1, %v199_v2  ;;  %v204_v7 = vld [vmem:[%s3686_s22 + $0x30] sm:$0xff]  ;;  %v205_v8 = vld [vmem:[%s3686_s22 + $0x38] sm:$0xff]  ;;  %v206_v9 = vld [vmem:[%s3686_s22 + $0x40] sm:$0xff]  ;;  %677 = vst.msk [vmem:[#allocation2 + $0x68] sm:$0xff] %vm231_vm1, %v3639_v33 }
  0x15   : > { %3502 = vmatprep.mubr.msk.f32.mxu0 %vm231_vm1, %v200_v3  ;;  %v207_v10 = vld [vmem:[%s3686_s22 + $0x48] sm:$0xff]  ;;  %v208_v11 = vld [vmem:[%s3686_s22 + $0x50] sm:$0xff]  ;;  %v209_v12 = vld [vmem:[%s3686_s22 + $0x58] sm:$0xff]  ;;  %678 = vst.msk [vmem:[#allocation2 + $0x70] sm:$0xff] %vm231_vm1, %v3639_v33 }
  0x16   : > { %v210_v13 = vld [vmem:[%s3686_s22 + $0x60] sm:$0xff]  ;;  %v211_v14 = vld [vmem:[%s3686_s22 + $0x68] sm:$0xff]  ;;  %v212_v15 = vld [vmem:[%s3686_s22 + $0x70] sm:$0xff]  ;;  %680 = vst.msk [vmem:[#allocation2 + $0x80] sm:$0xff] %vm231_vm1, %v3639_v33 }
  0x17   : > { %v213_v16 = vld [vmem:[%s3686_s22 + $0x78] sm:$0xff]  ;;  %v214_v17 = vld [vmem:[%s3686_s22 + $0x80] sm:$0xff]  ;;  %v215_v18 = vld [vmem:[%s3686_s22 + $0x88] sm:$0xff]  ;;  %681 = vst.msk [vmem:[#allocation2 + $0x88] sm:$0xff] %vm231_vm1, %v3639_v33 }
  0x18   : > { %3503 = vmatmul.mubr.msk.f32.gmra.mrb[2].mxu0 %vm231_vm1, %v201_v4  ;;  %v216_v19 = vld [vmem:[%s3686_s22 + $0x90] sm:$0xff]  ;;  %v217_v20 = vld [vmem:[%s3686_s22 + $0x98] sm:$0xff]  ;;  %v218_v21 = vld [vmem:[%s3686_s22 + $0xa0] sm:$0xff]  ;;  %682 = vst.msk [vmem:[#allocation2 + $0x90] sm:$0xff] %vm231_vm1, %v3639_v33 }
  0x19   : > { %3505 = vmatprep.mubr.msk.f32.mxu0 %vm231_vm1, %v202_v5  ;;  %v219_v22 = vld [vmem:[%s3686_s22 + $0xa8] sm:$0xff]  ;;  %v220_v23 = vld [vmem:[%s3686_s22 + $0xb0] sm:$0xff]  ;;  %v221_v24 = vld [vmem:[%s3686_s22 + $0xb8] sm:$0xff]  ;;  %684 = vst.msk [vmem:[#allocation2 + $0xa0] sm:$0xff] %vm231_vm1, %v3639_v33 }
  0x1a   : > { %v222_v25 = vld [vmem:[%s3686_s22 + $0xc0] sm:$0xff]  ;;  %v223_v26 = vld [vmem:[%s3686_s22 + $0xc8] sm:$0xff]  ;;  %v224_v27 = vld [vmem:[%s3686_s22 + $0xd0] sm:$0xff]  ;;  %685 = vst.msk [vmem:[#allocation2 + $0xa8] sm:$0xff] %vm231_vm1, %v3639_v33 }
  0x1b   : > { %v225_v28 = vld [vmem:[%s3686_s22 + $0xd8] sm:$0xff]  ;;  %v226_v29 = vld [vmem:[%s3686_s22 + $0xe0] sm:$0xff]  ;;  %v227_v30 = vld [vmem:[%s3686_s22 + $0xe8] sm:$0xff]  ;;  %686 = vst.msk [vmem:[#allocation2 + $0xb0] sm:$0xff] %vm231_vm1, %v3639_v33 }
  0x1c   : > { %3506 = vmatmul.mubr.msk.f32.gmra.mrb[4].mxu0 %vm231_vm1, %v203_v6  ;;  %v228_v31 = vld [vmem:[%s3686_s22 + $0xf0] sm:$0xff]  ;;  %v229_v32 = vld [vmem:[%s3686_s22 + $0xf8] sm:$0xff]  ;;  %688 = vst.msk [vmem:[#allocation2 + $0xc0] sm:$0xff] %vm231_vm1, %v3639_v33  ;;  %689 = vst.msk [vmem:[#allocation2 + $0xc8] sm:$0xff] %vm231_vm1, %v3639_v33 }
  0x1d   : > { %3508 = vmatprep.mubr.msk.f32.mxu0 %vm231_vm1, %v204_v7  ;;  %690 = vst.msk [vmem:[#allocation2 + $0xd0] sm:$0xff] %vm231_vm1, %v3639_v33  ;;  %692 = vst.msk [vmem:[#allocation2 + $0xe0] sm:$0xff] %vm231_vm1, %v3639_v33  ;;  %v770_v35 = vld [vmem:[#allocation2 + $0x8] sm:$0xff]  ;;  %v771_v36 = vld [vmem:[#allocation2 + $0x10] sm:$0xff] }
  0x1e   : > { %693 = vst.msk [vmem:[#allocation2 + $0xe8] sm:$0xff] %vm231_vm1, %v3639_v33  ;;  %694 = vst.msk [vmem:[#allocation2 + $0xf0] sm:$0xff] %vm231_vm1, %v3639_v33  ;;  %v947_v38 = vmul.f32 %v3904_v37, %v770_v35  ;;  %v948_v39 = vmul.f32 %v3904_v37, %v771_v36  ;;  %v769_v41 = vld [vmem:[#allocation2] sm:$0xff]  ;;  %v1162_v43 = vmul.f32 %v3911_v40, %v771_v36  ;;  %v3940_v2 = vld [vmem:[%s6139_s3 + $0x8] ss:$0 sm:$0xff] }
  0x1f   : > { %696 = vst.msk [vmem:[#allocation2 + $0x100] sm:$0xff] %vm231_vm1, %v3639_v33  ;;  %697 = vst.msk [vmem:[#allocation2 + $0x108] sm:$0xff] %vm231_vm1, %v3639_v33  ;;  %v846_v45 = vmul.f32 %v3916_v42, %v769_v41  ;;  %v1161_v48 = vmul.f32 %v3911_v40, %v770_v35  ;;  %v847_v50 = vmul.f32 %v3916_v42, %v770_v35  ;;  %v773_v55 = vld [vmem:[#allocation2 + $0x20] sm:$0xff]  ;;  %v4009_v35 = vld [vmem:[%s6139_s3 + $0xa] ss:$0 sm:$0xff] }
  0x20   : > { %3509 = vmatmul.mubr.msk.f32.gmra.mrb[6].mxu0 %vm231_vm1, %v205_v8  ;;  %698 = vst.msk [vmem:[#allocation2 + $0x110] sm:$0xff] %vm231_vm1, %v3639_v33  ;;  %700 = vst.msk [vmem:[#allocation2 + $0x120] sm:$0xff] %vm231_vm1, %v3639_v33  ;;  %v1012_v46 = vrot.slane %v947_v38, 1  ;;  %v1013_v47 = vrot.slane %v948_v39, 1  ;;  %v1259_v54 = vrot.slane %v1162_v43, 2  ;;  %v848_v57 = vmul.f32 %v3916_v42, %v771_v36  ;;  %v777_v3 = vld [vmem:[#allocation2 + $0x40] sm:$0xff] }
  0x21   : > { %3511 = vmatprep.mubr.msk.f32.mxu0 %vm231_vm1, %v206_v9  ;;  %701 = vst.msk [vmem:[#allocation2 + $0x128] sm:$0xff] %vm231_vm1, %v3639_v33  ;;  %702 = vst.msk [vmem:[#allocation2 + $0x130] sm:$0xff] %vm231_vm1, %v3639_v33  ;;  %v1258_v53 = vrot.slane %v1161_v48, 2  ;;  %v3933_v60 = vld [vmem:[%s6139_s3 + $0x5] ss:$0 sm:$0xff]  ;;  %v1439_v1 = vmul.f32 %v3927_v56, %v773_v55 }
  0x22   : > { %704 = vst.msk [vmem:[#allocation2 + $0x140] sm:$0xff] %vm231_vm1, %v3639_v33  ;;  %705 = vst.msk [vmem:[#allocation2 + $0x148] sm:$0xff] %vm231_vm1, %v3639_v33  ;;  %v1014_v51 = vsel %vm1011_vm3, %v1012_v46, %v1013_v47  ;;  %v1108_v52 = vadd.f32 %v1012_v46, %v846_v45  ;;  %v1110_v4 = vadd.f32 %v1013_v47, %v848_v57 }
  0x23   : > { %706 = vst.msk [vmem:[#allocation2 + $0x150] sm:$0xff] %vm231_vm1, %v3639_v33  ;;  %708 = vst.msk [vmem:[#allocation2 + $0x160] sm:$0xff] %vm231_vm1, %v3639_v33  ;;  %v1109_v59 = vadd.f32 %v1014_v51, %v847_v50  ;;  %v1260_v63 = vsel %vm1257_vm4, %v1258_v53, %v1259_v54 }
  0x24   : > { %3512 = vmatmul.mubr.msk.f32.gmra.mrb[8].mxu0 %vm231_vm1, %v207_v10  ;;  %709 = vst.msk [vmem:[#allocation2 + $0x168] sm:$0xff] %vm231_vm1, %v3639_v33  ;;  %710 = vst.msk [vmem:[#allocation2 + $0x170] sm:$0xff] %vm231_vm1, %v3639_v33  ;;  %v1386_v0 = vadd.f32 %v1258_v53, %v1108_v52  ;;  %v789_v53 = vld [vmem:[#allocation2 + $0xa0] sm:$0xff] }
  0x25   : > { %3514 = vmatprep.mubr.msk.f32.mxu0 %vm231_vm1, %v208_v11  ;;  %712 = vst.msk [vmem:[#allocation2 + $0x180] sm:$0xff] %vm231_vm1, %v3639_v33  ;;  %713 = vst.msk [vmem:[#allocation2 + $0x188] sm:$0xff] %vm231_vm1, %v3639_v33  ;;  %v3952_v10 = vadd.f32 %v1260_v63, %v1109_v59 }
  0x26   : > { %714 = vst.msk [vmem:[#allocation2 + $0x190] sm:$0xff] %vm231_vm1, %v3639_v33  ;;  %716 = vst.msk [vmem:[#allocation2 + $0x1a0] sm:$0xff] %vm231_vm1, %v3639_v33 }
  0x27   : > { %717 = vst.msk [vmem:[#allocation2 + $0x1a8] sm:$0xff] %vm231_vm1, %v3639_v33  ;;  %718 = vst.msk [vmem:[#allocation2 + $0x1b0] sm:$0xff] %vm231_vm1, %v3639_v33 }
  0x28   : > { %3515 = vmatmul.mubr.msk.f32.gmra.mrb[10].mxu0 %vm231_vm1, %v209_v12  ;;  %720 = vst.msk [vmem:[#allocation2 + $0x1c0] sm:$0xff] %vm231_vm1, %v3639_v33  ;;  %721 = vst.msk [vmem:[#allocation2 + $0x1c8] sm:$0xff] %vm231_vm1, %v3639_v33 }
  0x29   : > { %3517 = vmatprep.mubr.msk.f32.mxu0 %vm231_vm1, %v210_v13  ;;  %722 = vst.msk [vmem:[#allocation2 + $0x1d0] sm:$0xff] %vm231_vm1, %v3639_v33  ;;  %724 = vst.msk [vmem:[#allocation2 + $0x1e0] sm:$0xff] %vm231_vm1, %v3639_v33  ;;  %v3961_v13 = vmul.f32 %v3916_v42, %v773_v55 }
  0x2a   : > { %725 = vst.msk [vmem:[#allocation2 + $0x1e8] sm:$0xff] %vm231_vm1, %v3639_v33  ;;  %726 = vst.msk [vmem:[#allocation2 + $0x1f0] sm:$0xff] %vm231_vm1, %v3639_v33 }
  0x2b   : > { %728 = vst.msk [vmem:[#allocation2 + $0x200] sm:$0xff] %vm231_vm1, %v3639_v33  ;;  %729 = vst.msk [vmem:[#allocation2 + $0x208] sm:$0xff] %vm231_vm1, %v3639_v33 }
  0x2c   : > { %3518 = vmatmul.mubr.msk.f32.gmra.mrb[12].mxu0 %vm231_vm1, %v211_v14  ;;  %730 = vst.msk [vmem:[#allocation2 + $0x210] sm:$0xff] %vm231_vm1, %v3639_v33  ;;  %732 = vst.msk [vmem:[#allocation2 + $0x220] sm:$0xff] %vm231_vm1, %v3639_v33  ;;  %v3964_v14 = vmul.f32 %v3916_v42, %v777_v3 }
  0x2d   : > { %3520 = vmatprep.mubr.msk.f32.mxu0 %vm231_vm1, %v212_v15  ;;  %733 = vst.msk [vmem:[#allocation2 + $0x228] sm:$0xff] %vm231_vm1, %v3639_v33  ;;  %734 = vst.msk [vmem:[#allocation2 + $0x230] sm:$0xff] %vm231_vm1, %v3639_v33  ;;  %v3967_v15 = vmul.f32 %v3927_v56, %v777_v3 }
  0x2e   : > { %667 = vst.msk [vmem:[#allocation2 + $0x18] sm:$0x1] %vm666_vm2, %v3639_v33  ;;  %671 = vst.msk [vmem:[#allocation2 + $0x38] sm:$0x1] %vm666_vm2, %v3639_v33 }
  0x2f   : > { %675 = vst.msk [vmem:[#allocation2 + $0x58] sm:$0x1] %vm666_vm2, %v3639_v33  ;;  %679 = vst.msk [vmem:[#allocation2 + $0x78] sm:$0x1] %vm666_vm2, %v3639_v33 }
  0x30   : > { %3521 = vmatmul.mubr.msk.f32.gmra.mrb[14].mxu0 %vm231_vm1, %v213_v16  ;;  %683 = vst.msk [vmem:[#allocation2 + $0x98] sm:$0x1] %vm666_vm2, %v3639_v33  ;;  %687 = vst.msk [vmem:[#allocation2 + $0xb8] sm:$0x1] %vm666_vm2, %v3639_v33  ;;  %v3969_v16 = vadd.f32 %v1439_v1, %v1386_v0 }
  0x31   : > { %3523 = vmatprep.mubr.msk.f32.mxu0 %vm231_vm1, %v214_v17  ;;  %691 = vst.msk [vmem:[#allocation2 + $0xd8] sm:$0x1] %vm666_vm2, %v3639_v33  ;;  %695 = vst.msk [vmem:[#allocation2 + $0xf8] sm:$0x1] %vm666_vm2, %v3639_v33  ;;  %v781_v17 = vld [vmem:[#allocation2 + $0x60] sm:$0xff] }
  0x32   : > { %699 = vst.msk [vmem:[#allocation2 + $0x118] sm:$0x1] %vm666_vm2, %v3639_v33  ;;  %703 = vst.msk [vmem:[#allocation2 + $0x138] sm:$0x1] %vm666_vm2, %v3639_v33  ;;  %v4012_v36 = vmul.f32 %v3927_v56, %v781_v17 }
  0x33   : > { %707 = vst.msk [vmem:[#allocation2 + $0x158] sm:$0x1] %vm666_vm2, %v3639_v33  ;;  %711 = vst.msk [vmem:[#allocation2 + $0x178] sm:$0x1] %vm666_vm2, %v3639_v33 }
  0x34   : > { %3524 = vmatmul.mubr.msk.f32.gmra.mrb[16].mxu0 %vm231_vm1, %v215_v18  ;;  %715 = vst.msk [vmem:[#allocation2 + $0x198] sm:$0x1] %vm666_vm2, %v3639_v33  ;;  %719 = vst.msk [vmem:[#allocation2 + $0x1b8] sm:$0x1] %vm666_vm2, %v3639_v33 }
  0x35   : > { %3526 = vmatprep.mubr.msk.f32.mxu0 %vm231_vm1, %v216_v19  ;;  %723 = vst.msk [vmem:[#allocation2 + $0x1d8] sm:$0x1] %vm666_vm2, %v3639_v33  ;;  %727 = vst.msk [vmem:[#allocation2 + $0x1f8] sm:$0x1] %vm666_vm2, %v3639_v33  ;;  %v772_v44 = vld [vmem:[#allocation2 + $0x18] sm:$0x1] }
  0x36   : > { %731 = vst.msk [vmem:[#allocation2 + $0x218] sm:$0x1] %vm666_vm2, %v3639_v33  ;;  %735 = vst.msk [vmem:[#allocation2 + $0x238] sm:$0x1] %vm666_vm2, %v3639_v33  ;;  %v1163_v49 = vmul.f32 %v3911_v40, %v772_v44  ;;  %v776_v61 = vld [vmem:[#allocation2 + $0x38] sm:$0x1] }
  0x37   : > { %v780_v62 = vld [vmem:[#allocation2 + $0x58] sm:$0x1]  ;;  %v3943_v5 = vmul.f32 %v3911_v40, %v776_v61  ;;  %v3950_v8 = vmul.f32 %v3933_v60, %v776_v61  ;;  %v3974_v19 = vld [vmem:[%s6139_s3 + $0x6] ss:$0 sm:$0xff] }
  0x38   : > { %3527 = vmatmul.mubr.msk.f32.gmra.mrb[18].mxu0 %vm231_vm1, %v217_v20  ;;  %v1261_v58 = vrot.slane %v1163_v49, 2  ;;  %v3946_v6 = vmul.f32 %v3911_v40, %v780_v62  ;;  %v784_v9 = vld [vmem:[#allocation2 + $0x78] sm:$0x1]  ;;  %v3955_v11 = vmul.f32 %v3933_v60, %v780_v62  ;;  %v3958_v12 = vmul.f32 %v3940_v2, %v780_v62 }
  0x39   : > { %3529 = vmatprep.mubr.msk.f32.mxu0 %vm231_vm1, %v218_v21  ;;  %v788_v18 = vld [vmem:[#allocation2 + $0x98] sm:$0x1]  ;;  %v3979_v21 = vmul.f32 %v3911_v40, %v784_v9  ;;  %v4015_v38 = vmul.f32 %v3974_v19, %v781_v17 }
  0x3a   : > { %v1262_v7 = vsel %vm1257_vm4, %v1259_v54, %v1261_v58  ;;  %v4004_v33 = vmul.f32 %v3911_v40, %v788_v18  ;;  %v4018_v39 = vmul.f32 %v3933_v60, %v788_v18  ;;  %v4021_v41 = vmul.f32 %v3940_v2, %v788_v18  ;;  %v792_v43 = vld [vmem:[#allocation2 + $0xb8] sm:$0x1]  ;;  %v793_v18 = vld [vmem:[#allocation2 + $0xc0] sm:$0xff] }
  0x3b   : > { %v3976_v20 = vadd.f32 %v1262_v7, %v1110_v4  ;;  %v4040_v57 = vmul.f32 %v3911_v40, %v792_v43  ;;  %v4043_v58 = vmul.f32 %v3933_v60, %v792_v43  ;;  %v796_v59 = vld [vmem:[#allocation2 + $0xd8] sm:$0x1]  ;;  %v4049_v1 = vmul.f32 %v3940_v2, %v792_v43 }
  0x3c   : > { %3530 = vmatmul.mubr.msk.f32.gmra.mrb[20].mxu0 %vm231_vm1, %v219_v22  ;;  %v3982_v22 = vmul.f32 %v3933_v60, %v784_v9  ;;  %6161 = vst [vmem:[#allocation3_spill] sm:$0xff] %v4004_v33  ;;  %6162 = vst [vmem:[#allocation4_spill] sm:$0xff] %v4018_v39  ;;  %v4063_v43 = vmul.f32 %v3933_v60, %v796_v59  ;;  %v4076_v63 = vmul.f32 %v3916_v42, %v793_v18 }
  0x3d   : > { %3532 = vmatprep.mubr.msk.f32.mxu0 %vm231_vm1, %v220_v23  ;;  %v3985_v23 = vmul.f32 %v3940_v2, %v784_v9  ;;  %6163 = vst [vmem:[#allocation5_spill] sm:$0xff] %v4040_v57  ;;  %6164 = vst [vmem:[#allocation6_spill] sm:$0xff] %v4043_v58  ;;  %v4053_v9 = vmul.f32 %v3916_v42, %v789_v53 }
  0x3e   : > { %6165 = vst [vmem:[#allocation7_spill] sm:$0xff] %v4049_v1  ;;  %6168 = vst [vmem:[#allocation10_spill] sm:$0xff] %v4063_v43 }
  0x3f   : > { %6169 = vst [vmem:[#allocation11_spill] sm:$0xff] %v4076_v63 }
  0x40   : > { %3533 = vmatmul.mubr.msk.f32.gmra.mrb[22].mxu0 %vm231_vm1, %v221_v24  ;;  %v3990_v24 = vld [vmem:[%s6139_s3 + $0x9] ss:$0 sm:$0xff] }
  0x41   : > { %3535 = vmatprep.mubr.msk.f32.mxu0 %vm231_vm1, %v222_v25  ;;  %v3993_v25 = vmul.f32 %v3974_v19, %v777_v3 }
  0x44   : > { %3536 = vmatmul.mubr.msk.f32.gmra.mrb[24].mxu0 %vm231_vm1, %v223_v26 }
  0x45   : > { %3538 = vmatprep.mubr.msk.f32.mxu0 %vm231_vm1, %v224_v27 }
  0x48   : > { %3539 = vmatmul.mubr.msk.f32.gmra.mrb[26].mxu0 %vm231_vm1, %v225_v28 }
  0x49   : > { %3541 = vmatprep.mubr.msk.f32.mxu0 %vm231_vm1, %v226_v29 }
  0x4c   : > { %3542 = vmatmul.mubr.msk.f32.gmra.mrb[28].mxu0 %vm231_vm1, %v227_v30 }
  0x4d   : > { %3544 = vmatprep.mubr.msk.f32.mxu0 %vm231_vm1, %v228_v31  ;;  %v4001_v31 = vmul.f32 %v3916_v42, %v781_v17  ;;  %v4056_v17 = vmul.f32 %v3927_v56, %v789_v53 }
  0x4f   : > { %6166 = vst [vmem:[#allocation8_spill] sm:$0xff] %v4056_v17 }
  0x50   : > { %3545 = vmatmul.mubr.msk.f32.gmra.mrb[30].mxu0 %vm231_vm1, %v229_v32  ;;  %v785_v32 = vld [vmem:[#allocation2 + $0x80] sm:$0xff] }
  0x51   : > { %v4029_v50 = vmul.f32 %v3916_v42, %v785_v32  ;;  %v4032_v51 = vmul.f32 %v3927_v56, %v785_v32  ;;  %v4035_v52 = vmul.f32 %v3974_v19, %v785_v32 }
  0xe7   : > { %v3501_v34 = vpop.f32.mrb[0].mxu0 }
  0xe8   : > { %v563_v44 = vmul.f32 %v3501_v34, %v3990_v24  ;;  %v398_v45 = vpop.f32.mrb[1].mxu0 }
  0xe9   : > { %v562_v49 = vmul.f32 %v3990_v24, %v398_v45 }
  0xea   : > { %v600_v54 = vadd.f32 %v4009_v35, %v563_v44  ;;  %v4060_v44 = vmul.f32 %v3911_v40, %v796_v59 }
  0xeb   : > { %v599_v61 = vadd.f32 %v4009_v35, %v562_v49  ;;  %v3504_v62 = vpop.f32.mrb[2].mxu0  ;;  %v4068_v49 = vmul.f32 %v3974_v19, %v789_v53 }
  0xec   : > { %v632_v3 = vmax.f32 %v600_v54, 0.0  ;;  %v565_v4 = vmul.f32 %v3504_v62, %v3990_v24  ;;  %v408_v7 = vpop.f32.mrb[3].mxu0  ;;  %6167 = vst [vmem:[#allocation9_spill] sm:$0xff] %v4060_v44  ;;  %v4083_v62 = vmul.f32 %v3927_v56, %v793_v18 }
  0xed   : > { %v631_v32 = vmax.f32 %v599_v61, 0.0  ;;  %v564_v34 = vmul.f32 %v3990_v24, %v408_v7 }
  0xee   : > { %738 = vst.msk [vmem:[#allocation2 + $0x30] sm:$0xff] %vm231_vm1, %v632_v3  ;;  %v602_v45 = vadd.f32 %v4009_v35, %v565_v4  ;;  %v4079_v3 = vmul.f32 %v3940_v2, %v796_v59  ;;  %v800_v4 = vld [vmem:[#allocation2 + $0xf8] sm:$0x1]  ;;  %6171 = vst [vmem:[#allocation13_spill] sm:$0xff] %v4083_v62 }
  0xef   : > { %737 = vst.msk [vmem:[#allocation2 + $0x28] sm:$0xff] %vm231_vm1, %v631_v32  ;;  %v601_v61 = vadd.f32 %v4009_v35, %v564_v34  ;;  %v3507_v7 = vpop.f32.mrb[4].mxu0  ;;  %v4086_v32 = vmul.f32 %v3974_v19, %v793_v18  ;;  %v797_v34 = vld [vmem:[#allocation2 + $0xe0] sm:$0xff]  ;;  %v4097_v27 = vmul.f32 %v3933_v60, %v800_v4  ;;  %v4100_v18 = vmul.f32 %v3940_v2, %v800_v4 }
  0xf0   : > { %6170 = vst [vmem:[#allocation12_spill] sm:$0xff] %v4079_v3  ;;  %v634_v53 = vmax.f32 %v602_v45, 0.0  ;;  %v567_v46 = vmul.f32 %v3507_v7, %v3990_v24  ;;  %v418_v54 = vpop.f32.mrb[5].mxu0  ;;  %v4094_v7 = vmul.f32 %v3911_v40, %v800_v4  ;;  %v4111_v47 = vmul.f32 %v3916_v42, %v797_v34 }
  0xf1   : > { %6172 = vst [vmem:[#allocation14_spill] sm:$0xff] %v4086_v32  ;;  %v633_v0 = vmax.f32 %v601_v61, 0.0  ;;  %v566_v55 = vmul.f32 %v3990_v24, %v418_v54  ;;  %6174 = vst [vmem:[#allocation16_spill] sm:$0xff] %v4097_v27  ;;  %v4114_v59 = vmul.f32 %v3927_v56, %v797_v34 }
  0xf2   : > { %740 = vst.msk [vmem:[#allocation2 + $0x50] sm:$0xff] %vm231_vm1, %v634_v53  ;;  %v604_v45 = vadd.f32 %v4009_v35, %v567_v46  ;;  %6173 = vst [vmem:[#allocation15_spill] sm:$0xff] %v4094_v7  ;;  %v4107_v53 = vld [vmem:[%s6139_s3 + $0x4] ss:$0 sm:$0xff] }
  0xf3   : > { %6175 = vst [vmem:[#allocation17_spill] sm:$0xff] %v4100_v18  ;;  %739 = vst.msk [vmem:[#allocation2 + $0x48] sm:$0xff] %vm231_vm1, %v633_v0  ;;  %v603_v54 = vadd.f32 %v4009_v35, %v566_v55  ;;  %v3510_v61 = vpop.f32.mrb[6].mxu0  ;;  %v4118_v55 = vmul.f32 %v3974_v19, %v797_v34 }
  0xf4   : > { %6176 = vst [vmem:[#allocation18_spill] sm:$0xff] %v4111_v47  ;;  %6177 = vst [vmem:[#allocation19_spill] sm:$0xff] %v4114_v59  ;;  %v636_v4 = vmax.f32 %v604_v45, 0.0  ;;  %v569_v48 = vmul.f32 %v3510_v61, %v3990_v24  ;;  %v428_v0 = vpop.f32.mrb[7].mxu0 }
  0xf5   : > { %6178 = vst [vmem:[#allocation20_spill] sm:$0xff] %v4118_v55  ;;  %v635_v26 = vmax.f32 %v603_v54, 0.0  ;;  %v568_v30 = vmul.f32 %v3990_v24, %v428_v0  ;;  %v4122_v28 = vld [vmem:[#allocation2 + $0x30] sm:$0xff] }
  0xf6   : > { %742 = vst.msk [vmem:[#allocation2 + $0x70] sm:$0xff] %vm231_vm1, %v636_v4  ;;  %v606_v45 = vadd.f32 %v4009_v35, %v569_v48  ;;  %v4128_v61 = vld [vmem:[#allocation2 + $0x28] sm:$0xff]  ;;  %v4132_v34 = vmul.f32 %v4107_v53, %v4122_v28  ;;  %v4136_v54 = vmul.f32 %v3933_v60, %v4122_v28  ;;  %v4140_v0 = vmul.f32 %v3927_v56, %v4122_v28 }
  0xf7   : > { %741 = vst.msk [vmem:[#allocation2 + $0x68] sm:$0xff] %vm231_vm1, %v635_v26  ;;  %v605_v4 = vadd.f32 %v4009_v35, %v568_v30  ;;  %v3513_v29 = vpop.f32.mrb[8].mxu0  ;;  %v4146_v48 = vmul.f32 %v3904_v37, %v4128_v61  ;;  %v4150_v46 = vmul.f32 %v3911_v40, %v4128_v61  ;;  %v1440_v44 = vmul.f32 %v3927_v56, %v4128_v61 }
  0xf8   : > { %v638_v7 = vmax.f32 %v606_v45, 0.0  ;;  %v571_v27 = vmul.f32 %v3513_v29, %v3990_v24  ;;  %v438_v59 = vpop.f32.mrb[9].mxu0  ;;  %v1540_v26 = vmul.f32 %v4107_v53, %v4128_v61  ;;  %v6152_v30 = vrot.slane %v4132_v34, 1 }
  0xf9   : > { %v637_v18 = vmax.f32 %v605_v4, 0.0  ;;  %v570_v43 = vmul.f32 %v3990_v24, %v438_v59  ;;  %v6150_v57 = vrot.slane %v4146_v48, 1  ;;  %v1488_v29 = vadd.f32 %v1440_v44, %v3952_v10 }
  0xfa   : > { %744 = vst.msk [vmem:[#allocation2 + $0x90] sm:$0xff] %vm231_vm1, %v638_v7  ;;  %v608_v62 = vadd.f32 %v4009_v35, %v571_v27  ;;  %v4163_v45 = vld [vmem:[#allocation2 + $0x48] sm:$0xff]  ;;  %v1604_v47 = vrot.slane %v1540_v26, 1  ;;  %v1753_v3 = vmul.f32 %v3933_v60, %v4128_v61 }
  0xfb   : > { %743 = vst.msk [vmem:[#allocation2 + $0x88] sm:$0xff] %vm231_vm1, %v637_v18  ;;  %v607_v59 = vadd.f32 %v4009_v35, %v570_v43  ;;  %v3516_v4 = vpop.f32.mrb[10].mxu0  ;;  %v4172_v55 = vmul.f32 %v3904_v37, %v4163_v45  ;;  %v1111_v27 = vadd.f32 %v6150_v57, %v3961_v13  ;;  %v4179_v10 = vmul.f32 %v3911_v40, %v4163_v45 }
  0xfc   : > { %v640_v44 = vmax.f32 %v608_v62, 0.0  ;;  %v573_v7 = vmul.f32 %v3516_v4, %v3990_v24  ;;  %v448_v26 = vpop.f32.mrb[11].mxu0  ;;  %v1606_v43 = vsel %vm1011_vm3, %v1604_v47, %v6152_v30  ;;  %v1700_v18 = vadd.f32 %v1604_v47, %v3969_v16 }
  0xfd   : > { %v639_v58 = vmax.f32 %v607_v59, 0.0  ;;  %v572_v33 = vmul.f32 %v3990_v24, %v448_v26  ;;  %v6151_v32 = vrot.slane %v4172_v55, 1  ;;  %v6153_v13 = vrot.slane %v4179_v10, 2 }
  0xfe   : > { %746 = vst.msk [vmem:[#allocation2 + $0xb0] sm:$0xff] %vm231_vm1, %v640_v44  ;;  %v610_v62 = vadd.f32 %v4009_v35, %v573_v7  ;;  %v6179_v4 = vrot.slane %v4150_v46, 2  ;;  %v1701_v17 = vadd.f32 %v1606_v43, %v1488_v29  ;;  %v1849_v63 = vrot.slane %v1753_v3, 2 }
  0xff   : > { %745 = vst.msk [vmem:[#allocation2 + $0xa8] sm:$0xff] %vm231_vm1, %v639_v58  ;;  %v609_v16 = vadd.f32 %v4009_v35, %v572_v33  ;;  %v3519_v47 = vpop.f32.mrb[12].mxu0  ;;  %v1114_v59 = vadd.f32 %v6151_v32, %v3964_v14  ;;  %v1850_v26 = vrot.slane %v4136_v54, 2  ;;  %v2031_v44 = vmul.f32 %v3974_v19, %v4163_v45  ;;  %v4207_v33 = vld [vmem:[#allocation2 + $0x50] sm:$0xff] }
 0x100   : > { %v1389_v57 = vadd.f32 %v6179_v4, %v1111_v27  ;;  %v4204_v27 = vld [vmem:[%s6139_s3 + $0x7] ss:$0 sm:$0xff]  ;;  %v642_v3 = vmax.f32 %v610_v62, 0.0  ;;  %v575_v58 = vmul.f32 %v3519_v47, %v3990_v24  ;;  %v458_v29 = vpop.f32.mrb[13].mxu0  ;;  %v1977_v14 = vadd.f32 %v1849_v63, %v1700_v18 }
 0x101   : > { %v641_v43 = vmax.f32 %v609_v16, 0.0  ;;  %v574_v54 = vmul.f32 %v3990_v24, %v458_v29  ;;  %v4215_v4 = vadd.f32 %v6153_v13, %v1114_v59  ;;  %v1851_v32 = vsel %vm1257_vm4, %v1849_v63, %v1850_v26 }
 0x102   : > { %v4210_v7 = vadd.f32 %v3967_v15, %v1389_v57  ;;  %748 = vst.msk [vmem:[#allocation2 + $0xd0] sm:$0xff] %vm231_vm1, %v642_v3  ;;  %v612_v62 = vadd.f32 %v4009_v35, %v575_v58  ;;  %v1978_v47 = vadd.f32 %v1851_v32, %v1701_v17  ;;  %v2078_v30 = vadd.f32 %v3993_v25, %v1977_v14 }
 0x103   : > { %v2131_v15 = vmul.f32 %v4204_v27, %v4163_v45  ;;  %747 = vst.msk [vmem:[#allocation2 + $0xc8] sm:$0xff] %vm231_vm1, %v641_v43  ;;  %v611_v57 = vadd.f32 %v4009_v35, %v574_v54  ;;  %v3522_v18 = vpop.f32.mrb[14].mxu0  ;;  %v4227_v16 = vmul.f32 %v4204_v27, %v4207_v33  ;;  %v2344_v63 = vmul.f32 %v3940_v2, %v4163_v45 }
 0x104   : > { %v2345_v17 = vmul.f32 %v3940_v2, %v4207_v33  ;;  %v644_v32 = vmax.f32 %v612_v62, 0.0  ;;  %v577_v25 = vmul.f32 %v3522_v18, %v3990_v24  ;;  %v468_v59 = vpop.f32.mrb[15].mxu0  ;;  %v2079_v3 = vadd.f32 %v2031_v44, %v1978_v47 }
 0x105   : > { %v2195_v58 = vrot.slane %v2131_v15, 1  ;;  %v643_v29 = vmax.f32 %v611_v57, 0.0  ;;  %v576_v14 = vmul.f32 %v3990_v24, %v468_v59  ;;  %v2196_v43 = vrot.slane %v4227_v16, 1 }
 0x106   : > { %v2440_v54 = vrot.slane %v2344_v63, 2  ;;  %750 = vst.msk [vmem:[#allocation2 + $0xf0] sm:$0xff] %vm231_vm1, %v644_v32  ;;  %v614_v13 = vadd.f32 %v4009_v35, %v577_v25  ;;  %v2441_v39 = vrot.slane %v2345_v17, 2  ;;  %v1489_v62 = vadd.f32 %v4140_v0, %v3976_v20  ;;  %v4253_v32 = vld [vmem:[%s6139_s3 + $0xb] ss:$0 sm:$0xff] }
 0x107   : > { %v2291_v1 = vadd.f32 %v2195_v58, %v2078_v30  ;;  %749 = vst.msk [vmem:[#allocation2 + $0xe8] sm:$0xff] %vm231_vm1, %v643_v29  ;;  %v613_v44 = vadd.f32 %v4009_v35, %v576_v14  ;;  %v3525_v47 = vpop.f32.mrb[16].mxu0  ;;  %v2197_v15 = vsel %vm1011_vm3, %v2195_v58, %v2196_v43  ;;  %v6180_v57 = vrot.slane %v3950_v8, 2  ;;  %v4258_v29 = vld [vmem:[#allocation2 + $0x68] sm:$0xff] }
 0x108   : > { %v2032_v16 = vmul.f32 %v3974_v19, %v4207_v33  ;;  %v646_v30 = vmax.f32 %v614_v13, 0.0  ;;  %v579_v63 = vmul.f32 %v3525_v47, %v3990_v24  ;;  %v478_v17 = vpop.f32.mrb[17].mxu0  ;;  %v2292_v20 = vadd.f32 %v2197_v15, %v2079_v3  ;;  %v4265_v14 = vld [vmem:[%s6139_s3 + $0xc] ss:$0 sm:$0xff] }
 0x109   : > { %v1853_v18 = vsel %vm1257_vm4, %v1850_v26, %v6180_v57  ;;  %v2442_v0 = vsel %vm1257_vm4, %v2440_v54, %v2441_v39  ;;  %v645_v25 = vmax.f32 %v613_v44, 0.0  ;;  %v578_v8 = vmul.f32 %v3990_v24, %v478_v17 }
 0x10a   : > { %v2568_v59 = vadd.f32 %v2440_v54, %v2291_v1  ;;  %v6181_v26 = vrot.slane %v4132_v34, 1  ;;  %752 = vst.msk [vmem:[#allocation2 + $0x110] sm:$0xff] %vm231_vm1, %v646_v30  ;;  %v616_v13 = vadd.f32 %v4009_v35, %v579_v63  ;;  %v2569_v3 = vadd.f32 %v2442_v0, %v2292_v20 }
 0x10b   : > { %v6182_v44 = vrot.slane %v3958_v12, 2  ;;  %v850_v1 = vmul.f32 %v3916_v42, %v4128_v61  ;;  %751 = vst.msk [vmem:[#allocation2 + $0x108] sm:$0xff] %vm231_vm1, %v645_v25  ;;  %v615_v34 = vadd.f32 %v4009_v35, %v578_v8  ;;  %v3528_v54 = vpop.f32.mrb[18].mxu0  ;;  %v4277_v57 = vmul.f32 %v3904_v37, %v4122_v28 }
 0x10c   : > { %v1702_v58 = vadd.f32 %v6181_v26, %v1489_v62  ;;  %v2621_v62 = vmul.f32 %v4253_v32, %v2568_v59  ;;  %v648_v30 = vmax.f32 %v616_v13, 0.0  ;;  %v581_v12 = vmul.f32 %v3528_v54, %v3990_v24  ;;  %v488_v63 = vpop.f32.mrb[19].mxu0 }
 0x10d   : > { %v2444_v47 = vsel %vm1257_vm4, %v2441_v39, %v6182_v44  ;;  %v2622_v39 = vmul.f32 %v4253_v32, %v2569_v3  ;;  %v4283_v61 = vmul.f32 %v3904_v37, %v4258_v29  ;;  %v647_v17 = vmax.f32 %v615_v34, 0.0 }
 0x10e   : > { %v1979_v15 = vadd.f32 %v1853_v18, %v1702_v58  ;;  %v580_v20 = vmul.f32 %v3990_v24, %v488_v63  ;;  %v2674_v0 = vadd.f32 %v4265_v14, %v2621_v62  ;;  %754 = vst.msk [vmem:[#allocation2 + $0x130] sm:$0xff] %vm231_vm1, %v648_v30  ;;  %v618_v25 = vadd.f32 %v4009_v35, %v581_v12 }
 0x10f   : > { %v2675_v8 = vadd.f32 %v4265_v14, %v2622_v39  ;;  %v6158_v59 = vrot.slane %v4277_v57, 1  ;;  %v6156_v26 = vrot.slane %v4283_v61, 1  ;;  %753 = vst.msk [vmem:[#allocation2 + $0x128] sm:$0xff] %vm231_vm1, %v647_v17  ;;  %v3531_v44 = vpop.f32.mrb[20].mxu0  ;;  %v6183_v30 = vrot.slane %v4146_v48, 1 }
 0x110   : > { %v2080_v18 = vadd.f32 %v2032_v16, %v1979_v15  ;;  %v617_v58 = vadd.f32 %v4009_v35, %v580_v20  ;;  %v2771_v13 = vrot.slane %v2674_v0, 7  ;;  %v4296_v16 = vmul.f32 %v3911_v40, %v4122_v28  ;;  %v498_v15 = vpop.f32.mrb[21].mxu0 }
 0x111   : > { %v650_v34 = vmax.f32 %v618_v25, 0.0  ;;  %v2772_v54 = vrot.slane %v2675_v8, 7  ;;  %v583_v62 = vmul.f32 %v3531_v44, %v3990_v24  ;;  %v1017_v12 = vsel %vm1011_vm3, %v6183_v30, %v6158_v59 }
 0x112   : > { %v2293_v3 = vadd.f32 %v2196_v43, %v2080_v18  ;;  %v649_v63 = vmax.f32 %v617_v58, 0.0  ;;  %v582_v43 = vmul.f32 %v3990_v24, %v498_v15  ;;  %v1112_v17 = vadd.f32 %v1017_v12, %v850_v1 }
 0x113   : > { %756 = vst.msk [vmem:[#allocation2 + $0x150] sm:$0xff] %vm231_vm1, %v650_v34  ;;  %v2773_v20 = vsel %vm2770_vm5, %v2771_v13, %v2772_v54  ;;  %v620_v0 = vadd.f32 %v4009_v35, %v583_v62  ;;  %v4311_v18 = vadd.f32 %v6156_v26, %v4001_v31  ;;  %v1264_v48 = vrot.slane %v4296_v16, 2  ;;  %v3534_v25 = vpop.f32.mrb[22].mxu0 }
 0x114   : > { %v2570_v39 = vadd.f32 %v2444_v47, %v2293_v3  ;;  %755 = vst.msk [vmem:[#allocation2 + $0x148] sm:$0xff] %vm231_vm1, %v649_v63  ;;  %3549 = vmatprep.mubr.msk.f32.mxu1 %vm231_vm1, %v2773_v20  ;;  %v619_v1 = vadd.f32 %v4009_v35, %v582_v43  ;;  %v1443_v8 = vmul.f32 %v3927_v56, %v4163_v45  ;;  %v6184_v3 = vrot.slane %v4150_v46, 2  ;;  %v508_v34 = vpop.f32.mrb[23].mxu0 }
 0x115   : > { %v1542_v58 = vmul.f32 %v4107_v53, %v4163_v45  ;;  %v652_v13 = vmax.f32 %v620_v0, 0.0  ;;  %v585_v31 = vmul.f32 %v3534_v25, %v3990_v24  ;;  %v4328_v16 = vmul.f32 %v4107_v53, %v4207_v33 }
 0x116   : > { %v2623_v47 = vmul.f32 %v4253_v32, %v2570_v39  ;;  %v1265_v44 = vsel %vm1257_vm4, %v6184_v3, %v1264_v48  ;;  %v651_v15 = vmax.f32 %v619_v1, 0.0  ;;  %v4333_v39 = vld [vmem:[#allocation2 + $0x70] sm:$0xff]  ;;  %v1756_v43 = vmul.f32 %v3933_v60, %v4163_v45 }
 0x117   : > { %v1390_v30 = vadd.f32 %v1265_v44, %v1112_v17  ;;  %v1607_v12 = vrot.slane %v1542_v58, 1  ;;  %758 = vst.msk [vmem:[#allocation2 + $0x170] sm:$0xff] %vm231_vm1, %v652_v13  ;;  %v622_v63 = vadd.f32 %v4009_v35, %v585_v31  ;;  %v6157_v46 = vrot.slane %v4328_v16, 1  ;;  %v3537_v25 = vpop.f32.mrb[24].mxu0 }
 0x118   : > { %v2676_v62 = vadd.f32 %v4265_v14, %v2623_v47  ;;  %v1757_v20 = vmul.f32 %v3933_v60, %v4207_v33  ;;  %757 = vst.msk [vmem:[#allocation2 + $0x168] sm:$0xff] %vm231_vm1, %v651_v15  ;;  %v2034_v1 = vmul.f32 %v3974_v19, %v4258_v29  ;;  %v1854_v31 = vrot.slane %v1756_v43, 2  ;;  %v4347_v44 = vpop.f32.mrb[25].mxu0 }
 0x119   : > { %v1491_v47 = vadd.f32 %v1443_v8, %v1390_v30  ;;  %v1703_v17 = vadd.f32 %v1607_v12, %v4210_v7  ;;  %v654_v58 = vmax.f32 %v622_v63, 0.0  ;;  %v1609_v13 = vsel %vm1011_vm3, %v1607_v12, %v6157_v46 }
 0x11a   : > { %v2774_v0 = vrot.slane %v2676_v62, 7  ;;  %v1855_v3 = vrot.slane %v1757_v20, 2  ;;  %v2133_v8 = vmul.f32 %v4204_v27, %v4258_v29  ;;  %v4354_v7 = vmul.f32 %v4204_v27, %v4333_v39 }
 0x11b   : > { %v1704_v26 = vadd.f32 %v1609_v13, %v1491_v47  ;;  %760 = vst.msk [vmem:[#allocation2 + $0x190] sm:$0xff] %vm231_vm1, %v654_v58  ;;  %v1980_v30 = vadd.f32 %v1854_v31, %v1703_v17  ;;  %v2347_v12 = vmul.f32 %v3940_v2, %v4258_v29  ;;  %v4365_v47 = vpop.f32.mrb[26].mxu0  ;;  %v851_v17 = vmul.f32 %v3916_v42, %v4122_v28 }
 0x11c   : > { %v2775_v62 = vsel %vm2770_vm5, %v2772_v54, %v2774_v0  ;;  %v1856_v15 = vsel %vm1257_vm4, %v1854_v31, %v1855_v3  ;;  %v2348_v54 = vmul.f32 %v3940_v2, %v4333_v39  ;;  %v2198_v43 = vrot.slane %v2133_v8, 1  ;;  %v4370_v31 = vpop.f32.mrb[27].mxu0 }
 0x11d   : > { %3550 = vmatmul.mubr.msk.f32.vlgmr.msra.gmra.mrb[0].mxu1 %vm231_vm1, %v2775_v62  ;;  %v1981_v63 = vadd.f32 %v1856_v15, %v1704_v26  ;;  %v6159_v20 = vrot.slane %v4354_v7, 1  ;;  %v584_v0 = vmul.f32 %v3990_v24, %v508_v34  ;;  %v2081_v13 = vadd.f32 %v4015_v38, %v1980_v30 }
 0x11e   : > { %v2445_v58 = vrot.slane %v2347_v12, 2  ;;  %v2446_v62 = vrot.slane %v2348_v54, 2  ;;  %v6185_v34 = vrot.slane %v3943_v5, 2  ;;  %v6186_v30 = vrot.slane %v4277_v57, 1 }
 0x11f   : > { %v2082_v46 = vadd.f32 %v2034_v1, %v1981_v63  ;;  %v2200_v26 = vsel %vm1011_vm3, %v2198_v43, %v6159_v20  ;;  %v621_v8 = vadd.f32 %v4009_v35, %v584_v0  ;;  %v2294_v59 = vadd.f32 %v2198_v43, %v2081_v13  ;;  %v4384_v1 = vld [vmem:[#allocation2 + $0x88] sm:$0xff] }
 0x120   : > { %v1267_v15 = vsel %vm1257_vm4, %v1264_v48, %v6185_v34  ;;  %v2447_v38 = vsel %vm1257_vm4, %v2445_v58, %v2446_v62  ;;  %v1113_v12 = vadd.f32 %v6186_v30, %v851_v17  ;;  %v1444_v28 = vmul.f32 %v3927_v56, %v4207_v33  ;;  %v4391_v48 = vpop.f32.mrb[28].mxu0 }
 0x121   : > { %v2295_v54 = vadd.f32 %v2200_v26, %v2082_v46  ;;  %v653_v63 = vmax.f32 %v621_v8, 0.0  ;;  %v6187_v20 = vrot.slane %v3955_v11, 2  ;;  %v2035_v5 = vmul.f32 %v3974_v19, %v4333_v39  ;;  %v4397_v30 = vpop.f32.mrb[29].mxu0 }
 0x122   : > { %v2571_v43 = vadd.f32 %v2445_v58, %v2294_v59  ;;  %v1391_v13 = vadd.f32 %v1267_v15, %v1113_v12  ;;  %v6188_v57 = vrot.slane %v3985_v23, 2  ;;  %v587_v34 = vmul.f32 %v3537_v25, %v3990_v24 }
 0x123   : > { %v1858_v0 = vsel %vm1257_vm4, %v1855_v3, %v6187_v20  ;;  %v2572_v46 = vadd.f32 %v2447_v38, %v2295_v54  ;;  %759 = vst.msk [vmem:[#allocation2 + $0x188] sm:$0xff] %vm231_vm1, %v653_v63  ;;  %v853_v11 = vmul.f32 %v3916_v42, %v4163_v45  ;;  %v4404_v3 = vmul.f32 %v3904_v37, %v4207_v33  ;;  %v4419_v15 = vpop.f32.mrb[30].mxu0 }
 0x124   : > { %v2449_v17 = vsel %vm1257_vm4, %v2446_v62, %v6188_v57  ;;  %v4408_v59 = vmul.f32 %v3904_v37, %v4384_v1  ;;  %v2624_v23 = vmul.f32 %v4253_v32, %v2571_v43  ;;  %v1492_v20 = vadd.f32 %v1444_v28, %v1391_v13  ;;  %v4424_v43 = vpop.f32.mrb[31].mxu0 }
 0x125   : > { %v624_v25 = vadd.f32 %v4009_v35, %v587_v34  ;;  %v1168_v58 = vmul.f32 %v3911_v40, %v4207_v33  ;;  %v2625_v62 = vmul.f32 %v4253_v32, %v2572_v46  ;;  %v1019_v45 = vrot.slane %v4404_v3, 1 }
 0x126   : > { %v6160_v26 = vrot.slane %v4408_v59, 1  ;;  %v1446_v8 = vmul.f32 %v3927_v56, %v4258_v29  ;;  %v2677_v38 = vadd.f32 %v4265_v14, %v2624_v23  ;;  %v6189_v12 = vrot.slane %v4328_v16, 1 }
 0x127   : > { %v656_v54 = vmax.f32 %v624_v25, 0.0  ;;  %v1269_v63 = vrot.slane %v1168_v58, 2  ;;  %v4427_v13 = vadd.f32 %v4265_v14, %v2625_v62  ;;  %v6190_v57 = vrot.slane %v4172_v55, 1 }
 0x128   : > { %v1705_v28 = vadd.f32 %v6189_v12, %v1492_v20  ;;  %v4435_v46 = vadd.f32 %v6160_v26, %v4029_v50  ;;  %v1493_v16 = vadd.f32 %v4012_v36, %v4215_v4  ;;  %v2776_v3 = vrot.slane %v2677_v38, 7 }
 0x129   : > { %v1020_v34 = vsel %vm1011_vm3, %v6190_v57, %v1019_v45  ;;  %762 = vst.msk [vmem:[#allocation2 + $0x1b0] sm:$0xff] %vm231_vm1, %v656_v54  ;;  %v6191_v25 = vrot.slane %v4179_v10, 2  ;;  %v2777_v55 = vrot.slane %v4427_v13, 7  ;;  %v1544_v62 = vmul.f32 %v4107_v53, %v4258_v29 }
 0x12a   : > { %v1982_v23 = vadd.f32 %v1858_v0, %v1705_v28  ;;  %v1115_v20 = vadd.f32 %v1020_v34, %v853_v11  ;;  %v4448_v50 = vmul.f32 %v4107_v53, %v4333_v39  ;;  %v1759_v36 = vmul.f32 %v3933_v60, %v4258_v29  ;;  %v4452_v0 = vld [vmem:[#allocation2 + $0x90] sm:$0xff] }
 0x12b   : > { %v1270_v58 = vsel %vm1257_vm4, %v6191_v25, %v1269_v63  ;;  %v1760_v10 = vmul.f32 %v3933_v60, %v4333_v39  ;;  %v2037_v38 = vmul.f32 %v3974_v19, %v4384_v1  ;;  %v2778_v12 = vsel %vm2770_vm5, %v2776_v3, %v2777_v55 }
 0x12c   : > { %v2083_v4 = vadd.f32 %v2035_v5, %v1982_v23  ;;  %v1393_v11 = vadd.f32 %v1270_v58, %v1115_v20  ;;  %v1610_v28 = vrot.slane %v1544_v62, 1  ;;  %v1611_v54 = vrot.slane %v4448_v50, 1  ;;  %3552 = vmatprep.mubr.msk.f32.mxu1 %vm231_vm1, %v2778_v12 }
 0x12d   : > { %v1859_v13 = vrot.slane %v1759_v36, 2  ;;  %v6192_v57 = vrot.slane %v4354_v7, 1  ;;  %v1860_v23 = vrot.slane %v1760_v10, 2  ;;  %v2135_v20 = vmul.f32 %v4204_v27, %v4384_v1 }
 0x12e   : > { %v1494_v34 = vadd.f32 %v1446_v8, %v1393_v11  ;;  %v1612_v25 = vsel %vm1011_vm3, %v1610_v28, %v1611_v54  ;;  %v1706_v58 = vadd.f32 %v1610_v28, %v1493_v16  ;;  %v4468_v3 = vmul.f32 %v4204_v27, %v4452_v0 }
 0x12f   : > { %v2296_v5 = vadd.f32 %v6192_v57, %v2083_v4  ;;  %v2350_v62 = vmul.f32 %v3940_v2, %v4384_v1  ;;  %v1861_v7 = vsel %vm1257_vm4, %v1859_v13, %v1860_v23  ;;  %v2201_v4 = vrot.slane %v2135_v20, 1 }
 0x130   : > { %v1707_v36 = vadd.f32 %v1612_v25, %v1494_v34  ;;  %v1983_v8 = vadd.f32 %v1859_v13, %v1706_v58  ;;  %v2202_v11 = vrot.slane %v4468_v3, 1  ;;  %v2351_v10 = vmul.f32 %v3940_v2, %v4452_v0 }
 0x131   : > { %v2573_v50 = vadd.f32 %v2449_v17, %v2296_v5  ;;  %v2450_v12 = vrot.slane %v2350_v62, 2  ;;  %v586_v57 = vmul.f32 %v3990_v24, %v4347_v44  ;;  %v854_v17 = vmul.f32 %v3916_v42, %v4207_v33 }
 0x132   : > { %v1984_v28 = vadd.f32 %v1861_v7, %v1707_v36  ;;  %v2084_v5 = vadd.f32 %v4035_v52, %v1983_v8  ;;  %v2203_v13 = vsel %vm1011_vm3, %v2201_v4, %v2202_v11  ;;  %v2451_v34 = vrot.slane %v2351_v10, 2 }
 0x133   : > { %v2626_v16 = vmul.f32 %v4253_v32, %v2573_v50  ;;  %v6193_v20 = vrot.slane %v3946_v6, 2  ;;  %v623_v50 = vadd.f32 %v4009_v35, %v586_v57  ;;  %v1116_v44 = vadd.f32 %v1019_v45, %v854_v17 }
 0x134   : > { %v2085_v62 = vadd.f32 %v2037_v38, %v1984_v28  ;;  %v2297_v36 = vadd.f32 %v2201_v4, %v2084_v5  ;;  %v2452_v33 = vsel %vm1257_vm4, %v2450_v12, %v2451_v34  ;;  %v1447_v52 = vmul.f32 %v3927_v56, %v4333_v39 }
 0x135   : > { %v1272_v25 = vsel %vm1257_vm4, %v1269_v63, %v6193_v20  ;;  %v2679_v58 = vadd.f32 %v4265_v14, %v2626_v16  ;;  %v6194_v7 = vrot.slane %v3982_v22, 2  ;;  %v655_v26 = vmax.f32 %v623_v50, 0.0  ;;  %v4496_v20 = vld [vmem:[#allocation2 + $0xa8] sm:$0xff] }
 0x136   : > { %v2298_v6 = vadd.f32 %v2203_v13, %v2085_v62  ;;  %v1394_v63 = vadd.f32 %v1272_v25, %v1116_v44  ;;  %v2574_v38 = vadd.f32 %v2450_v12, %v2297_v36  ;;  %v2038_v45 = vmul.f32 %v3974_v19, %v4452_v0 }
 0x137   : > { %v1863_v8 = vsel %vm1257_vm4, %v1860_v23, %v6194_v7  ;;  %v2779_v10 = vrot.slane %v2679_v58, 7  ;;  %v6195_v4 = vrot.slane %v4021_v41, 2  ;;  %v589_v28 = vmul.f32 %v4365_v47, %v3990_v24  ;;  %761 = vst.msk [vmem:[#allocation2 + $0x1a8] sm:$0xff] %vm231_vm1, %v655_v26 }
 0x138   : > { %v2575_v23 = vadd.f32 %v2452_v33, %v2298_v6  ;;  %v1495_v57 = vadd.f32 %v1447_v52, %v1394_v63  ;;  %v856_v17 = vmul.f32 %v3916_v42, %v4258_v29  ;;  %v2627_v12 = vmul.f32 %v4253_v32, %v2574_v38 }
 0x139   : > { %v2454_v16 = vsel %vm1257_vm4, %v2451_v34, %v6195_v4  ;;  %v2780_v22 = vsel %vm2770_vm5, %v2777_v55, %v2779_v10  ;;  %v626_v41 = vadd.f32 %v4009_v35, %v589_v28  ;;  %v4514_v5 = vmul.f32 %v3904_v37, %v4333_v39  ;;  %v4553_v28 = vld [vmem:[#allocation2 + $0xb0] sm:$0xff] }
 0x13a   : > { %3553 = vmatmul.mubr.msk.f32.gmra.mrb[2].mxu1 %vm231_vm1, %v2780_v22  ;;  %v4518_v47 = vmul.f32 %v3904_v37, %v4496_v20  ;;  %v2628_v26 = vmul.f32 %v4253_v32, %v2575_v23  ;;  %v1708_v55 = vadd.f32 %v1611_v54, %v1495_v57  ;;  %v1170_v42 = vmul.f32 %v3911_v40, %v4258_v29 }
 0x13b   : > { %v1171_v13 = vmul.f32 %v3911_v40, %v4333_v39  ;;  %v2680_v34 = vadd.f32 %v4265_v14, %v2627_v12  ;;  %v658_v25 = vmax.f32 %v626_v41, 0.0  ;;  %v1022_v58 = vrot.slane %v4514_v5, 1 }
 0x13c   : > { %v1027_v62 = vrot.slane %v4518_v47, 1  ;;  %v2681_v50 = vadd.f32 %v4265_v14, %v2628_v26  ;;  %v1985_v37 = vadd.f32 %v1863_v8, %v1708_v55  ;;  %v1273_v44 = vrot.slane %v1170_v42, 2 }
 0x13d   : > { %v1274_v36 = vrot.slane %v1171_v13, 2  ;;  %v2781_v33 = vrot.slane %v2680_v34, 7  ;;  %764 = vst.msk [vmem:[#allocation2 + $0x1d0] sm:$0xff] %vm231_vm1, %v658_v25  ;;  %v6196_v29 = vrot.slane %v4283_v61, 1  ;;  %v1449_v52 = vmul.f32 %v3927_v56, %v4384_v1 }
 0x13e   : > { %v4536_v40 = vadd.f32 %v1027_v62, %v4053_v9  ;;  %v2782_v7 = vrot.slane %v2681_v50, 7  ;;  %v2086_v10 = vadd.f32 %v2038_v45, %v1985_v37  ;;  %v1395_v63 = vadd.f32 %v1273_v44, %v4311_v18 }
 0x13f   : > { %v1023_v54 = vsel %vm1011_vm3, %v6196_v29, %v1022_v58  ;;  %v1275_v6 = vsel %vm1257_vm4, %v1273_v44, %v1274_v36  ;;  %v1546_v61 = vmul.f32 %v4107_v53, %v4384_v1  ;;  %v4546_v38 = vmul.f32 %v4107_v53, %v4452_v0 }
 0x140   : > { %v1118_v8 = vadd.f32 %v1023_v54, %v856_v17  ;;  %v1762_v9 = vmul.f32 %v3933_v60, %v4384_v1  ;;  %v2783_v4 = vsel %vm2770_vm5, %v2781_v33, %v2782_v7  ;;  %v2299_v45 = vadd.f32 %v2202_v11, %v2086_v10 }
 0x141   : > { %v1763_v18 = vmul.f32 %v3933_v60, %v4452_v0  ;;  %3555 = vmatprep.mubr.msk.f32.mxu1 %vm231_vm1, %v2783_v4  ;;  %v1496_v23 = vadd.f32 %v4032_v51, %v1395_v63  ;;  %v1613_v57 = vrot.slane %v1546_v61, 1  ;;  %v1614_v17 = vrot.slane %v4546_v38, 1  ;;  %v4586_v63 = vld [vmem:[%s6139_s3] ss:$0 sm:$0xff] }
 0x142   : > { %v1396_v22 = vadd.f32 %v1275_v6, %v1118_v8  ;;  %v1864_v12 = vrot.slane %v1762_v9, 2  ;;  %v2576_v41 = vadd.f32 %v2454_v16, %v2299_v45  ;;  %v2040_v3 = vmul.f32 %v3974_v19, %v4496_v20 }
 0x143   : > { %v1865_v26 = vrot.slane %v1763_v18, 2  ;;  %v1615_v11 = vsel %vm1011_vm3, %v1613_v57, %v1614_v17  ;;  %v1709_v55 = vadd.f32 %v1613_v57, %v1496_v23  ;;  %v2137_v60 = vmul.f32 %v4204_v27, %v4496_v20 }
 0x144   : > { %v1497_v5 = vadd.f32 %v1449_v52, %v1396_v22  ;;  %v4567_v42 = vmul.f32 %v4204_v27, %v4553_v28  ;;  %v2629_v51 = vmul.f32 %v4253_v32, %v2576_v41  ;;  %v2353_v34 = vmul.f32 %v3940_v2, %v4496_v20 }
 0x145   : > { %v1866_v16 = vsel %vm1257_vm4, %v1864_v12, %v1865_v26  ;;  %v1986_v25 = vadd.f32 %v1864_v12, %v1709_v55  ;;  %v2204_v50 = vrot.slane %v2137_v60, 1  ;;  %v2354_v44 = vmul.f32 %v3940_v2, %v4553_v28 }
 0x146   : > { %v1710_v13 = vadd.f32 %v1615_v11, %v1497_v5  ;;  %v2205_v37 = vrot.slane %v4567_v42, 1  ;;  %v2682_v33 = vadd.f32 %v4265_v14, %v2629_v51  ;;  %v2455_v54 = vrot.slane %v2353_v34, 2  ;;  %v6200_v11 = vld [vmem:[#allocation7_spill] sm:$0xff] }
 0x147   : > { %v588_v52 = vmul.f32 %v3990_v24, %v4370_v31  ;;  %v2087_v10 = vadd.f32 %v4068_v49, %v1986_v25  ;;  %v2456_v6 = vrot.slane %v2354_v44, 2  ;;  %v857_v2 = vmul.f32 %v4586_v63, %v4333_v39  ;;  %v6198_v39 = vld [vmem:[#allocation4_spill] sm:$0xff]  ;;  %v4617_v51 = vld [vmem:[%s6139_s3 + $0x1] ss:$0 sm:$0xff] }
 0x148   : > { %v1987_v29 = vadd.f32 %v1866_v16, %v1710_v13  ;;  %v2206_v8 = vsel %vm1011_vm3, %v2204_v50, %v2205_v37  ;;  %v2784_v61 = vrot.slane %v2682_v33, 7  ;;  %v6197_v31 = vrot.slane %v3979_v21, 2 }
 0x149   : > { %v625_v9 = vadd.f32 %v4009_v35, %v588_v52  ;;  %v2300_v4 = vadd.f32 %v2204_v50, %v2087_v10  ;;  %v2457_v45 = vsel %vm1257_vm4, %v2455_v54, %v2456_v6  ;;  %v1119_v22 = vadd.f32 %v1022_v58, %v857_v2 }
 0x14a   : > { %v2088_v38 = vadd.f32 %v2040_v3, %v1987_v29  ;;  %v1277_v49 = vsel %vm1257_vm4, %v1274_v36, %v6197_v31  ;;  %v1450_v18 = vmul.f32 %v3927_v56, %v4452_v0  ;;  %v2785_v23 = vsel %vm2770_vm5, %v2782_v7, %v2784_v61  ;;  %v4601_v3 = vld [vmem:[#allocation2 + $0xc8] sm:$0xff]  ;;  %v6203_v31 = vld [vmem:[#allocation11_spill] sm:$0xff] }
 0x14b   : > { %v657_v12 = vmax.f32 %v625_v9, 0.0  ;;  %v6199_v41 = vrot.slane %v6198_v39, 2  ;;  %3556 = vmatmul.mubr.msk.f32.gmra.mrb[4].mxu1 %vm231_vm1, %v2785_v23  ;;  %v2577_v21 = vadd.f32 %v2455_v54, %v2300_v4  ;;  %v1397_v36 = vadd.f32 %v1277_v49, %v1119_v22  ;;  %v4678_v39 = vld [vmem:[#allocation2 + $0xd0] sm:$0xff] }
 0x14c   : > { %v2301_v57 = vadd.f32 %v2206_v8, %v2088_v38  ;;  %v2041_v58 = vmul.f32 %v3974_v19, %v4553_v28  ;;  %v6201_v55 = vrot.slane %v6200_v11, 2  ;;  %v591_v60 = vmul.f32 %v4391_v48, %v3990_v24  ;;  %v4631_v24 = vld [vmem:[%s6139_s3 + $0x2] ss:$0 sm:$0xff] }
 0x14d   : > { %v1868_v5 = vsel %vm1257_vm4, %v1865_v26, %v6199_v41  ;;  %763 = vst.msk [vmem:[#allocation2 + $0x1c8] sm:$0xff] %vm231_vm1, %v657_v12  ;;  %v859_v26 = vmul.f32 %v4586_v63, %v4384_v1  ;;  %v4621_v19 = vmul.f32 %v4617_v51, %v4452_v0  ;;  %v2630_v13 = vmul.f32 %v4253_v32, %v2577_v21  ;;  %v6204_v41 = vld [vmem:[#allocation8_spill] sm:$0xff]  ;;  %v4684_v21 = vld [vmem:[%s6139_s3 + $0x5] ss:$0 sm:$0xff] }
 0x14e   : > { %v2459_v56 = vsel %vm1257_vm4, %v2456_v6, %v6201_v55  ;;  %v2578_v7 = vadd.f32 %v2457_v45, %v2301_v57  ;;  %v1498_v16 = vadd.f32 %v1450_v18, %v1397_v36  ;;  %v4626_v34 = vmul.f32 %v4617_v51, %v4601_v3  ;;  %v4665_v45 = vld [vmem:[%s6139_s3 + $0x3] ss:$0 sm:$0xff] }
 0x14f   : > { %v1173_v48 = vmul.f32 %v4631_v24, %v4384_v1  ;;  %v628_v50 = vadd.f32 %v4009_v35, %v591_v60  ;;  %v1025_v44 = vrot.slane %v4621_v19, 1  ;;  %v4640_v33 = vmul.f32 %v4631_v24, %v4452_v0  ;;  %v4751_v19 = vld [vmem:[#allocation2 + $0xe8] sm:$0xff] }
 0x150   : > { %v2631_v25 = vmul.f32 %v4253_v32, %v2578_v7  ;;  %v2683_v29 = vadd.f32 %v4265_v14, %v2630_v13  ;;  %v1711_v54 = vadd.f32 %v1614_v17, %v1498_v16  ;;  %v1030_v52 = vrot.slane %v4626_v34, 1  ;;  %v4697_v13 = vld [vmem:[%s6139_s3 + $0x6] ss:$0 sm:$0xff] }
 0x151   : > { %v1278_v10 = vrot.slane %v1173_v48, 2  ;;  %v660_v1 = vmax.f32 %v628_v50, 0.0  ;;  %v6202_v35 = vrot.slane %v4408_v59, 1  ;;  %v1279_v2 = vrot.slane %v4640_v33, 2 }
 0x152   : > { %v4645_v8 = vadd.f32 %v4265_v14, %v2631_v25  ;;  %v2786_v61 = vrot.slane %v2683_v29, 7  ;;  %v1988_v38 = vadd.f32 %v1868_v5, %v1711_v54  ;;  %v4656_v17 = vadd.f32 %v1030_v52, %v6203_v31  ;;  %v4723_v31 = vld [vmem:[%s6139_s3 + $0x9] ss:$0 sm:$0xff] }
 0x153   : > { %v1026_v6 = vsel %vm1011_vm3, %v6202_v35, %v1025_v44  ;;  %766 = vst.msk [vmem:[#allocation2 + $0x1f0] sm:$0xff] %vm231_vm1, %v660_v1  ;;  %v1280_v4 = vsel %vm1257_vm4, %v1278_v10, %v1279_v2  ;;  %v1398_v59 = vadd.f32 %v1278_v10, %v4435_v46  ;;  %v1452_v22 = vmul.f32 %v4665_v45, %v4496_v20  ;;  %v4712_v10 = vld [vmem:[%s6139_s3 + $0x8] ss:$0 sm:$0xff] }
 0x154   : > { %v1121_v9 = vadd.f32 %v1026_v6, %v859_v26  ;;  %v2787_v49 = vrot.slane %v4645_v8, 7  ;;  %v2089_v18 = vadd.f32 %v2041_v58, %v1988_v38  ;;  %v1548_v57 = vmul.f32 %v4107_v53, %v4496_v20 }
 0x155   : > { %v4673_v12 = vmul.f32 %v4107_v53, %v4553_v28  ;;  %v1499_v5 = vadd.f32 %v6204_v41, %v1398_v59  ;;  %v1765_v36 = vmul.f32 %v4684_v21, %v4496_v20  ;;  %v1766_v53 = vmul.f32 %v4684_v21, %v4553_v28  ;;  %v4737_v41 = vld [vmem:[%s6139_s3 + $0xa] ss:$0 sm:$0xff] }
 0x156   : > { %v1399_v23 = vadd.f32 %v1280_v4, %v1121_v9  ;;  %v2788_v46 = vsel %vm2770_vm5, %v2786_v61, %v2787_v49  ;;  %v2302_v58 = vadd.f32 %v2205_v37, %v2089_v18  ;;  %v1616_v55 = vrot.slane %v1548_v57, 1  ;;  %v6205_v18 = vld [vmem:[#allocation14_spill] sm:$0xff] }
 0x157   : > { %3558 = vmatprep.mubr.msk.f32.mxu1 %vm231_vm1, %v2788_v46  ;;  %v1617_v7 = vrot.slane %v4673_v12, 1  ;;  %v1869_v60 = vrot.slane %v1765_v36, 2  ;;  %v1870_v26 = vrot.slane %v1766_v53, 2  ;;  %v2043_v16 = vmul.f32 %v4697_v13, %v4601_v3 }
 0x158   : > { %v1500_v11 = vadd.f32 %v1452_v22, %v1399_v23  ;;  %v2139_v48 = vmul.f32 %v4204_v27, %v4601_v3  ;;  %v2579_v25 = vadd.f32 %v2459_v56, %v2302_v58  ;;  %v1712_v37 = vadd.f32 %v1616_v55, %v1499_v5  ;;  %v6206_v5 = vld [vmem:[#allocation3_spill] sm:$0xff] }
 0x159   : > { %v1618_v42 = vsel %vm1011_vm3, %v1616_v55, %v1617_v7  ;;  %v4706_v50 = vmul.f32 %v4204_v27, %v4678_v39  ;;  %v1871_v29 = vsel %vm1257_vm4, %v1869_v60, %v1870_v26  ;;  %v2356_v1 = vmul.f32 %v4712_v10, %v4601_v3 }
 0x15a   : > { %v1713_v33 = vadd.f32 %v1618_v42, %v1500_v11  ;;  %v2207_v54 = vrot.slane %v2139_v48, 1  ;;  %v2632_v56 = vmul.f32 %v4253_v32, %v2579_v25  ;;  %v1989_v35 = vadd.f32 %v1869_v60, %v1712_v37  ;;  %v6208_v42 = vld [vmem:[#allocation6_spill] sm:$0xff] }
 0x15b   : > { %v2208_v6 = vrot.slane %v4706_v50, 1  ;;  %v2357_v61 = vmul.f32 %v4712_v10, %v4678_v39  ;;  %v2460_v9 = vrot.slane %v2356_v1, 2  ;;  %v590_v4 = vmul.f32 %v4723_v31, %v4397_v30 }
 0x15c   : > { %v1990_v38 = vadd.f32 %v1871_v29, %v1713_v33  ;;  %v860_v59 = vmul.f32 %v4586_v63, %v4452_v0  ;;  %v2685_v22 = vadd.f32 %v4265_v14, %v2632_v56  ;;  %v2090_v23 = vadd.f32 %v6205_v18, %v1989_v35 }
 0x15d   : > { %v2209_v57 = vsel %vm1011_vm3, %v2207_v54, %v2208_v6  ;;  %v2461_v12 = vrot.slane %v2357_v61, 2  ;;  %v627_v30 = vadd.f32 %v4737_v41, %v590_v4  ;;  %v6207_v36 = vrot.slane %v6206_v5, 2 }
 0x15e   : > { %v2091_v46 = vadd.f32 %v2043_v16, %v1990_v38  ;;  %v1122_v0 = vadd.f32 %v1025_v44, %v860_v59  ;;  %v2789_v58 = vrot.slane %v2685_v22, 7  ;;  %v2303_v11 = vadd.f32 %v2207_v54, %v2090_v23  ;;  %v6210_v54 = vld [vmem:[#allocation12_spill] sm:$0xff] }
 0x15f   : > { %v1282_v53 = vsel %vm1257_vm4, %v1279_v2, %v6207_v36  ;;  %v2462_v55 = vsel %vm1257_vm4, %v2460_v9, %v2461_v12  ;;  %v1453_v60 = vmul.f32 %v4665_v45, %v4553_v28  ;;  %v659_v48 = vmax.f32 %v627_v30, 0.0 }
 0x160   : > { %v2304_v16 = vadd.f32 %v2209_v57, %v2091_v46  ;;  %v1400_v25 = vadd.f32 %v1282_v53, %v1122_v0  ;;  %v6209_v37 = vrot.slane %v6208_v42, 2  ;;  %v2790_v44 = vsel %vm2770_vm5, %v2787_v49, %v2789_v58 }
 0x161   : > { %v2580_v2 = vadd.f32 %v2460_v9, %v2303_v11  ;;  %v2044_v29 = vmul.f32 %v4697_v13, %v4678_v39  ;;  %v6211_v1 = vrot.slane %v6210_v54, 2  ;;  %3559 = vmatmul.mubr.msk.f32.gmra.mrb[6].mxu1 %vm231_vm1, %v2790_v44  ;;  %765 = vst.msk [vmem:[#allocation2 + $0x1e8] sm:$0xff] %vm231_vm1, %v659_v48  ;;  %v862_v61 = vmul.f32 %v4586_v63, %v4496_v20  ;;  %v6212_v11 = vld [vmem:[#allocation18_spill] sm:$0xff] }
 0x162   : > { %v1873_v33 = vsel %vm1257_vm4, %v1870_v26, %v6209_v37  ;;  %v2581_v35 = vadd.f32 %v2462_v55, %v2304_v16  ;;  %v1501_v26 = vadd.f32 %v1453_v60, %v1400_v25  ;;  %v4767_v8 = vmul.f32 %v4617_v51, %v4553_v28 }
 0x163   : > { %v2464_v56 = vsel %vm1257_vm4, %v2461_v12, %v6211_v1  ;;  %v2633_v49 = vmul.f32 %v4253_v32, %v2580_v2  ;;  %v4772_v38 = vmul.f32 %v4617_v51, %v4751_v19  ;;  %v1176_v9 = vmul.f32 %v4631_v24, %v4496_v20 }
 0x164   : > { %v1177_v4 = vmul.f32 %v4631_v24, %v4553_v28  ;;  %v2634_v59 = vmul.f32 %v4253_v32, %v2581_v35  ;;  %v1714_v22 = vadd.f32 %v1617_v7, %v1501_v26  ;;  %v1028_v18 = vrot.slane %v4767_v8, 1  ;;  %v4791_v7 = vld [vmem:[%s6139_s3 + $0x4] ss:$0 sm:$0xff] }
 0x165   : > { %v1455_v23 = vmul.f32 %v4665_v45, %v4601_v3  ;;  %v2686_v57 = vadd.f32 %v4265_v14, %v2633_v49  ;;  %v1033_v12 = vrot.slane %v4772_v38, 1  ;;  %v1283_v46 = vrot.slane %v1176_v9, 2 }
 0x166   : > { %v1284_v30 = vrot.slane %v1177_v4, 2  ;;  %v2687_v0 = vadd.f32 %v4265_v14, %v2634_v59  ;;  %v1991_v20 = vadd.f32 %v1873_v33, %v1714_v22  ;;  %v1029_v5 = vsel %vm1011_vm3, %v1027_v62, %v1028_v18 }
 0x167   : > { %v1550_v36 = vmul.f32 %v4791_v7, %v4601_v3  ;;  %v2791_v53 = vrot.slane %v2686_v57, 7  ;;  %v1124_v58 = vadd.f32 %v1029_v5, %v862_v61  ;;  %v4798_v55 = vadd.f32 %v1033_v12, %v6212_v11 }
 0x168   : > { %v1285_v60 = vsel %vm1257_vm4, %v1283_v46, %v1284_v30  ;;  %v2792_v47 = vrot.slane %v2687_v0, 7  ;;  %v2092_v16 = vadd.f32 %v2044_v29, %v1991_v20  ;;  %v1401_v62 = vadd.f32 %v1283_v46, %v4536_v40  ;;  %v4813_v29 = vld [vmem:[#allocation2 + $0xf0] sm:$0xff] }
 0x169   : > { %v4804_v48 = vmul.f32 %v4791_v7, %v4678_v39  ;;  %v1402_v25 = vadd.f32 %v1285_v60, %v1124_v58  ;;  %v1619_v42 = vrot.slane %v1550_v36, 1  ;;  %v1768_v37 = vmul.f32 %v4684_v21, %v4601_v3  ;;  %v6213_v40 = vld [vmem:[#allocation13_spill] sm:$0xff]  ;;  %v6214_v58 = vld [vmem:[#allocation20_spill] sm:$0xff] }
 0x16a   : > { %v1769_v33 = vmul.f32 %v4684_v21, %v4678_v39  ;;  %v2793_v44 = vsel %vm2770_vm5, %v2791_v53, %v2792_v47  ;;  %v2305_v2 = vadd.f32 %v2208_v6, %v2092_v16  ;;  %v1502_v54 = vadd.f32 %v6213_v40, %v1401_v62 }
 0x16b   : > { %v1620_v1 = vrot.slane %v4804_v48, 1  ;;  %3561 = vmatprep.mubr.msk.f32.mxu1 %vm231_vm1, %v2793_v44  ;;  %v1503_v35 = vadd.f32 %v1455_v23, %v1402_v25  ;;  %v1874_v26 = vrot.slane %v1768_v37, 2  ;;  %v2046_v8 = vmul.f32 %v4697_v13, %v4751_v19 }
 0x16c   : > { %v1875_v61 = vrot.slane %v1769_v33, 2  ;;  %v2582_v49 = vadd.f32 %v2464_v56, %v2305_v2  ;;  %v1715_v4 = vadd.f32 %v1619_v42, %v1502_v54  ;;  %v2141_v50 = vmul.f32 %v4204_v27, %v4751_v19 }
 0x16d   : > { %v1621_v9 = vsel %vm1011_vm3, %v1619_v42, %v1620_v1  ;;  %v4826_v22 = vmul.f32 %v4204_v27, %v4813_v29  ;;  %v2359_v23 = vmul.f32 %v4712_v10, %v4751_v19  ;;  %v2360_v0 = vmul.f32 %v4712_v10, %v4813_v29  ;;  %v6215_v42 = vld [vmem:[#allocation5_spill] sm:$0xff] }
 0x16e   : > { %v1716_v6 = vadd.f32 %v1621_v9, %v1503_v35  ;;  %v1876_v59 = vsel %vm1257_vm4, %v1874_v26, %v1875_v61  ;;  %v2635_v57 = vmul.f32 %v4253_v32, %v2582_v49  ;;  %v1992_v46 = vadd.f32 %v1874_v26, %v1715_v4  ;;  %v6217_v26 = vld [vmem:[#allocation10_spill] sm:$0xff]  ;;  %v801_v9 = vld [vmem:[#allocation2 + $0x100] sm:$0xff] }
 0x16f   : > { %v2210_v56 = vrot.slane %v2141_v50, 1  ;;  %v2211_v5 = vrot.slane %v4826_v22, 1  ;;  %v2465_v36 = vrot.slane %v2359_v23, 2  ;;  %v593_v53 = vmul.f32 %v4723_v31, %v4419_v15  ;;  %v6219_v23 = vld [vmem:[#allocation17_spill] sm:$0xff] }
 0x170   : > { %v1993_v20 = vadd.f32 %v1876_v59, %v1716_v6  ;;  %v2688_v27 = vadd.f32 %v4265_v14, %v2635_v57  ;;  %v2093_v11 = vadd.f32 %v6214_v58, %v1992_v46  ;;  %v2466_v60 = vrot.slane %v2360_v0, 2  ;;  %v4856_v59 = vld [vmem:[#allocation2 + $0x108] sm:$0xff] }
 0x171   : > { %v863_v16 = vmul.f32 %v4586_v63, %v4553_v28  ;;  %v2212_v48 = vsel %vm1011_vm3, %v2210_v56, %v2211_v5  ;;  %v630_v25 = vadd.f32 %v4737_v41, %v593_v53  ;;  %v6216_v37 = vrot.slane %v6215_v42, 2 }
 0x172   : > { %v2094_v62 = vadd.f32 %v2046_v8, %v1993_v20  ;;  %v2794_v15 = vrot.slane %v2688_v27, 7  ;;  %v2306_v44 = vadd.f32 %v2210_v56, %v2093_v11  ;;  %v2467_v2 = vsel %vm1257_vm4, %v2465_v36, %v2466_v60 }
 0x173   : > { %v1287_v33 = vsel %vm1257_vm4, %v1284_v30, %v6216_v37  ;;  %v1125_v40 = vadd.f32 %v1028_v18, %v863_v16  ;;  %v662_v35 = vmax.f32 %v630_v25, 0.0  ;;  %v1456_v28 = vmul.f32 %v4665_v45, %v4678_v39 }
 0x174   : > { %v2307_v54 = vadd.f32 %v2212_v48, %v2094_v62  ;;  %v6218_v8 = vrot.slane %v6217_v26, 2  ;;  %v2795_v4 = vsel %vm2770_vm5, %v2792_v47, %v2794_v15  ;;  %v2583_v50 = vadd.f32 %v2465_v36, %v2306_v44 }
 0x175   : > { %v1403_v6 = vadd.f32 %v1287_v33, %v1125_v40  ;;  %v2047_v30 = vmul.f32 %v4697_v13, %v4813_v29  ;;  %3562 = vmatmul.mubr.msk.f32.gmra.mrb[8].mxu1 %vm231_vm1, %v2795_v4  ;;  %768 = vst.msk [vmem:[#allocation2 + $0x210] sm:$0xff] %vm231_vm1, %v662_v35  ;;  %v6220_v57 = vrot.slane %v6219_v23, 2  ;;  %v865_v47 = vmul.f32 %v4586_v63, %v4601_v3  ;;  %v6221_v35 = vld [vmem:[#allocation19_spill] sm:$0xff] }
 0x176   : > { %v1878_v49 = vsel %vm1257_vm4, %v1875_v61, %v6218_v8  ;;  %v2584_v18 = vadd.f32 %v2467_v2, %v2307_v54  ;;  %v592_v61 = vmul.f32 %v4723_v31, %v4424_v43  ;;  %v2636_v56 = vmul.f32 %v4253_v32, %v2583_v50  ;;  %v4917_v8 = vld [vmem:[#allocation2 + $0x110] sm:$0xff] }
 0x177   : > { %v2469_v46 = vsel %vm1257_vm4, %v2466_v60, %v6220_v57  ;;  %v1504_v0 = vadd.f32 %v1456_v28, %v1403_v6  ;;  %v870_v20 = vmul.f32 %v4586_v63, %v801_v9  ;;  %v4871_v36 = vmul.f32 %v4617_v51, %v4678_v39 }
 0x178   : > { %v2637_v53 = vmul.f32 %v4253_v32, %v2584_v18  ;;  %v629_v27 = vadd.f32 %v4737_v41, %v592_v61  ;;  %v4877_v58 = vmul.f32 %v4617_v51, %v4856_v59  ;;  %v1179_v43 = vmul.f32 %v4631_v24, %v4601_v3 }
 0x179   : > { %v2689_v31 = vadd.f32 %v4265_v14, %v2636_v56  ;;  %v1717_v11 = vadd.f32 %v1620_v1, %v1504_v0  ;;  %v1031_v60 = vrot.slane %v4871_v36, 1  ;;  %v4885_v16 = vmul.f32 %v4631_v24, %v4678_v39  ;;  %v4934_v56 = vld [vmem:[%s6139_s3 + $0x7] ss:$0 sm:$0xff]  ;;  %v6224_v36 = vld [vmem:[#allocation16_spill] sm:$0xff] }
 0x17a   : > { %v4888_v32 = vadd.f32 %v4265_v14, %v2637_v53  ;;  %v661_v41 = vmax.f32 %v629_v27, 0.0  ;;  %v1036_v62 = vrot.slane %v4877_v58, 1  ;;  %v1288_v48 = vrot.slane %v1179_v43, 2 }
 0x17b   : > { %v2796_v25 = vrot.slane %v2689_v31, 7  ;;  %v1994_v42 = vadd.f32 %v1878_v49, %v1717_v11  ;;  %v1032_v3 = vsel %vm1011_vm3, %v1030_v52, %v1031_v60  ;;  %v1289_v1 = vrot.slane %v4885_v16, 2  ;;  %v804_v11 = vld [vmem:[#allocation2 + $0x118] sm:$0x1] }
 0x17c   : > { %v2797_v37 = vrot.slane %v4888_v32, 7  ;;  %767 = vst.msk [vmem:[#allocation2 + $0x208] sm:$0xff] %vm231_vm1, %v661_v41  ;;  %v1127_v14 = vadd.f32 %v1032_v3, %v865_v47  ;;  %v4901_v33 = vadd.f32 %v1036_v62, %v870_v20  ;;  %v1404_v15 = vadd.f32 %v1288_v48, %v4656_v17  ;;  %v4947_v20 = vld [vmem:[%s6139_s3 + $0xb] ss:$0 sm:$0xff] }
 0x17d   : > { %v2095_v44 = vadd.f32 %v2047_v30, %v1994_v42  ;;  %v1290_v2 = vsel %vm1257_vm4, %v1288_v48, %v1289_v1  ;;  %v1458_v34 = vmul.f32 %v4665_v45, %v4751_v19  ;;  %v4908_v52 = vmul.f32 %v4665_v45, %v801_v9 }
 0x17e   : > { %v2798_v40 = vsel %vm2770_vm5, %v2796_v25, %v2797_v37  ;;  %v1405_v54 = vadd.f32 %v1290_v2, %v1127_v14  ;;  %v1505_v28 = vadd.f32 %v6221_v35, %v1404_v15  ;;  %v1552_v26 = vmul.f32 %v4791_v7, %v4751_v19  ;;  %v4958_v25 = vld [vmem:[%s6139_s3 + $0xc] ss:$0 sm:$0xff] }
 0x17f   : > { %3564 = vmatprep.mubr.msk.f32.mxu1 %vm231_vm1, %v2798_v40  ;;  %v2308_v17 = vadd.f32 %v2211_v5, %v2095_v44  ;;  %v4921_v49 = vmul.f32 %v4791_v7, %v4813_v29  ;;  %v1771_v4 = vmul.f32 %v4684_v21, %v4751_v19  ;;  %v1772_v50 = vmul.f32 %v4684_v21, %v4813_v29 }
 0x180   : > { %v1506_v6 = vadd.f32 %v1458_v34, %v1405_v54  ;;  %v1622_v30 = vrot.slane %v1552_v26, 1  ;;  %v2048_v18 = vmul.f32 %v4697_v13, %v801_v9  ;;  %v2049_v22 = vmul.f32 %v4697_v13, %v4856_v59  ;;  %v6222_v26 = vld [vmem:[#allocation9_spill] sm:$0xff] }
 0x181   : > { %v2585_v5 = vadd.f32 %v2469_v46, %v2308_v17  ;;  %v1623_v23 = vrot.slane %v4921_v49, 1  ;;  %v1879_v57 = vrot.slane %v1771_v4, 2  ;;  %v1880_v61 = vrot.slane %v1772_v50, 2 }
 0x182   : > { %v1718_v47 = vadd.f32 %v1622_v30, %v1505_v28  ;;  %v2143_v0 = vmul.f32 %v4934_v56, %v4856_v59  ;;  %v4940_v9 = vmul.f32 %v4934_v56, %v4917_v8  ;;  %v2362_v46 = vmul.f32 %v4712_v10, %v4856_v59 }
 0x183   : > { %v2638_v53 = vmul.f32 %v4947_v20, %v2585_v5  ;;  %v1624_v27 = vsel %vm1011_vm3, %v1622_v30, %v1623_v23  ;;  %v1881_v43 = vsel %vm1257_vm4, %v1879_v57, %v1880_v61  ;;  %v2363_v31 = vmul.f32 %v4712_v10, %v4917_v8  ;;  %v805_v30 = vld [vmem:[#allocation2 + $0x120] sm:$0xff] }
 0x184   : > { %v1719_v16 = vadd.f32 %v1624_v27, %v1506_v6  ;;  %v1995_v32 = vadd.f32 %v1879_v57, %v1718_v47  ;;  %v2213_v41 = vrot.slane %v2143_v0, 1  ;;  %v2214_v48 = vrot.slane %v4940_v9, 1 }
 0x185   : > { %v2691_v42 = vadd.f32 %v4958_v25, %v2638_v53  ;;  %v2470_v3 = vrot.slane %v2362_v46, 2  ;;  %v2471_v14 = vrot.slane %v2363_v31, 2  ;;  %v866_v15 = vmul.f32 %v4586_v63, %v4678_v39  ;;  %v4987_v46 = vld [vmem:[#allocation2 + $0x128] sm:$0xff] }
 0x186   : > { %v1996_v44 = vadd.f32 %v1881_v43, %v1719_v16  ;;  %v2096_v2 = vadd.f32 %v2048_v18, %v1995_v32  ;;  %v2215_v34 = vsel %vm1011_vm3, %v2213_v41, %v2214_v48  ;;  %v4965_v40 = vmul.f32 %v4631_v24, %v804_v11 }
 0x187   : > { %v2799_v54 = vrot.slane %v2691_v42, 7  ;;  %v2472_v35 = vsel %vm1257_vm4, %v2470_v3, %v2471_v14  ;;  %v1128_v28 = vadd.f32 %v1031_v60, %v866_v15  ;;  %v6223_v17 = vrot.slane %v6222_v26, 2 }
 0x188   : > { %v2097_v4 = vadd.f32 %v2049_v22, %v1996_v44  ;;  %v2309_v50 = vadd.f32 %v2213_v41, %v2096_v2  ;;  %v1301_v39 = vrot.slane %v4965_v40, 2  ;;  %v1459_v6 = vmul.f32 %v4665_v45, %v4813_v29 }
 0x189   : > { %v1292_v49 = vsel %vm1257_vm4, %v1289_v1, %v6223_v17  ;;  %v2800_v18 = vsel %vm2770_vm5, %v2797_v37, %v2799_v54  ;;  %v4978_v57 = vmul.f32 %v4684_v21, %v804_v11  ;;  %v6225_v60 = vrot.slane %v6224_v36, 2 }
 0x18a   : > { %v1406_v5 = vadd.f32 %v1292_v49, %v1128_v28  ;;  %3565 = vmatmul.mubr.msk.f32.gmra.mrb[10].mxu1 %vm231_vm1, %v2800_v18  ;;  %v2310_v1 = vadd.f32 %v2215_v34, %v2097_v4  ;;  %v2586_v22 = vadd.f32 %v2470_v3, %v2309_v50  ;;  %v2050_v0 = vmul.f32 %v4697_v13, %v4917_v8 }
 0x18b   : > { %v1883_v47 = vsel %vm1257_vm4, %v1880_v61, %v6225_v60  ;;  %v2364_v9 = vmul.f32 %v4712_v10, %v804_v11  ;;  %v1887_v53 = vrot.slane %v4978_v57, 2  ;;  %v868_v27 = vmul.f32 %v4586_v63, %v4751_v19 }
 0x18c   : > { %v1507_v37 = vadd.f32 %v1459_v6, %v1406_v5  ;;  %v873_v43 = vmul.f32 %v4586_v63, %v805_v30  ;;  %v2587_v61 = vadd.f32 %v2472_v35, %v2310_v1  ;;  %v2639_v31 = vmul.f32 %v4947_v20, %v2586_v22 }
 0x18d   : > { %v2473_v16 = vrot.slane %v2364_v9, 2  ;;  %v4996_v32 = vmul.f32 %v4617_v51, %v4813_v29  ;;  %v5000_v11 = vmul.f32 %v4617_v51, %v4987_v46  ;;  %v1182_v42 = vmul.f32 %v4631_v24, %v4751_v19 }
 0x18e   : > { %v1720_v41 = vadd.f32 %v1623_v23, %v1507_v37  ;;  %v5006_v3 = vmul.f32 %v4631_v24, %v4813_v29  ;;  %v2640_v15 = vmul.f32 %v4947_v20, %v2587_v61  ;;  %v2692_v44 = vadd.f32 %v4958_v25, %v2639_v31 }
 0x18f   : > { %v2474_v2 = vsel %vm1257_vm4, %v2471_v14, %v2473_v16  ;;  %v1034_v34 = vrot.slane %v4996_v32, 1  ;;  %v1039_v54 = vrot.slane %v5000_v11, 1  ;;  %v1293_v35 = vrot.slane %v1182_v42, 2 }
 0x190   : > { %v1997_v23 = vadd.f32 %v1883_v47, %v1720_v41  ;;  %v1294_v28 = vrot.slane %v5006_v3, 2  ;;  %v2693_v19 = vadd.f32 %v4958_v25, %v2640_v15  ;;  %v2801_v26 = vrot.slane %v2692_v44, 7 }
 0x191   : > { %v1035_v17 = vsel %vm1011_vm3, %v1033_v12, %v1034_v34  ;;  %v1461_v49 = vmul.f32 %v4665_v45, %v4856_v59  ;;  %v5022_v50 = vadd.f32 %v1039_v54, %v873_v43  ;;  %v1407_v5 = vadd.f32 %v1293_v35, %v4798_v55 }
 0x192   : > { %v2098_v4 = vadd.f32 %v2050_v0, %v1997_v23  ;;  %v1130_v14 = vadd.f32 %v1035_v17, %v868_v27  ;;  %v1295_v6 = vsel %vm1257_vm4, %v1293_v35, %v1294_v28  ;;  %v2802_v18 = vrot.slane %v2693_v19, 7  ;;  %v5038_v0 = vld [vmem:[#allocation2 + $0x130] sm:$0xff]  ;;  %v808_v35 = vld [vmem:[#allocation2 + $0x138] sm:$0x1] }
 0x193   : > { %v5027_v36 = vmul.f32 %v4665_v45, %v805_v30  ;;  %v1554_v38 = vmul.f32 %v4791_v7, %v4856_v59  ;;  %v5033_v47 = vmul.f32 %v4791_v7, %v4917_v8  ;;  %v1774_v1 = vmul.f32 %v4684_v21, %v4856_v59 }
 0x194   : > { %v2311_v12 = vadd.f32 %v2214_v48, %v2098_v4  ;;  %v1408_v60 = vadd.f32 %v1295_v6, %v1130_v14  ;;  %v2803_v22 = vsel %vm2770_vm5, %v2801_v26, %v2802_v18  ;;  %v1508_v55 = vadd.f32 %v4908_v52, %v1407_v5 }
 0x195   : > { %v1625_v9 = vrot.slane %v1554_v38, 1  ;;  %v1775_v37 = vmul.f32 %v4684_v21, %v4917_v8  ;;  %3567 = vmatprep.mubr.msk.f32.mxu1 %vm231_vm1, %v2803_v22  ;;  %v1626_v43 = vrot.slane %v5033_v47, 1  ;;  %v1884_v61 = vrot.slane %v1774_v1, 2 }
 0x196   : > { %v2588_v48 = vadd.f32 %v2474_v2, %v2311_v12  ;;  %v1509_v27 = vadd.f32 %v1461_v49, %v1408_v60  ;;  %v2051_v32 = vmul.f32 %v4697_v13, %v805_v30  ;;  %v2052_v41 = vmul.f32 %v4697_v13, %v4987_v46 }
 0x197   : > { %v1721_v31 = vadd.f32 %v1625_v9, %v1508_v55  ;;  %v1885_v16 = vrot.slane %v1775_v37, 2  ;;  %v1627_v42 = vsel %vm1011_vm3, %v1625_v9, %v1626_v43  ;;  %v2145_v3 = vmul.f32 %v4934_v56, %v4987_v46  ;;  %v6226_v9 = vld [vmem:[#allocation15_spill] sm:$0xff] }
 0x198   : > { %v2641_v52 = vmul.f32 %v4947_v20, %v2588_v48  ;;  %v5054_v15 = vmul.f32 %v4934_v56, %v5038_v0  ;;  %v1722_v44 = vadd.f32 %v1627_v42, %v1509_v27  ;;  %v2365_v30 = vmul.f32 %v4712_v10, %v4987_v46  ;;  %v809_v42 = vld [vmem:[#allocation2 + $0x140] sm:$0xff] }
 0x199   : > { %v1886_v2 = vsel %vm1257_vm4, %v1884_v61, %v1885_v16  ;;  %v1998_v23 = vadd.f32 %v1884_v61, %v1721_v31  ;;  %v2216_v26 = vrot.slane %v2145_v3, 1  ;;  %v2366_v49 = vmul.f32 %v4712_v10, %v5038_v0  ;;  %v5083_v3 = vld [vmem:[#allocation2 + $0x148] sm:$0xff] }
 0x19a   : > { %v2694_v19 = vadd.f32 %v4958_v25, %v2641_v52  ;;  %v2217_v17 = vrot.slane %v5054_v15, 1  ;;  %v1999_v4 = vadd.f32 %v1886_v2, %v1722_v44  ;;  %v2475_v6 = vrot.slane %v2365_v30, 2 }
 0x19b   : > { %v2099_v14 = vadd.f32 %v2051_v32, %v1998_v23  ;;  %v869_v5 = vmul.f32 %v4586_v63, %v4813_v29  ;;  %v2476_v60 = vrot.slane %v2366_v49, 2  ;;  %v5069_v47 = vmul.f32 %v4631_v24, %v808_v35 }
 0x19c   : > { %v2804_v38 = vrot.slane %v2694_v19, 7  ;;  %v2218_v12 = vsel %vm1011_vm3, %v2216_v26, %v2217_v17  ;;  %v2100_v1 = vadd.f32 %v2052_v41, %v1999_v4  ;;  %v6227_v37 = vrot.slane %v6226_v9, 2 }
 0x19d   : > { %v2312_v22 = vadd.f32 %v2216_v26, %v2099_v14  ;;  %v1131_v55 = vadd.f32 %v1034_v34, %v869_v5  ;;  %v2477_v29 = vsel %vm1257_vm4, %v2475_v6, %v2476_v60  ;;  %v1306_v61 = vrot.slane %v5069_v47, 2 }
 0x19e   : > { %v1297_v48 = vsel %vm1257_vm4, %v1294_v28, %v6227_v37  ;;  %v2805_v27 = vsel %vm2770_vm5, %v2802_v18, %v2804_v38  ;;  %v1462_v31 = vmul.f32 %v4665_v45, %v4917_v8  ;;  %v2313_v32 = vadd.f32 %v2218_v12, %v2100_v1 }
 0x19f   : > { %3568 = vmatmul.mubr.msk.f32.gmra.mrb[12].mxu1 %vm231_vm1, %v2805_v27  ;;  %v2589_v52 = vadd.f32 %v2475_v6, %v2312_v22  ;;  %v1409_v41 = vadd.f32 %v1297_v48, %v1131_v55  ;;  %v5081_v34 = vmul.f32 %v4684_v21, %v808_v35  ;;  %v1888_v28 = vsel %vm1257_vm4, %v1885_v16, %v1887_v53 }
 0x1a0   : > { %v2053_v18 = vmul.f32 %v4697_v13, %v5038_v0  ;;  %v2367_v44 = vmul.f32 %v4712_v10, %v808_v35  ;;  %v871_v2 = vmul.f32 %v4586_v63, %v4856_v59  ;;  %v2590_v23 = vadd.f32 %v2477_v29, %v2313_v32 }
 0x1a1   : > { %v2642_v30 = vmul.f32 %v4947_v20, %v2589_v52  ;;  %v1510_v19 = vadd.f32 %v1462_v31, %v1409_v41  ;;  %v1892_v26 = vrot.slane %v5081_v34, 2  ;;  %v876_v4 = vmul.f32 %v4586_v63, %v809_v42 }
 0x1a2   : > { %v2478_v49 = vrot.slane %v2367_v44, 2  ;;  %v5098_v57 = vmul.f32 %v4617_v51, %v4917_v8  ;;  %v5102_v53 = vmul.f32 %v4617_v51, %v5083_v3  ;;  %v2643_v16 = vmul.f32 %v4947_v20, %v2590_v23 }
 0x1a3   : > { %v2695_v35 = vadd.f32 %v4958_v25, %v2642_v30  ;;  %v1723_v14 = vadd.f32 %v1626_v43, %v1510_v19  ;;  %v1185_v6 = vmul.f32 %v4631_v24, %v4856_v59  ;;  %v1186_v1 = vmul.f32 %v4631_v24, %v4917_v8 }
 0x1a4   : > { %v2479_v5 = vsel %vm1257_vm4, %v2476_v60, %v2478_v49  ;;  %v1037_v38 = vrot.slane %v5098_v57, 1  ;;  %v1042_v12 = vrot.slane %v5102_v53, 1  ;;  %v2696_v22 = vadd.f32 %v4958_v25, %v2643_v16  ;;  %v5354_v53 = vld [vmem:[%s6139_s3 + $0x3] ss:$0 sm:$0xff] }
 0x1a5   : > { %v2806_v55 = vrot.slane %v2695_v35, 7  ;;  %v2000_v9 = vadd.f32 %v1888_v28, %v1723_v14  ;;  %v1298_v37 = vrot.slane %v1185_v6, 2  ;;  %v1299_v60 = vrot.slane %v1186_v1, 2 }
 0x1a6   : > { %v1038_v43 = vsel %vm1011_vm3, %v1036_v62, %v1037_v38  ;;  %v5119_v59 = vadd.f32 %v1042_v12, %v876_v4  ;;  %v1464_v48 = vmul.f32 %v4665_v45, %v4987_v46  ;;  %v2807_v27 = vrot.slane %v2696_v22, 7 }
 0x1a7   : > { %v2101_v29 = vadd.f32 %v2053_v18, %v2000_v9  ;;  %v1133_v31 = vadd.f32 %v1038_v43, %v871_v2  ;;  %v1410_v32 = vadd.f32 %v1298_v37, %v4901_v33  ;;  %v1300_v52 = vsel %vm1257_vm4, %v1298_v37, %v1299_v60  ;;  %v5139_v2 = vld [vmem:[#allocation2 + $0x150] sm:$0xff]  ;;  %v812_v43 = vld [vmem:[#allocation2 + $0x158] sm:$0x1] }
 0x1a8   : > { %v5126_v41 = vmul.f32 %v4665_v45, %v809_v42  ;;  %v1556_v58 = vmul.f32 %v4791_v7, %v4987_v46  ;;  %v5132_v62 = vmul.f32 %v4791_v7, %v5038_v0  ;;  %v2808_v28 = vsel %vm2770_vm5, %v2806_v55, %v2807_v27 }
 0x1a9   : > { %v2314_v18 = vadd.f32 %v2217_v17, %v2101_v29  ;;  %v1411_v44 = vadd.f32 %v1300_v52, %v1133_v31  ;;  %v1511_v33 = vadd.f32 %v5027_v36, %v1410_v32  ;;  %3570 = vmatprep.mubr.msk.f32.mxu1 %vm231_vm1, %v2808_v28  ;;  %v1777_v19 = vmul.f32 %v4684_v21, %v4987_v46 }
 0x1aa   : > { %v1628_v23 = vrot.slane %v1556_v58, 1  ;;  %v1629_v30 = vrot.slane %v5132_v62, 1  ;;  %v1778_v49 = vmul.f32 %v4684_v21, %v5038_v0  ;;  %v2054_v15 = vmul.f32 %v4697_v13, %v809_v42 }
 0x1ab   : > { %v2591_v4 = vadd.f32 %v2479_v5, %v2314_v18  ;;  %v1512_v57 = vadd.f32 %v1464_v48, %v1411_v44  ;;  %v2055_v36 = vmul.f32 %v4697_v13, %v5083_v3  ;;  %v1889_v35 = vrot.slane %v1777_v19, 2 }
 0x1ac   : > { %v1630_v17 = vsel %vm1011_vm3, %v1628_v23, %v1629_v30  ;;  %v1724_v16 = vadd.f32 %v1628_v23, %v1511_v33  ;;  %v1890_v14 = vrot.slane %v1778_v49, 2  ;;  %v2147_v22 = vmul.f32 %v4934_v56, %v5083_v3 }
 0x1ad   : > { %v2644_v6 = vmul.f32 %v4947_v20, %v2591_v4  ;;  %v1725_v1 = vadd.f32 %v1630_v17, %v1512_v57  ;;  %v5155_v5 = vmul.f32 %v4934_v56, %v5139_v2  ;;  %v2368_v9 = vmul.f32 %v4712_v10, %v5083_v3 }
 0x1ae   : > { %v1891_v42 = vsel %vm1257_vm4, %v1889_v35, %v1890_v14  ;;  %v2001_v55 = vadd.f32 %v1889_v35, %v1724_v16  ;;  %v2369_v37 = vmul.f32 %v4712_v10, %v5139_v2  ;;  %v2219_v31 = vrot.slane %v2147_v22, 1  ;;  %v813_v16 = vld [vmem:[#allocation2 + $0x160] sm:$0xff] }
 0x1af   : > { %v2697_v48 = vadd.f32 %v4958_v25, %v2644_v6  ;;  %v2002_v29 = vadd.f32 %v1891_v42, %v1725_v1  ;;  %v2220_v32 = vrot.slane %v5155_v5, 1  ;;  %v2480_v58 = vrot.slane %v2368_v9, 2 }
 0x1b0   : > { %v2102_v52 = vadd.f32 %v2054_v15, %v2001_v55  ;;  %v2481_v62 = vrot.slane %v2369_v37, 2  ;;  %v872_v28 = vmul.f32 %v4586_v63, %v4917_v8  ;;  %v5168_v23 = vmul.f32 %v4631_v24, %v812_v43 }
 0x1b1   : > { %v2809_v18 = vrot.slane %v2697_v48, 7  ;;  %v2103_v44 = vadd.f32 %v2055_v36, %v2002_v29  ;;  %v2221_v33 = vsel %vm1011_vm3, %v2219_v31, %v2220_v32  ;;  %v1302_v57 = vsel %vm1257_vm4, %v1299_v60, %v1301_v39  ;;  %v5185_v39 = vld [vmem:[#allocation2 + $0x168] sm:$0xff] }
 0x1b2   : > { %v2315_v19 = vadd.f32 %v2219_v31, %v2102_v52  ;;  %v2482_v49 = vsel %vm1257_vm4, %v2480_v58, %v2481_v62  ;;  %v1134_v4 = vadd.f32 %v1037_v38, %v872_v28  ;;  %v1311_v8 = vrot.slane %v5168_v23, 2 }
 0x1b3   : > { %v2810_v15 = vsel %vm2770_vm5, %v2807_v27, %v2809_v18  ;;  %v2316_v17 = vadd.f32 %v2221_v33, %v2103_v44  ;;  %v1465_v36 = vmul.f32 %v4665_v45, %v5038_v0  ;;  %v5180_v1 = vmul.f32 %v4684_v21, %v812_v43 }
 0x1b4   : > { %3571 = vmatmul.mubr.msk.f32.gmra.mrb[14].mxu1 %vm231_vm1, %v2810_v15  ;;  %v2592_v35 = vadd.f32 %v2480_v58, %v2315_v19  ;;  %v1412_v6 = vadd.f32 %v1302_v57, %v1134_v4  ;;  %v1893_v40 = vsel %vm1257_vm4, %v1890_v14, %v1892_v26  ;;  %v2056_v60 = vmul.f32 %v4697_v13, %v5139_v2 }
 0x1b5   : > { %v2593_v38 = vadd.f32 %v2482_v49, %v2316_v17  ;;  %v2370_v27 = vmul.f32 %v4712_v10, %v812_v43  ;;  %v874_v22 = vmul.f32 %v4586_v63, %v4987_v46  ;;  %v1897_v55 = vrot.slane %v5180_v1, 2 }
 0x1b6   : > { %v2645_v5 = vmul.f32 %v4947_v20, %v2592_v35  ;;  %v1513_v42 = vadd.f32 %v1465_v36, %v1412_v6  ;;  %v879_v34 = vmul.f32 %v4586_v63, %v813_v16  ;;  %v5198_v9 = vmul.f32 %v4617_v51, %v5038_v0 }
 0x1b7   : > { %v2646_v26 = vmul.f32 %v4947_v20, %v2593_v38  ;;  %v2483_v14 = vrot.slane %v2370_v27, 2  ;;  %v5202_v37 = vmul.f32 %v4617_v51, %v5185_v39  ;;  %v1188_v29 = vmul.f32 %v4631_v24, %v4987_v46  ;;  %v5241_v38 = vld [vmem:[#allocation2 + $0x170] sm:$0xff] }
 0x1b8   : > { %v2698_v43 = vadd.f32 %v4958_v25, %v2645_v5  ;;  %v1726_v48 = vadd.f32 %v1629_v30, %v1513_v42  ;;  %v1189_v63 = vmul.f32 %v4631_v24, %v5038_v0  ;;  %v1040_v58 = vrot.slane %v5198_v9, 1 }
 0x1b9   : > { %v5210_v31 = vadd.f32 %v4958_v25, %v2646_v26  ;;  %v2484_v52 = vsel %vm1257_vm4, %v2481_v62, %v2483_v14  ;;  %v1045_v28 = vrot.slane %v5202_v37, 1  ;;  %v1303_v44 = vrot.slane %v1188_v29, 2  ;;  %v5483_v37 = vld [vmem:[%s6139_s3 + $0x4] ss:$0 sm:$0xff] }
 0x1ba   : > { %v2811_v51 = vrot.slane %v2698_v43, 7  ;;  %v2003_v18 = vadd.f32 %v1893_v40, %v1726_v48  ;;  %v1304_v33 = vrot.slane %v1189_v63, 2  ;;  %v1041_v46 = vsel %vm1011_vm3, %v1039_v54, %v1040_v58 }
 0x1bb   : > { %v2812_v30 = vrot.slane %v5210_v31, 7  ;;  %v5221_v19 = vadd.f32 %v1045_v28, %v879_v34  ;;  %v1467_v62 = vmul.f32 %v4665_v45, %v5083_v3  ;;  %v1136_v4 = vadd.f32 %v1041_v46, %v874_v22  ;;  %v816_v31 = vld [vmem:[#allocation2 + $0x178] sm:$0x1] }
 0x1bc   : > { %v2104_v49 = vadd.f32 %v2056_v60, %v2003_v18  ;;  %v1305_v57 = vsel %vm1257_vm4, %v1303_v44, %v1304_v33  ;;  %v1413_v15 = vadd.f32 %v1303_v44, %v5022_v50  ;;  %v5229_v36 = vmul.f32 %v4665_v45, %v813_v16 }
 0x1bd   : > { %v2813_v17 = vsel %vm2770_vm5, %v2811_v51, %v2812_v30  ;;  %v1558_v11 = vmul.f32 %v4791_v7, %v5083_v3  ;;  %v5235_v54 = vmul.f32 %v4791_v7, %v5139_v2  ;;  %v1414_v6 = vadd.f32 %v1305_v57, %v1136_v4 }
 0x1be   : > { %3573 = vmatprep.mubr.msk.f32.mxu1 %vm231_vm1, %v2813_v17  ;;  %v2317_v35 = vadd.f32 %v2220_v32, %v2104_v49  ;;  %v1514_v40 = vadd.f32 %v5126_v41, %v1413_v15  ;;  %v1780_v50 = vmul.f32 %v4684_v21, %v5083_v3  ;;  %v1781_v22 = vmul.f32 %v4684_v21, %v5139_v2  ;;  %v5269_v17 = vld [vmem:[%s6139_s3] ss:$0 sm:$0xff] }
 0x1bf   : > { %v1631_v60 = vrot.slane %v1558_v11, 1  ;;  %v1632_v27 = vrot.slane %v5235_v54, 1  ;;  %v2057_v5 = vmul.f32 %v4697_v13, %v813_v16  ;;  %v1515_v34 = vadd.f32 %v1467_v62, %v1414_v6 }
 0x1c0   : > { %v2594_v42 = vadd.f32 %v2484_v52, %v2317_v35  ;;  %v1894_v26 = vrot.slane %v1780_v50, 2  ;;  %v2058_v32 = vmul.f32 %v4697_v13, %v5185_v39  ;;  %v1895_v9 = vrot.slane %v1781_v22, 2 }
 0x1c1   : > { %v1633_v41 = vsel %vm1011_vm3, %v1631_v60, %v1632_v27  ;;  %v1727_v14 = vadd.f32 %v1631_v60, %v1514_v40  ;;  %v2149_v43 = vmul.f32 %v4934_v56, %v5185_v39  ;;  %v5257_v16 = vmul.f32 %v4934_v56, %v5241_v38 }
 0x1c2   : > { %v2647_v48 = vmul.f32 %v4947_v20, %v2594_v42  ;;  %v1728_v29 = vadd.f32 %v1633_v41, %v1515_v34  ;;  %v2371_v63 = vmul.f32 %v4712_v10, %v5185_v39  ;;  %v1896_v52 = vsel %vm1257_vm4, %v1894_v26, %v1895_v9  ;;  %v817_v41 = vld [vmem:[#allocation2 + $0x180] sm:$0xff] }
 0x1c3   : > { %v2004_v51 = vadd.f32 %v1894_v26, %v1727_v14  ;;  %v2222_v18 = vrot.slane %v2149_v43, 1  ;;  %v2372_v44 = vmul.f32 %v4712_v10, %v5241_v38  ;;  %v2223_v49 = vrot.slane %v5257_v16, 1 }
 0x1c4   : > { %v2700_v46 = vadd.f32 %v4958_v25, %v2647_v48  ;;  %v2005_v62 = vadd.f32 %v1896_v52, %v1728_v29  ;;  %v2485_v4 = vrot.slane %v2371_v63, 2  ;;  %v875_v11 = vmul.f32 %v5269_v17, %v5038_v0 }
 0x1c5   : > { %v2105_v57 = vadd.f32 %v2057_v5, %v2004_v51  ;;  %v2486_v15 = vrot.slane %v2372_v44, 2  ;;  %v5274_v35 = vmul.f32 %v4631_v24, %v816_v31  ;;  %v2224_v50 = vsel %vm1011_vm3, %v2222_v18, %v2223_v49 }
 0x1c6   : > { %v2814_v6 = vrot.slane %v2700_v46, 7  ;;  %v2106_v40 = vadd.f32 %v2058_v32, %v2005_v62  ;;  %v1307_v60 = vsel %vm1257_vm4, %v1304_v33, %v1306_v61  ;;  %v1137_v42 = vadd.f32 %v1040_v58, %v875_v11 }
 0x1c7   : > { %v2318_v22 = vadd.f32 %v2222_v18, %v2105_v57  ;;  %v2487_v5 = vsel %vm1257_vm4, %v2485_v4, %v2486_v15  ;;  %v1316_v34 = vrot.slane %v5274_v35, 2  ;;  %v1468_v26 = vmul.f32 %v4665_v45, %v5139_v2  ;;  %v825_v35 = vld [vmem:[#allocation2 + $0x1c0] sm:$0xff] }
 0x1c8   : > { %v2815_v0 = vsel %vm2770_vm5, %v2812_v30, %v2814_v6  ;;  %v2319_v24 = vadd.f32 %v2224_v50, %v2106_v40  ;;  %v5288_v32 = vmul.f32 %v4684_v21, %v816_v31  ;;  %v1415_v61 = vadd.f32 %v1307_v60, %v1137_v42  ;;  %v5296_v30 = vld [vmem:[#allocation2 + $0x188] sm:$0xff] }
 0x1c9   : > { %3574 = vmatmul.mubr.msk.f32.gmra.mrb[16].mxu1 %vm231_vm1, %v2815_v0  ;;  %v2595_v47 = vadd.f32 %v2485_v4, %v2318_v22  ;;  %v1898_v58 = vsel %vm1257_vm4, %v1895_v9, %v1897_v55  ;;  %v2059_v33 = vmul.f32 %v4697_v13, %v5241_v38  ;;  %v2373_v21 = vmul.f32 %v4712_v10, %v816_v31  ;;  %v5307_v55 = vld [vmem:[%s6139_s3 + $0x1] ss:$0 sm:$0xff]  ;;  %v5321_v31 = vld [vmem:[%s6139_s3 + $0x2] ss:$0 sm:$0xff] }
 0x1ca   : > { %v2596_v14 = vadd.f32 %v2487_v5, %v2319_v24  ;;  %v1902_v45 = vrot.slane %v5288_v32, 2  ;;  %v877_v43 = vmul.f32 %v5269_v17, %v5083_v3  ;;  %v1516_v29 = vadd.f32 %v1468_v26, %v1415_v61  ;;  %v5368_v61 = vld [vmem:[#allocation2 + $0x190] sm:$0xff] }
 0x1cb   : > { %v2648_v48 = vmul.f32 %v4947_v20, %v2595_v47  ;;  %v882_v1 = vmul.f32 %v5269_v17, %v817_v41  ;;  %v5311_v13 = vmul.f32 %v5307_v55, %v5139_v2  ;;  %v2488_v10 = vrot.slane %v2373_v21, 2 }
 0x1cc   : > { %v2649_v9 = vmul.f32 %v4947_v20, %v2596_v14  ;;  %v5316_v63 = vmul.f32 %v5307_v55, %v5296_v30  ;;  %v1191_v52 = vmul.f32 %v5321_v31, %v5083_v3  ;;  %v1729_v18 = vadd.f32 %v1632_v27, %v1516_v29 }
 0x1cd   : > { %v2701_v51 = vadd.f32 %v4958_v25, %v2648_v48  ;;  %v1043_v44 = vrot.slane %v5311_v13, 1  ;;  %v5331_v46 = vmul.f32 %v5321_v31, %v5139_v2  ;;  %v2489_v4 = vsel %vm1257_vm4, %v2486_v15, %v2488_v10 }
 0x1ce   : > { %v5334_v62 = vadd.f32 %v4958_v25, %v2649_v9  ;;  %v1048_v57 = vrot.slane %v5316_v63, 1  ;;  %v1308_v11 = vrot.slane %v1191_v52, 2  ;;  %v2006_v6 = vadd.f32 %v1898_v58, %v1729_v18 }
 0x1cf   : > { %v2816_v3 = vrot.slane %v2701_v51, 7  ;;  %v1044_v54 = vsel %vm1011_vm3, %v1042_v12, %v1043_v44  ;;  %v1309_v27 = vrot.slane %v5331_v46, 2  ;;  %v1470_v12 = vmul.f32 %v5354_v53, %v5185_v39 }
 0x1d0   : > { %v2817_v40 = vrot.slane %v5334_v62, 7  ;;  %v1139_v50 = vadd.f32 %v1044_v54, %v877_v43  ;;  %v5347_v60 = vadd.f32 %v1048_v57, %v882_v1  ;;  %v1416_v15 = vadd.f32 %v1308_v11, %v5119_v59 }
 0x1d1   : > { %v2107_v22 = vadd.f32 %v2059_v33, %v2006_v6  ;;  %v1310_v5 = vsel %vm1257_vm4, %v1308_v11, %v1309_v27  ;;  %v5359_v42 = vmul.f32 %v5354_v53, %v817_v41  ;;  %v1560_v59 = vmul.f32 %v4791_v7, %v5185_v39  ;;  %v5377_v33 = vld [vmem:[%s6139_s3 + $0x5] ss:$0 sm:$0xff] }
 0x1d2   : > { %v2818_v0 = vsel %vm2770_vm5, %v2816_v3, %v2817_v40  ;;  %v1417_v24 = vadd.f32 %v1310_v5, %v1139_v50  ;;  %v1517_v26 = vadd.f32 %v5229_v36, %v1416_v15  ;;  %v5372_v58 = vmul.f32 %v4791_v7, %v5241_v38  ;;  %v820_v3 = vld [vmem:[#allocation2 + $0x198] sm:$0x1] }
 0x1d3   : > { %3576 = vmatprep.mubr.msk.f32.mxu1 %vm231_vm1, %v2818_v0  ;;  %v2320_v47 = vadd.f32 %v2223_v49, %v2107_v22  ;;  %v1783_v36 = vmul.f32 %v5377_v33, %v5185_v39  ;;  %v1784_v14 = vmul.f32 %v5377_v33, %v5241_v38  ;;  %v1634_v16 = vrot.slane %v1560_v59, 1  ;;  %v5386_v49 = vld [vmem:[%s6139_s3 + $0x6] ss:$0 sm:$0xff] }
 0x1d4   : > { %v1518_v21 = vadd.f32 %v1470_v12, %v1417_v24  ;;  %v2060_v7 = vmul.f32 %v5386_v49, %v817_v41  ;;  %v2061_v43 = vmul.f32 %v5386_v49, %v5296_v30  ;;  %v1635_v29 = vrot.slane %v5372_v58, 1  ;;  %v5401_v41 = vld [vmem:[%s6139_s3 + $0x8] ss:$0 sm:$0xff] }
 0x1d5   : > { %v2597_v48 = vadd.f32 %v2489_v4, %v2320_v47  ;;  %v1899_v1 = vrot.slane %v1783_v36, 2  ;;  %v1900_v9 = vrot.slane %v1784_v14, 2  ;;  %v1730_v10 = vadd.f32 %v1634_v16, %v1517_v26 }
 0x1d6   : > { %v2151_v52 = vmul.f32 %v4934_v56, %v5296_v30  ;;  %v5396_v51 = vmul.f32 %v4934_v56, %v5368_v61  ;;  %v2374_v18 = vmul.f32 %v5401_v41, %v5296_v30  ;;  %v1636_v62 = vsel %vm1011_vm3, %v1634_v16, %v1635_v29 }
 0x1d7   : > { %v2650_v46 = vmul.f32 %v4947_v20, %v2597_v48  ;;  %v1901_v4 = vsel %vm1257_vm4, %v1899_v1, %v1900_v9  ;;  %v2375_v11 = vmul.f32 %v5401_v41, %v5368_v61  ;;  %v1731_v6 = vadd.f32 %v1636_v62, %v1518_v21 }
 0x1d8   : > { %v2007_v54 = vadd.f32 %v1899_v1, %v1730_v10  ;;  %v2225_v50 = vrot.slane %v2151_v52, 1  ;;  %v2226_v15 = vrot.slane %v5396_v51, 1  ;;  %v2490_v5 = vrot.slane %v2374_v18, 2  ;;  %v821_v1 = vld [vmem:[#allocation2 + $0x1a0] sm:$0xff] }
 0x1d9   : > { %v2703_v22 = vadd.f32 %v4958_v25, %v2650_v46  ;;  %v2491_v12 = vrot.slane %v2375_v11, 2  ;;  %v878_v0 = vmul.f32 %v5269_v17, %v5139_v2  ;;  %v2008_v24 = vadd.f32 %v1901_v4, %v1731_v6 }
 0x1da   : > { %v2108_v26 = vadd.f32 %v2060_v7, %v2007_v54  ;;  %v2227_v59 = vsel %vm1011_vm3, %v2225_v50, %v2226_v15  ;;  %v5416_v47 = vmul.f32 %v5321_v31, %v820_v3  ;;  %v1312_v21 = vsel %vm1257_vm4, %v1309_v27, %v1311_v8 }
 0x1db   : > { %v2819_v58 = vrot.slane %v2703_v22, 7  ;;  %v2492_v36 = vsel %vm1257_vm4, %v2490_v5, %v2491_v12  ;;  %v1140_v14 = vadd.f32 %v1043_v44, %v878_v0  ;;  %v2109_v16 = vadd.f32 %v2061_v43, %v2008_v24  ;;  %v5438_v43 = vld [vmem:[#allocation2 + $0x1a8] sm:$0xff] }
 0x1dc   : > { %v2321_v48 = vadd.f32 %v2225_v50, %v2108_v26  ;;  %v1321_v2 = vrot.slane %v5416_v47, 2  ;;  %v1471_v7 = vmul.f32 %v5354_v53, %v5241_v38  ;;  %v5429_v51 = vmul.f32 %v5377_v33, %v820_v3 }
 0x1dd   : > { %v2820_v10 = vsel %vm2770_vm5, %v2817_v40, %v2819_v58  ;;  %v1418_v52 = vadd.f32 %v1312_v21, %v1140_v14  ;;  %v1903_v23 = vsel %vm1257_vm4, %v1900_v9, %v1902_v45  ;;  %v2322_v8 = vadd.f32 %v2227_v59, %v2109_v16 }
 0x1de   : > { %3577 = vmatmul.mubr.msk.f32.gmra.mrb[18].mxu1 %vm231_vm1, %v2820_v10  ;;  %v2598_v13 = vadd.f32 %v2490_v5, %v2321_v48  ;;  %v2062_v44 = vmul.f32 %v5386_v49, %v5368_v61  ;;  %v2376_v27 = vmul.f32 %v5401_v41, %v820_v3  ;;  %v1907_v18 = vrot.slane %v5429_v51, 2 }
 0x1df   : > { %v1519_v40 = vadd.f32 %v1471_v7, %v1418_v52  ;;  %v880_v46 = vmul.f32 %v5269_v17, %v5185_v39  ;;  %v885_v32 = vmul.f32 %v5269_v17, %v821_v1  ;;  %v2599_v45 = vadd.f32 %v2492_v36, %v2322_v8 }
 0x1e0   : > { %v2651_v9 = vmul.f32 %v4947_v20, %v2598_v13  ;;  %v2493_v62 = vrot.slane %v2376_v27, 2  ;;  %v5447_v4 = vmul.f32 %v5307_v55, %v5241_v38  ;;  %v5451_v3 = vmul.f32 %v5307_v55, %v5438_v43  ;;  %v5494_v27 = vld [vmem:[#allocation2 + $0x1b0] sm:$0xff] }
 0x1e1   : > { %v1732_v11 = vadd.f32 %v1635_v29, %v1519_v40  ;;  %v1194_v6 = vmul.f32 %v5321_v31, %v5185_v39  ;;  %v5457_v54 = vmul.f32 %v5321_v31, %v5241_v38  ;;  %v2652_v50 = vmul.f32 %v4947_v20, %v2599_v45 }
 0x1e2   : > { %v2704_v22 = vadd.f32 %v4958_v25, %v2651_v9  ;;  %v2494_v5 = vsel %vm1257_vm4, %v2491_v12, %v2493_v62  ;;  %v1046_v0 = vrot.slane %v5447_v4, 1  ;;  %v1051_v24 = vrot.slane %v5451_v3, 1 }
 0x1e3   : > { %v2009_v29 = vadd.f32 %v1903_v23, %v1732_v11  ;;  %v1313_v26 = vrot.slane %v1194_v6, 2  ;;  %v1314_v59 = vrot.slane %v5457_v54, 2  ;;  %v2705_v39 = vadd.f32 %v4958_v25, %v2652_v50 }
 0x1e4   : > { %v2821_v58 = vrot.slane %v2704_v22, 7  ;;  %v1047_v36 = vsel %vm1011_vm3, %v1045_v28, %v1046_v0  ;;  %v1473_v14 = vmul.f32 %v5354_v53, %v5296_v30  ;;  %v5473_v16 = vadd.f32 %v1051_v24, %v885_v32 }
 0x1e5   : > { %v2110_v21 = vadd.f32 %v2062_v44, %v2009_v29  ;;  %v1142_v12 = vadd.f32 %v1047_v36, %v880_v46  ;;  %v1315_v48 = vsel %vm1257_vm4, %v1313_v26, %v1314_v59  ;;  %v2822_v7 = vrot.slane %v2705_v39, 7 }
 0x1e6   : > { %v1419_v10 = vadd.f32 %v1313_v26, %v5221_v19  ;;  %v5478_v52 = vmul.f32 %v5354_v53, %v821_v1  ;;  %v1562_v28 = vmul.f32 %v5483_v37, %v5296_v30  ;;  %v5489_v13 = vmul.f32 %v5483_v37, %v5368_v61 }
 0x1e7   : > { %v2323_v23 = vadd.f32 %v2226_v15, %v2110_v21  ;;  %v1420_v8 = vadd.f32 %v1315_v48, %v1142_v12  ;;  %v1786_v19 = vmul.f32 %v5377_v33, %v5296_v30  ;;  %v2823_v44 = vsel %vm2770_vm5, %v2821_v58, %v2822_v7  ;;  %v824_v58 = vld [vmem:[#allocation2 + $0x1b8] sm:$0x1] }
 0x1e8   : > { %v1520_v40 = vadd.f32 %v5359_v42, %v1419_v10  ;;  %v1637_v46 = vrot.slane %v1562_v28, 1  ;;  %v1787_v32 = vmul.f32 %v5377_v33, %v5368_v61  ;;  %3579 = vmatprep.mubr.msk.f32.mxu1 %vm231_vm1, %v2823_v44  ;;  %v1638_v9 = vrot.slane %v5489_v13, 1 }
 0x1e9   : > { %v2600_v15 = vadd.f32 %v2494_v5, %v2323_v23  ;;  %v1521_v45 = vadd.f32 %v1473_v14, %v1420_v8  ;;  %v1904_v62 = vrot.slane %v1786_v19, 2  ;;  %v2063_v6 = vmul.f32 %v5386_v49, %v821_v1 }
 0x1ea   : > { %v1733_v4 = vadd.f32 %v1637_v46, %v1520_v40  ;;  %v1905_v11 = vrot.slane %v1787_v32, 2  ;;  %v2064_v54 = vmul.f32 %v5386_v49, %v5438_v43  ;;  %v1639_v50 = vsel %vm1011_vm3, %v1637_v46, %v1638_v9 }
 0x1eb   : > { %v2653_v42 = vmul.f32 %v4947_v20, %v2600_v15  ;;  %v2153_v22 = vmul.f32 %v4934_v56, %v5438_v43  ;;  %v5510_v5 = vmul.f32 %v4934_v56, %v5494_v27  ;;  %v1734_v29 = vadd.f32 %v1639_v50, %v1521_v45 }
 0x1ec   : > { %v1906_v26 = vsel %vm1257_vm4, %v1904_v62, %v1905_v11  ;;  %v2010_v39 = vadd.f32 %v1904_v62, %v1733_v4  ;;  %v2377_v1 = vmul.f32 %v5401_v41, %v5438_v43  ;;  %v2378_v12 = vmul.f32 %v5401_v41, %v5494_v27 }
 0x1ed   : > { %v2706_v36 = vadd.f32 %v4958_v25, %v2653_v42  ;;  %v2228_v14 = vrot.slane %v2153_v22, 1  ;;  %v2229_v21 = vrot.slane %v5510_v5, 1  ;;  %v2011_v48 = vadd.f32 %v1906_v26, %v1734_v29  ;;  %v5539_v42 = vld [vmem:[#allocation2 + $0x1c8] sm:$0xff] }
 0x1ee   : > { %v2111_v10 = vadd.f32 %v2063_v6, %v2010_v39  ;;  %v2495_v56 = vrot.slane %v2377_v1, 2  ;;  %v881_v28 = vmul.f32 %v5269_v17, %v5241_v38  ;;  %v2496_v13 = vrot.slane %v2378_v12, 2 }
 0x1ef   : > { %v2824_v23 = vrot.slane %v2706_v36, 7  ;;  %v2230_v8 = vsel %vm1011_vm3, %v2228_v14, %v2229_v21  ;;  %v5525_v19 = vmul.f32 %v5321_v31, %v824_v58  ;;  %v2112_v44 = vadd.f32 %v2064_v54, %v2011_v48 }
 0x1f0   : > { %v2324_v40 = vadd.f32 %v2228_v14, %v2111_v10  ;;  %v1143_v46 = vadd.f32 %v1046_v0, %v881_v28  ;;  %v1317_v32 = vsel %vm1257_vm4, %v1314_v59, %v1316_v34  ;;  %v2497_v38 = vsel %vm1257_vm4, %v2495_v56, %v2496_v13 }
 0x1f1   : > { %v2825_v15 = vsel %vm2770_vm5, %v2822_v7, %v2824_v23  ;;  %v1326_v45 = vrot.slane %v5525_v19, 2  ;;  %v1474_v62 = vmul.f32 %v5354_v53, %v5368_v61  ;;  %v2325_v4 = vadd.f32 %v2230_v8, %v2112_v44 }
 0x1f2   : > { %3580 = vmatmul.mubr.msk.f32.gmra.mrb[20].mxu1 %vm231_vm1, %v2825_v15  ;;  %v2601_v6 = vadd.f32 %v2495_v56, %v2324_v40  ;;  %v1421_v54 = vadd.f32 %v1317_v32, %v1143_v46  ;;  %v5537_v0 = vmul.f32 %v5377_v33, %v824_v58  ;;  %v1908_v34 = vsel %vm1257_vm4, %v1905_v11, %v1907_v18  ;;  %v5560_v11 = vpop.f32.mrb[0].mxu1 }
 0x1f3   : > { %v2065_v59 = vmul.f32 %v5386_v49, %v5494_v27  ;;  %v2379_v7 = vmul.f32 %v5401_v41, %v824_v58  ;;  %v883_v50 = vmul.f32 %v5269_v17, %v5296_v30  ;;  %v2602_v22 = vadd.f32 %v2497_v38, %v2325_v4  ;;  %v5566_v10 = vpop.f32.mrb[1].mxu1 }
 0x1f4   : > { %v2654_v29 = vmul.f32 %v4947_v20, %v2601_v6  ;;  %v1522_v26 = vadd.f32 %v1474_v62, %v1421_v54  ;;  %v1912_v39 = vrot.slane %v5537_v0, 2  ;;  %v888_v36 = vmul.f32 %v5269_v17, %v825_v35 }
 0x1f5   : > { %v2498_v1 = vrot.slane %v2379_v7, 2  ;;  %v5554_v51 = vmul.f32 %v5307_v55, %v5368_v61  ;;  %v5558_v18 = vmul.f32 %v5307_v55, %v5539_v42  ;;  %v2655_v58 = vmul.f32 %v4947_v20, %v2602_v22  ;;  %v5607_v7 = vld [vmem:[#allocation2 + $0x1d0] sm:$0xff] }
 0x1f6   : > { %v2707_v14 = vadd.f32 %v4958_v25, %v2654_v29  ;;  %v1735_v12 = vadd.f32 %v1638_v9, %v1522_v26  ;;  %v1197_v48 = vmul.f32 %v5321_v31, %v5296_v30  ;;  %v5573_v8 = vmul.f32 %v5321_v31, %v5368_v61 }
 0x1f7   : > { %v2499_v56 = vsel %vm1257_vm4, %v2496_v13, %v2498_v1  ;;  %v1049_v28 = vrot.slane %v5554_v51, 1  ;;  %v1054_v23 = vrot.slane %v5558_v18, 1  ;;  %v5576_v20 = vadd.f32 %v4958_v25, %v2655_v58 }
 0x1f8   : > { %v2826_v44 = vrot.slane %v2707_v14, 7  ;;  %v2012_v9 = vadd.f32 %v1908_v34, %v1735_v12  ;;  %v1318_v40 = vrot.slane %v1197_v48, 2  ;;  %v1319_v46 = vrot.slane %v5573_v8, 2  ;;  %v5623_v48 = vld [vmem:[%s6139_s3 + $0xb] ss:$0 sm:$0xff] }
 0x1f9   : > { %v1050_v30 = vsel %vm1011_vm3, %v1048_v57, %v1049_v28  ;;  %v5585_v13 = vadd.f32 %v1054_v23, %v888_v36  ;;  %v1476_v32 = vmul.f32 %v5354_v53, %v5438_v43  ;;  %v2827_v25 = vrot.slane %v5576_v20, 7 }
 0x1fa   : > { %v2113_v15 = vadd.f32 %v2065_v59, %v2012_v9  ;;  %v1145_v38 = vadd.f32 %v1050_v30, %v883_v50  ;;  %v1422_v62 = vadd.f32 %v1318_v40, %v5347_v60  ;;  %v1320_v4 = vsel %vm1257_vm4, %v1318_v40, %v1319_v46 }
 0x1fb   : > { %v5594_v63 = vmul.f32 %v5354_v53, %v825_v35  ;;  %v1564_v57 = vmul.f32 %v5483_v37, %v5438_v43  ;;  %v5600_v6 = vmul.f32 %v5483_v37, %v5494_v27  ;;  %v2828_v54 = vsel %vm2770_vm5, %v2826_v44, %v2827_v25 }
 0x1fc   : > { %v2326_v34 = vadd.f32 %v2229_v21, %v2113_v15  ;;  %v1423_v59 = vadd.f32 %v1320_v4, %v1145_v38  ;;  %v1523_v60 = vadd.f32 %v5478_v52, %v1422_v62  ;;  %3582 = vmatprep.mubr.msk.f32.mxu1 %vm231_vm1, %v2828_v54  ;;  %v1789_v29 = vmul.f32 %v5377_v33, %v5438_v43  ;;  %v828_v15 = vld [vmem:[#allocation2 + $0x1d8] sm:$0x1]  ;;  %v5645_v38 = vld [vmem:[%s6139_s3 + $0xc] ss:$0 sm:$0xff] }
 0x1fd   : > { %v1640_v50 = vrot.slane %v1564_v57, 1  ;;  %v1641_v22 = vrot.slane %v5600_v6, 1  ;;  %v1790_v26 = vmul.f32 %v5377_v33, %v5494_v27  ;;  %v2066_v5 = vmul.f32 %v5386_v49, %v825_v35  ;;  %v5629_v35 = vld [vmem:[%s6139_s3 + $0x7] ss:$0 sm:$0xff] }
 0x1fe   : > { %v2603_v1 = vadd.f32 %v2499_v56, %v2326_v34  ;;  %v1524_v36 = vadd.f32 %v1476_v32, %v1423_v59  ;;  %v2067_v52 = vmul.f32 %v5386_v49, %v5539_v42  ;;  %v1909_v14 = vrot.slane %v1789_v29, 2 }
 0x1ff   : > { %v1642_v21 = vsel %vm1011_vm3, %v1640_v50, %v1641_v22  ;;  %v1736_v58 = vadd.f32 %v1640_v50, %v1523_v60  ;;  %v1910_v12 = vrot.slane %v1790_v26, 2  ;;  %v2155_v20 = vmul.f32 %v5629_v35, %v5539_v42 }
 0x200   : > { %v2656_v56 = vmul.f32 %v5623_v48, %v2603_v1  ;;  %v1737_v8 = vadd.f32 %v1642_v21, %v1524_v36  ;;  %v5635_v44 = vmul.f32 %v5629_v35, %v5607_v7  ;;  %v2380_v30 = vmul.f32 %v5401_v41, %v5539_v42 }
 0x201   : > { %v1911_v9 = vsel %vm1257_vm4, %v1909_v14, %v1910_v12  ;;  %v2013_v40 = vadd.f32 %v1909_v14, %v1736_v58  ;;  %v2381_v32 = vmul.f32 %v5401_v41, %v5607_v7  ;;  %v2231_v57 = vrot.slane %v2155_v20, 1  ;;  %v829_v20 = vld [vmem:[#allocation2 + $0x1e0] sm:$0xff] }
 0x202   : > { %v2709_v62 = vadd.f32 %v5645_v38, %v2656_v56  ;;  %v2014_v4 = vadd.f32 %v1911_v9, %v1737_v8  ;;  %v2232_v54 = vrot.slane %v5635_v44, 1  ;;  %v2500_v59 = vrot.slane %v2380_v30, 2 }
 0x203   : > { %v2114_v34 = vadd.f32 %v2066_v5, %v2013_v40  ;;  %v2501_v60 = vrot.slane %v2381_v32, 2  ;;  %v884_v50 = vmul.f32 %v5269_v17, %v5368_v61  ;;  %v5653_v36 = vmul.f32 %v5321_v31, %v828_v15 }
 0x204   : > { %v2829_v29 = vrot.slane %v2709_v62, 7  ;;  %v2115_v26 = vadd.f32 %v2067_v52, %v2014_v4  ;;  %v2233_v1 = vsel %vm1011_vm3, %v2231_v57, %v2232_v54  ;;  %v1322_v5 = vsel %vm1257_vm4, %v1319_v46, %v1321_v2  ;;  %v5672_v2 = vld [vmem:[#allocation2 + $0x1e8] sm:$0xff] }
 0x205   : > { %v2327_v21 = vadd.f32 %v2231_v57, %v2114_v34  ;;  %v2502_v58 = vsel %vm1257_vm4, %v2500_v59, %v2501_v60  ;;  %v1146_v14 = vadd.f32 %v1049_v28, %v884_v50  ;;  %v1331_v52 = vrot.slane %v5653_v36, 2 }
 0x206   : > { %v2830_v56 = vsel %vm2770_vm5, %v2827_v25, %v2829_v29  ;;  %v2328_v61 = vadd.f32 %v2233_v1, %v2115_v26  ;;  %v1477_v8 = vmul.f32 %v5354_v53, %v5494_v27  ;;  %v5667_v51 = vmul.f32 %v5377_v33, %v828_v15 }
 0x207   : > { %3583 = vmatmul.mubr.msk.f32.gmra.mrb[22].mxu1 %vm231_vm1, %v2830_v56  ;;  %v2604_v44 = vadd.f32 %v2500_v59, %v2327_v21  ;;  %v1424_v9 = vadd.f32 %v1322_v5, %v1146_v14  ;;  %v1913_v47 = vsel %vm1257_vm4, %v1910_v12, %v1912_v39  ;;  %v2068_v46 = vmul.f32 %v5386_v49, %v5607_v7 }
 0x208   : > { %v2605_v28 = vadd.f32 %v2502_v58, %v2328_v61  ;;  %v2382_v25 = vmul.f32 %v5401_v41, %v828_v15  ;;  %v886_v40 = vmul.f32 %v5269_v17, %v5438_v43  ;;  %v1917_v62 = vrot.slane %v5667_v51, 2 }
 0x209   : > { %v2657_v30 = vmul.f32 %v5623_v48, %v2604_v44  ;;  %v1525_v32 = vadd.f32 %v1477_v8, %v1424_v9  ;;  %v891_v0 = vmul.f32 %v5269_v17, %v829_v20  ;;  %v5685_v4 = vmul.f32 %v5307_v55, %v5494_v27 }
 0x20a   : > { %v2658_v39 = vmul.f32 %v5623_v48, %v2605_v28  ;;  %v2503_v12 = vrot.slane %v2382_v25, 2  ;;  %v5689_v15 = vmul.f32 %v5307_v55, %v5672_v2  ;;  %v1200_v59 = vmul.f32 %v5321_v31, %v5438_v43 }
 0x20b   : > { %v2710_v57 = vadd.f32 %v5645_v38, %v2657_v30  ;;  %v1738_v34 = vadd.f32 %v1641_v22, %v1525_v32  ;;  %v5698_v50 = vmul.f32 %v5321_v31, %v5494_v27  ;;  %v1052_v1 = vrot.slane %v5685_v4, 1 }
 0x20c   : > { %v5701_v29 = vadd.f32 %v5645_v38, %v2658_v39  ;;  %v2504_v26 = vsel %vm1257_vm4, %v2501_v60, %v2503_v12  ;;  %v1057_v21 = vrot.slane %v5689_v15, 1  ;;  %v1323_v6 = vrot.slane %v1200_v59, 2 }
 0x20d   : > { %v2831_v58 = vrot.slane %v2710_v57, 7  ;;  %v2015_v14 = vadd.f32 %v1913_v47, %v1738_v34  ;;  %v1324_v22 = vrot.slane %v5698_v50, 2  ;;  %v1053_v5 = vsel %vm1011_vm3, %v1051_v24, %v1052_v1  ;;  %v5729_v25 = vpop.f32.mrb[2].mxu1 }
 0x20e   : > { %v2832_v43 = vrot.slane %v5701_v29, 7  ;;  %v5713_v56 = vadd.f32 %v1057_v21, %v891_v0  ;;  %v1479_v60 = vmul.f32 %v5354_v53, %v5539_v42  ;;  %v1148_v8 = vadd.f32 %v1053_v5, %v886_v40  ;;  %v5735_v32 = vpop.f32.mrb[3].mxu1  ;;  %v5737_v0 = vld [vmem:[#allocation2 + $0x1f0] sm:$0xff] }
 0x20f   : > { %v2116_v61 = vadd.f32 %v2068_v46, %v2015_v14  ;;  %v1325_v44 = vsel %vm1257_vm4, %v1323_v6, %v1324_v22  ;;  %v1425_v9 = vadd.f32 %v1323_v6, %v5473_v16  ;;  %v5721_v28 = vmul.f32 %v5354_v53, %v829_v20 }
 0x210   : > { %v2833_v47 = vsel %vm2770_vm5, %v2831_v58, %v2832_v43  ;;  %v1566_v3 = vmul.f32 %v5483_v37, %v5539_v42  ;;  %v5727_v24 = vmul.f32 %v5483_v37, %v5607_v7  ;;  %v1426_v40 = vadd.f32 %v1325_v44, %v1148_v8 }
 0x211   : > { %3585 = vmatprep.mubr.msk.f32.mxu1 %vm231_vm1, %v2833_v47  ;;  %v2329_v46 = vadd.f32 %v2232_v54, %v2116_v61  ;;  %v1526_v16 = vadd.f32 %v5594_v63, %v1425_v9  ;;  %v1792_v30 = vmul.f32 %v5377_v33, %v5539_v42  ;;  %v1793_v4 = vmul.f32 %v5377_v33, %v5607_v7 }
 0x212   : > { %v1643_v39 = vrot.slane %v1566_v3, 1  ;;  %v1644_v12 = vrot.slane %v5727_v24, 1  ;;  %v2069_v57 = vmul.f32 %v5386_v49, %v829_v20  ;;  %v1527_v54 = vadd.f32 %v1479_v60, %v1426_v40 }
 0x213   : > { %v2606_v34 = vadd.f32 %v2504_v26, %v2329_v46  ;;  %v1914_v59 = vrot.slane %v1792_v30, 2  ;;  %v2070_v63 = vmul.f32 %v5386_v49, %v5672_v2  ;;  %v1915_v58 = vrot.slane %v1793_v4, 2  ;;  %v832_v26 = vld [vmem:[#allocation2 + $0x1f8] sm:$0x1] }
 0x214   : > { %v1645_v50 = vsel %vm1011_vm3, %v1643_v39, %v1644_v12  ;;  %v1739_v29 = vadd.f32 %v1643_v39, %v1526_v16  ;;  %v2157_v14 = vmul.f32 %v5629_v35, %v5672_v2  ;;  %v5751_v61 = vmul.f32 %v5629_v35, %v5737_v0 }
 0x215   : > { %v2659_v6 = vmul.f32 %v5623_v48, %v2606_v34  ;;  %v1740_v5 = vadd.f32 %v1645_v50, %v1527_v54  ;;  %v2383_v20 = vmul.f32 %v5401_v41, %v5672_v2  ;;  %v1916_v60 = vsel %vm1257_vm4, %v1914_v59, %v1915_v58 }
 0x216   : > { %v2016_v8 = vadd.f32 %v1914_v59, %v1739_v29  ;;  %v2234_v44 = vrot.slane %v2157_v14, 1  ;;  %v2384_v9 = vmul.f32 %v5401_v41, %v5737_v0  ;;  %v2235_v24 = vrot.slane %v5751_v61, 1 }
 0x217   : > { %v2712_v47 = vadd.f32 %v5645_v38, %v2659_v6  ;;  %v2017_v3 = vadd.f32 %v1916_v60, %v1740_v5  ;;  %v2505_v46 = vrot.slane %v2383_v20, 2  ;;  %v887_v30 = vmul.f32 %v5269_v17, %v5494_v27 }
 0x218   : > { %v2117_v40 = vadd.f32 %v2069_v57, %v2016_v8  ;;  %v2506_v16 = vrot.slane %v2384_v9, 2  ;;  %v5763_v39 = vmul.f32 %v5321_v31, %v832_v26  ;;  %v2236_v54 = vsel %vm1011_vm3, %v2234_v44, %v2235_v24 }
 0x219   : > { %v2834_v4 = vrot.slane %v2712_v47, 7  ;;  %v2118_v34 = vadd.f32 %v2070_v63, %v2017_v3  ;;  %v1327_v59 = vsel %vm1257_vm4, %v1324_v22, %v1326_v45  ;;  %v1149_v29 = vadd.f32 %v1052_v1, %v887_v30  ;;  %v833_v47 = vld [vmem:[#allocation2 + $0x200] sm:$0xff] }
 0x21a   : > { %v2330_v50 = vadd.f32 %v2234_v44, %v2117_v40  ;;  %v2507_v57 = vsel %vm1257_vm4, %v2505_v46, %v2506_v16  ;;  %v1336_v14 = vrot.slane %v5763_v39, 2  ;;  %v1480_v63 = vmul.f32 %v5354_v53, %v5607_v7 }
 0x21b   : > { %v2835_v27 = vsel %vm2770_vm5, %v2832_v43, %v2834_v4  ;;  %v2331_v6 = vadd.f32 %v2236_v54, %v2118_v34  ;;  %v5777_v5 = vmul.f32 %v5377_v33, %v832_v26  ;;  %v1427_v20 = vadd.f32 %v1327_v59, %v1149_v29 }
 0x21c   : > { %3586 = vmatmul.mubr.msk.f32.gmra.mrb[24].mxu1 %vm231_vm1, %v2835_v27  ;;  %v2607_v19 = vadd.f32 %v2505_v46, %v2330_v50  ;;  %v1918_v45 = vsel %vm1257_vm4, %v1915_v58, %v1917_v62  ;;  %v2071_v1 = vmul.f32 %v5386_v49, %v5737_v0  ;;  %v2385_v60 = vmul.f32 %v5401_v41, %v832_v26 }
 0x21d   : > { %v2608_v22 = vadd.f32 %v2507_v57, %v2331_v6  ;;  %v1922_v43 = vrot.slane %v5777_v5, 2  ;;  %v889_v8 = vmul.f32 %v5269_v17, %v5539_v42  ;;  %v1528_v9 = vadd.f32 %v1480_v63, %v1427_v20 }
 0x21e   : > { %v2660_v44 = vmul.f32 %v5623_v48, %v2607_v19  ;;  %v5792_v51 = vmul.f32 %v5307_v55, %v5607_v7  ;;  %v1203_v62 = vmul.f32 %v5321_v31, %v5539_v42  ;;  %v2508_v3 = vrot.slane %v2385_v60, 2  ;;  %v5814_v6 = vpop.f32.mrb[4].mxu1 }
 0x21f   : > { %v2661_v58 = vmul.f32 %v5623_v48, %v2608_v22  ;;  %v1204_v26 = vmul.f32 %v5321_v31, %v5607_v7  ;;  %v1482_v46 = vmul.f32 %v5354_v53, %v5672_v2  ;;  %v1741_v30 = vadd.f32 %v1644_v12, %v1528_v9  ;;  %v5820_v22 = vpop.f32.mrb[5].mxu1 }
 0x220   : > { %v2713_v40 = vadd.f32 %v5645_v38, %v2660_v44  ;;  %v1055_v4 = vrot.slane %v5792_v51, 1  ;;  %v1328_v34 = vrot.slane %v1203_v62, 2  ;;  %v2509_v42 = vsel %vm1257_vm4, %v2506_v16, %v2508_v3  ;;  %v5832_v44 = vld [vmem:[#allocation2 + $0x210] sm:$0xff] }
 0x221   : > { %v5804_v54 = vadd.f32 %v5645_v38, %v2661_v58  ;;  %v1329_v59 = vrot.slane %v1204_v26, 2  ;;  %v5808_v50 = vmul.f32 %v5354_v53, %v833_v47  ;;  %v2018_v29 = vadd.f32 %v1918_v45, %v1741_v30  ;;  %v5822_v45 = vld [vmem:[#allocation2 + $0x208] sm:$0xff] }
 0x222   : > { %v2836_v57 = vrot.slane %v2713_v40, 7  ;;  %v1056_v27 = vsel %vm1011_vm3, %v1054_v23, %v1055_v4  ;;  %v1428_v12 = vadd.f32 %v1328_v34, %v5585_v13  ;;  %v1568_v16 = vmul.f32 %v5483_v37, %v5672_v2 }
 0x223   : > { %v2837_v63 = vrot.slane %v5804_v54, 7  ;;  %v1151_v19 = vadd.f32 %v1056_v27, %v889_v8  ;;  %v1330_v20 = vsel %vm1257_vm4, %v1328_v34, %v1329_v59  ;;  %v2119_v60 = vadd.f32 %v2071_v1, %v2018_v29 }
 0x224   : > { %v1529_v18 = vadd.f32 %v5721_v28, %v1428_v12  ;;  %v5827_v23 = vmul.f32 %v5483_v37, %v5737_v0  ;;  %v1795_v13 = vmul.f32 %v5377_v33, %v5672_v2  ;;  %v1646_v51 = vrot.slane %v1568_v16, 1 }
 0x225   : > { %v2838_v8 = vsel %vm2770_vm5, %v2836_v57, %v2837_v63  ;;  %v1429_v9 = vadd.f32 %v1330_v20, %v1151_v19  ;;  %v1796_v1 = vmul.f32 %v5377_v33, %v5737_v0  ;;  %v2332_v28 = vadd.f32 %v2235_v24, %v2119_v60 }
 0x226   : > { %3588 = vmatprep.mubr.msk.f32.mxu1 %vm231_vm1, %v2838_v8  ;;  %v1647_v62 = vrot.slane %v5827_v23, 1  ;;  %v1919_v58 = vrot.slane %v1795_v13, 2  ;;  %v2072_v3 = vmul.f32 %v5386_v49, %v833_v47  ;;  %v1742_v40 = vadd.f32 %v1646_v51, %v1529_v18  ;;  %v836_v23 = vld [vmem:[#allocation2 + $0x218] sm:$0x1] }
 0x227   : > { %v1530_v26 = vadd.f32 %v1482_v46, %v1429_v9  ;;  %v1920_v30 = vrot.slane %v1796_v1, 2  ;;  %v2073_v34 = vmul.f32 %v5386_v49, %v5822_v45  ;;  %v2609_v54 = vadd.f32 %v2509_v42, %v2332_v28 }
 0x228   : > { %v1648_v57 = vsel %vm1011_vm3, %v1646_v51, %v1647_v62  ;;  %v2159_v29 = vmul.f32 %v5629_v35, %v5822_v45  ;;  %v5848_v61 = vmul.f32 %v5629_v35, %v5832_v44  ;;  %v2019_v47 = vadd.f32 %v1919_v58, %v1742_v40 }
 0x229   : > { %v1743_v24 = vadd.f32 %v1648_v57, %v1530_v26  ;;  %v1921_v27 = vsel %vm1257_vm4, %v1919_v58, %v1920_v30  ;;  %v2386_v46 = vmul.f32 %v5401_v41, %v5822_v45  ;;  %v2662_v12 = vmul.f32 %v5623_v48, %v2609_v54 }
 0x22a   : > { %v2237_v19 = vrot.slane %v2159_v29, 1  ;;  %v2238_v42 = vrot.slane %v5848_v61, 1  ;;  %v2387_v20 = vmul.f32 %v5401_v41, %v5832_v44  ;;  %v2120_v60 = vadd.f32 %v2072_v3, %v2019_v47 }
 0x22b   : > { %v2020_v16 = vadd.f32 %v1921_v27, %v1743_v24  ;;  %v2510_v18 = vrot.slane %v2386_v46, 2  ;;  %v890_v13 = vmul.f32 %v5269_v17, %v5607_v7  ;;  %v2715_v8 = vadd.f32 %v5645_v38, %v2662_v12 }
 0x22c   : > { %v2239_v9 = vsel %vm1011_vm3, %v2237_v19, %v2238_v42  ;;  %v2511_v51 = vrot.slane %v2387_v20, 2  ;;  %v1332_v1 = vsel %vm1257_vm4, %v1329_v59, %v1331_v52  ;;  %v2333_v58 = vadd.f32 %v2237_v19, %v2120_v60 }
 0x22d   : > { %v2121_v28 = vadd.f32 %v2073_v34, %v2020_v16  ;;  %v1152_v26 = vadd.f32 %v1055_v4, %v890_v13  ;;  %v1483_v3 = vmul.f32 %v5354_v53, %v5737_v0  ;;  %v2839_v40 = vrot.slane %v2715_v8, 7 }
 0x22e   : > { %v2512_v7 = vsel %vm1257_vm4, %v2510_v18, %v2511_v51  ;;  %v5870_v54 = vmul.f32 %v5377_v33, %v836_v23  ;;  %v1923_v57 = vsel %vm1257_vm4, %v1920_v30, %v1922_v43  ;;  %v2610_v36 = vadd.f32 %v2510_v18, %v2333_v58 }
 0x22f   : > { %v2334_v29 = vadd.f32 %v2239_v9, %v2121_v28  ;;  %v1430_v24 = vadd.f32 %v1332_v1, %v1152_v26  ;;  %v2074_v52 = vmul.f32 %v5386_v49, %v5832_v44  ;;  %v2840_v4 = vsel %vm2770_vm5, %v2837_v63, %v2839_v40 }
 0x230   : > { %v1927_v59 = vrot.slane %v5870_v54, 2  ;;  %v2388_v34 = vmul.f32 %v5401_v41, %v836_v23  ;;  %v892_v27 = vmul.f32 %v5269_v17, %v5672_v2  ;;  %3589 = vmatmul.mubr.msk.f32.gmra.mrb[26].mxu1 %vm231_vm1, %v2840_v4  ;;  %v2663_v43 = vmul.f32 %v5623_v48, %v2610_v36 }
 0x231   : > { %v2611_v5 = vadd.f32 %v2512_v7, %v2334_v29  ;;  %v1531_v30 = vadd.f32 %v1483_v3, %v1430_v24  ;;  %v5886_v47 = vmul.f32 %v5307_v55, %v5737_v0  ;;  %v1206_v63 = vmul.f32 %v5321_v31, %v5672_v2 }
 0x232   : > { %v2513_v46 = vrot.slane %v2388_v34, 2  ;;  %v5892_v12 = vmul.f32 %v5321_v31, %v5737_v0  ;;  %v1485_v17 = vmul.f32 %v5354_v53, %v5822_v45  ;;  %v2716_v20 = vadd.f32 %v5645_v38, %v2663_v43 }
 0x233   : > { %v2664_v19 = vmul.f32 %v5623_v48, %v2611_v5  ;;  %v1744_v16 = vadd.f32 %v1647_v62, %v1531_v30  ;;  %v1058_v60 = vrot.slane %v5886_v47, 1  ;;  %v1333_v18 = vrot.slane %v1206_v63, 2  ;;  %v837_v62 = vld [vmem:[#allocation2 + $0x220] sm:$0xff] }
 0x234   : > { %v2514_v55 = vsel %vm1257_vm4, %v2511_v51, %v2513_v46  ;;  %v1334_v23 = vrot.slane %v5892_v12, 2  ;;  %v1570_v2 = vmul.f32 %v5483_v37, %v5822_v45  ;;  %v2841_v13 = vrot.slane %v2716_v20, 7  ;;  %v5918_v15 = vpop.f32.mrb[6].mxu1 }
 0x235   : > { %v5904_v31 = vadd.f32 %v5645_v38, %v2664_v19  ;;  %v2021_v8 = vadd.f32 %v1923_v57, %v1744_v16  ;;  %v1059_v9 = vsel %vm1011_vm3, %v1057_v21, %v1058_v60  ;;  %v1431_v51 = vadd.f32 %v1333_v18, %v5713_v56  ;;  %v838_v21 = vld [vmem:[#allocation2 + $0x228] sm:$0xff]  ;;  %v839_v57 = vld [vmem:[#allocation2 + $0x230] sm:$0xff]  ;;  %v5924_v24 = vpop.f32.mrb[7].mxu1 }
 0x236   : > { %v1154_v1 = vadd.f32 %v1059_v9, %v892_v27  ;;  %v1335_v28 = vsel %vm1257_vm4, %v1333_v18, %v1334_v23  ;;  %v5913_v58 = vmul.f32 %v5483_v37, %v5832_v44  ;;  %v1649_v40 = vrot.slane %v1570_v2, 1 }
 0x237   : > { %v2842_v26 = vrot.slane %v5904_v31, 7  ;;  %v2122_v3 = vadd.f32 %v2074_v52, %v2021_v8  ;;  %v1798_v7 = vmul.f32 %v5377_v33, %v5822_v45  ;;  %v1532_v36 = vadd.f32 %v5808_v50, %v1431_v51 }
 0x238   : > { %v1432_v29 = vadd.f32 %v1335_v28, %v1154_v1  ;;  %v1650_v56 = vrot.slane %v5913_v58, 1  ;;  %v1799_v37 = vmul.f32 %v5377_v33, %v5832_v44  ;;  %v2075_v34 = vmul.f32 %v5386_v49, %v837_v62  ;;  %v840_v62 = vld [vmem:[#allocation2 + $0x238] sm:$0x1] }
 0x239   : > { %v2843_v52 = vsel %vm2770_vm5, %v2841_v13, %v2842_v26  ;;  %v2335_v4 = vadd.f32 %v2238_v42, %v2122_v3  ;;  %v1924_v45 = vrot.slane %v1798_v7, 2  ;;  %v1745_v5 = vadd.f32 %v1649_v40, %v1532_v36 }
 0x23a   : > { %3591 = vmatprep.mubr.msk.f32.mxu1 %vm231_vm1, %v2843_v52  ;;  %v1533_v27 = vadd.f32 %v1485_v17, %v1432_v29  ;;  %v1651_v50 = vsel %vm1011_vm3, %v1649_v40, %v1650_v56  ;;  %v1925_v43 = vrot.slane %v1799_v37, 2  ;;  %v2076_v30 = vmul.f32 %v5386_v49, %v838_v21 }
 0x23b   : > { %v2612_v33 = vadd.f32 %v2514_v55, %v2335_v4  ;;  %v2161_v47 = vmul.f32 %v5629_v35, %v838_v21  ;;  %v5937_v61 = vmul.f32 %v5629_v35, %v839_v57  ;;  %v2022_v63 = vadd.f32 %v1924_v45, %v1745_v5  ;;  %v3630_v35 = vld [vmem:[%s6139_s3] ss:$0 sm:$0xff] }
 0x23c   : > { %v1746_v42 = vadd.f32 %v1651_v50, %v1533_v27  ;;  %v1926_v46 = vsel %vm1257_vm4, %v1924_v45, %v1925_v43  ;;  %v2389_v12 = vmul.f32 %v5401_v41, %v838_v21  ;;  %v2390_v16 = vmul.f32 %v5401_v41, %v839_v57 }
 0x23d   : > { %v2665_v17 = vmul.f32 %v5623_v48, %v2612_v33  ;;  %v2240_v19 = vrot.slane %v2161_v47, 1  ;;  %v2241_v20 = vrot.slane %v5937_v61, 1  ;;  %v2123_v18 = vadd.f32 %v2075_v34, %v2022_v63 }
 0x23e   : > { %v2023_v55 = vadd.f32 %v1926_v46, %v1746_v42  ;;  %v2515_v2 = vrot.slane %v2389_v12, 2  ;;  %v893_v31 = vmul.f32 %v3630_v35, %v5737_v0  ;;  %v2516_v9 = vrot.slane %v2390_v16, 2  ;;  %v5960_v0 = vld [vmem:[%s6139_s3 + $0xd] ss:$0 sm:$0xff] }
 0x23f   : > { %v2718_v13 = vadd.f32 %v5645_v38, %v2665_v17  ;;  %v2242_v8 = vsel %vm1011_vm3, %v2240_v19, %v2241_v20  ;;  %v1337_v1 = vsel %vm1257_vm4, %v1334_v23, %v1336_v14  ;;  %v2336_v51 = vadd.f32 %v2240_v19, %v2123_v18 }
 0x240   : > { %v2124_v28 = vadd.f32 %v2076_v30, %v2023_v55  ;;  %v1155_v3 = vadd.f32 %v1058_v60, %v893_v31  ;;  %v1486_v40 = vmul.f32 %v5354_v53, %v5832_v44  ;;  %v2517_v21 = vsel %vm1257_vm4, %v2515_v2, %v2516_v9  ;;  %v5970_v53 = vld [vmem:[%s6139_s3 + $0xe] ss:$0 sm:$0xff] }
 0x241   : > { %v2844_v7 = vrot.slane %v2718_v13, 7  ;;  %v1928_v39 = vsel %vm1257_vm4, %v1925_v43, %v1927_v59  ;;  %v2613_v14 = vadd.f32 %v2515_v2, %v2336_v51  ;;  %v2391_v60 = vmul.f32 %v5401_v41, %v840_v62 }
 0x242   : > { %v2337_v29 = vadd.f32 %v2242_v8, %v2124_v28  ;;  %v1433_v23 = vadd.f32 %v1337_v1, %v1155_v3  ;;  %v3150_v36 = vmul.f32 %v5560_v11, %v5960_v0  ;;  %v3149_v54 = vmul.f32 %v5960_v0, %v5566_v10 }
 0x243   : > { %v2845_v44 = vsel %vm2770_vm5, %v2842_v26, %v2844_v7  ;;  %v3152_v59 = vmul.f32 %v5729_v25, %v5960_v0  ;;  %v2666_v41 = vmul.f32 %v5623_v48, %v2613_v14  ;;  %v2077_v4 = vmul.f32 %v5386_v49, %v839_v57 }
 0x244   : > { %3592 = vmatmul.mubr.msk.f32.gmra.mrb[28].mxu1 %vm231_vm1, %v2845_v44  ;;  %v2614_v37 = vadd.f32 %v2517_v21, %v2337_v29  ;;  %v1534_v52 = vadd.f32 %v1486_v40, %v1433_v23  ;;  %v3187_v45 = vadd.f32 %v5970_v53, %v3150_v36  ;;  %v3186_v26 = vadd.f32 %v5970_v53, %v3149_v54 }
 0x245   : > { %v3189_v11 = vadd.f32 %v5970_v53, %v3152_v59  ;;  %v3151_v10 = vmul.f32 %v5960_v0, %v5735_v32  ;;  %v2719_v25 = vadd.f32 %v5645_v38, %v2666_v41  ;;  %v2518_v34 = vrot.slane %v2391_v60, 2 }
 0x246   : > { %v2667_v49 = vmul.f32 %v5623_v48, %v2614_v37  ;;  %v1747_v57 = vadd.f32 %v1650_v56, %v1534_v52  ;;  %v3219_v27 = vmax.f32 %v3187_v45, 0.0  ;;  %v3218_v50 = vmax.f32 %v3186_v26, 0.0 }
 0x247   : > { %v3221_v32 = vmax.f32 %v3189_v11, 0.0  ;;  %v3188_v5 = vadd.f32 %v5970_v53, %v3151_v10  ;;  %v2846_v33 = vrot.slane %v2719_v25, 7  ;;  %v3154_v47 = vmul.f32 %v5814_v6, %v5960_v0 }
 0x248   : > { %v2720_v43 = vadd.f32 %v5645_v38, %v2667_v49  ;;  %v2024_v30 = vadd.f32 %v1928_v39, %v1747_v57  ;;  %3251 = vst.msk [vmem:[%s5992_s12 + $0x8] sm:$0xff] %vm231_vm1, %v3219_v27  ;;  %3250 = vst.msk [vmem:[%s5992_s12] sm:$0xff] %vm231_vm1, %v3218_v50  ;;  %v3153_v56 = vmul.f32 %v5960_v0, %v5820_v22  ;;  %v3563_v19 = vpop.f32.mrb[8].mxu1 }
 0x249   : > { %3253 = vst.msk [vmem:[%s5992_s12 + $0x18] sm:$0xff] %vm231_vm1, %v3221_v32  ;;  %v3220_v58 = vmax.f32 %v3188_v5, 0.0  ;;  %v3156_v42 = vmul.f32 %v5918_v15, %v5960_v0  ;;  %v3155_v46 = vmul.f32 %v5960_v0, %v5924_v24  ;;  %v2519_v6 = vsel %vm1257_vm4, %v2516_v9, %v2518_v34  ;;  %v3025_v55 = vpop.f32.mrb[9].mxu1 }
 0x24a   : > { %v2847_v63 = vrot.slane %v2720_v43, 7  ;;  %v2125_v12 = vadd.f32 %v2077_v4, %v2024_v30  ;;  %v3191_v17 = vadd.f32 %v5970_v53, %v3154_v47  ;;  %v3190_v16 = vadd.f32 %v5970_v53, %v3153_v56 }
 0x24b   : > { %3252 = vst.msk [vmem:[%s5992_s12 + $0x10] sm:$0xff] %vm231_vm1, %v3220_v58  ;;  %v3193_v22 = vadd.f32 %v5970_v53, %v3156_v42  ;;  %v3192_v15 = vadd.f32 %v5970_v53, %v3155_v46  ;;  %v3158_v24 = vmul.f32 %v3563_v19, %v5960_v0  ;;  %v3157_v31 = vmul.f32 %v5960_v0, %v3025_v55 }
 0x24c   : > { %v2848_v18 = vsel %vm2770_vm5, %v2846_v33, %v2847_v63  ;;  %v2338_v2 = vadd.f32 %v2241_v20, %v2125_v12  ;;  %v3223_v35 = vmax.f32 %v3191_v17, 0.0  ;;  %v3222_v13 = vmax.f32 %v3190_v16, 0.0 }
 0x24d   : > { %3594 = vmatprep.mubr.msk.f32.mxu1 %vm231_vm1, %v2848_v18  ;;  %v3225_v8 = vmax.f32 %v3193_v22, 0.0  ;;  %v3224_v9 = vmax.f32 %v3192_v15, 0.0  ;;  %v3195_v62 = vadd.f32 %v5970_v53, %v3158_v24  ;;  %v3194_v28 = vadd.f32 %v5970_v53, %v3157_v31 }
 0x24e   : > { %v2615_v1 = vadd.f32 %v2519_v6, %v2338_v2  ;;  %3255 = vst.msk [vmem:[%s5992_s12 + $0x28] sm:$0xff] %vm231_vm1, %v3223_v35  ;;  %3254 = vst.msk [vmem:[%s5992_s12 + $0x20] sm:$0xff] %vm231_vm1, %v3222_v13 }
 0x24f   : > { %3257 = vst.msk [vmem:[%s5992_s12 + $0x38] sm:$0xff] %vm231_vm1, %v3225_v8  ;;  %3256 = vst.msk [vmem:[%s5992_s12 + $0x30] sm:$0xff] %vm231_vm1, %v3224_v9  ;;  %v3227_v61 = vmax.f32 %v3195_v62, 0.0  ;;  %v3226_v51 = vmax.f32 %v3194_v28, 0.0 }
 0x250   : > { %v2668_v20 = vmul.f32 %v5623_v48, %v2615_v1 }
 0x251   : > { %3259 = vst.msk [vmem:[%s5992_s12 + $0x48] sm:$0xff] %vm231_vm1, %v3227_v61  ;;  %3258 = vst.msk [vmem:[%s5992_s12 + $0x40] sm:$0xff] %vm231_vm1, %v3226_v51 }
 0x252   : > { %v2721_v3 = vadd.f32 %v5645_v38, %v2668_v20 }
 0x254   : > { %v2849_v40 = vrot.slane %v2721_v3, 7 }
 0x256   : > { %v2850_v7 = vsel %vm2770_vm5, %v2847_v63, %v2849_v40 }
 0x257   : > { %3595 = vmatmul.mubr.msk.f32.gmra.mrb[30].mxu1 %vm231_vm1, %v2850_v7 }
 0x25d   : > { %v3566_v21 = vpop.f32.mrb[10].mxu1 }
 0x25e   : > { %v3160_v39 = vmul.f32 %v3566_v21, %v5960_v0  ;;  %v3035_v29 = vpop.f32.mrb[11].mxu1 }
 0x25f   : > { %v3159_v48 = vmul.f32 %v5960_v0, %v3035_v29 }
 0x260   : > { %v3197_v14 = vadd.f32 %v5970_v53, %v3160_v39 }
 0x261   : > { %v3196_v23 = vadd.f32 %v5970_v53, %v3159_v48 }
 0x262   : > { %v3229_v38 = vmax.f32 %v3197_v14, 0.0 }
 0x263   : > { %v3228_v60 = vmax.f32 %v3196_v23, 0.0 }
 0x264   : > { %3261 = vst.msk [vmem:[%s5992_s12 + $0x58] sm:$0xff] %vm231_vm1, %v3229_v38 }
 0x265   : > { %3260 = vst.msk [vmem:[%s5992_s12 + $0x50] sm:$0xff] %vm231_vm1, %v3228_v60 }
 0x272   : > { %v3569_v44 = vpop.f32.mrb[12].mxu1 }
 0x273   : > { %v3162_v36 = vmul.f32 %v3569_v44, %v5960_v0  ;;  %v3045_v54 = vpop.f32.mrb[13].mxu1 }
 0x274   : > { %v3161_v59 = vmul.f32 %v5960_v0, %v3045_v54 }
 0x275   : > { %v3199_v37 = vadd.f32 %v5970_v53, %v3162_v36 }
 0x276   : > { %v3198_v41 = vadd.f32 %v5970_v53, %v3161_v59 }
 0x277   : > { %v3231_v52 = vmax.f32 %v3199_v37, 0.0 }
 0x278   : > { %v3230_v4 = vmax.f32 %v3198_v41, 0.0 }
 0x279   : > { %3263 = vst.msk [vmem:[%s5992_s12 + $0x68] sm:$0xff] %vm231_vm1, %v3231_v52 }
 0x27a   : > { %3262 = vst.msk [vmem:[%s5992_s12 + $0x60] sm:$0xff] %vm231_vm1, %v3230_v4 }
 0x287   : > { %v3572_v45 = vpop.f32.mrb[14].mxu1 }
 0x288   : > { %v3164_v26 = vmul.f32 %v3572_v45, %v5960_v0  ;;  %v3055_v11 = vpop.f32.mrb[15].mxu1 }
 0x289   : > { %v3163_v10 = vmul.f32 %v5960_v0, %v3055_v11 }
 0x28a   : > { %v3201_v49 = vadd.f32 %v5970_v53, %v3164_v26 }
 0x28b   : > { %v3200_v25 = vadd.f32 %v5970_v53, %v3163_v10 }
 0x28c   : > { %v3233_v57 = vmax.f32 %v3201_v49, 0.0 }
 0x28d   : > { %v3232_v34 = vmax.f32 %v3200_v25, 0.0 }
 0x28e   : > { %3265 = vst.msk [vmem:[%s5992_s12 + $0x78] sm:$0xff] %vm231_vm1, %v3233_v57 }
 0x28f   : > { %3264 = vst.msk [vmem:[%s5992_s12 + $0x70] sm:$0xff] %vm231_vm1, %v3232_v34 }
 0x29c   : > { %v3575_v27 = vpop.f32.mrb[16].mxu1 }
 0x29d   : > { %v3166_v50 = vmul.f32 %v3575_v27, %v5960_v0  ;;  %v3065_v32 = vpop.f32.mrb[17].mxu1 }
 0x29e   : > { %v3165_v5 = vmul.f32 %v5960_v0, %v3065_v32 }
 0x29f   : > { %v3203_v43 = vadd.f32 %v5970_v53, %v3166_v50 }
 0x2a0   : > { %v3202_v33 = vadd.f32 %v5970_v53, %v3165_v5 }
 0x2a1   : > { %v3235_v30 = vmax.f32 %v3203_v43, 0.0 }
 0x2a2   : > { %v3234_v47 = vmax.f32 %v3202_v33, 0.0 }
 0x2a3   : > { %3267 = vst.msk [vmem:[%s5992_s12 + $0x88] sm:$0xff] %vm231_vm1, %v3235_v30 }
 0x2a4   : > { %3266 = vst.msk [vmem:[%s5992_s12 + $0x80] sm:$0xff] %vm231_vm1, %v3234_v47 }
 0x2b1   : > { %v3578_v58 = vpop.f32.mrb[18].mxu1 }
 0x2b2   : > { %v3168_v56 = vmul.f32 %v3578_v58, %v5960_v0  ;;  %v3075_v42 = vpop.f32.mrb[19].mxu1 }
 0x2b3   : > { %v3167_v46 = vmul.f32 %v5960_v0, %v3075_v42 }
 0x2b4   : > { %v3205_v63 = vadd.f32 %v5970_v53, %v3168_v56 }
 0x2b5   : > { %v3204_v12 = vadd.f32 %v5970_v53, %v3167_v46 }
 0x2b6   : > { %v3237_v6 = vmax.f32 %v3205_v63, 0.0 }
 0x2b7   : > { %v3236_v17 = vmax.f32 %v3204_v12, 0.0 }
 0x2b8   : > { %3269 = vst.msk [vmem:[%s5992_s12 + $0x98] sm:$0xff] %vm231_vm1, %v3237_v6 }
 0x2b9   : > { %3268 = vst.msk [vmem:[%s5992_s12 + $0x90] sm:$0xff] %vm231_vm1, %v3236_v17 }
 0x2c5   : > { %v3581_v19 = vpop.f32.mrb[20].mxu1 }
 0x2c6   : > { %v3170_v16 = vmul.f32 %v3581_v19, %v5960_v0  ;;  %v3085_v22 = vpop.f32.mrb[21].mxu1 }
 0x2c7   : > { %v3169_v15 = vmul.f32 %v5960_v0, %v3085_v22 }
 0x2c8   : > { %v3207_v24 = vadd.f32 %v5970_v53, %v3170_v16 }
 0x2c9   : > { %v3206_v55 = vadd.f32 %v5970_v53, %v3169_v15 }
 0x2ca   : > { %v3239_v18 = vmax.f32 %v3207_v24, 0.0 }
 0x2cb   : > { %v3238_v2 = vmax.f32 %v3206_v55, 0.0 }
 0x2cc   : > { %3271 = vst.msk [vmem:[%s5992_s12 + $0xa8] sm:$0xff] %vm231_vm1, %v3239_v18 }
 0x2cd   : > { %3270 = vst.msk [vmem:[%s5992_s12 + $0xa0] sm:$0xff] %vm231_vm1, %v3238_v2 }
 0x2da   : > { %v3584_v35 = vpop.f32.mrb[22].mxu1 }
 0x2db   : > { %v3172_v31 = vmul.f32 %v3584_v35, %v5960_v0  ;;  %v3095_v13 = vpop.f32.mrb[23].mxu1 }
 0x2dc   : > { %v3171_v8 = vmul.f32 %v5960_v0, %v3095_v13 }
 0x2dd   : > { %v3209_v9 = vadd.f32 %v5970_v53, %v3172_v31 }
 0x2de   : > { %v3208_v62 = vadd.f32 %v5970_v53, %v3171_v8 }
 0x2df   : > { %v3241_v1 = vmax.f32 %v3209_v9, 0.0 }
 0x2e0   : > { %v3240_v28 = vmax.f32 %v3208_v62, 0.0 }
 0x2e1   : > { %3273 = vst.msk [vmem:[%s5992_s12 + $0xb8] sm:$0xff] %vm231_vm1, %v3241_v1 }
 0x2e2   : > { %3272 = vst.msk [vmem:[%s5992_s12 + $0xb0] sm:$0xff] %vm231_vm1, %v3240_v28 }
 0x2ef   : > { %v3587_v61 = vpop.f32.mrb[24].mxu1 }
 0x2f0   : > { %v3174_v20 = vmul.f32 %v3587_v61, %v5960_v0  ;;  %v3105_v51 = vpop.f32.mrb[25].mxu1 }
 0x2f1   : > { %v3173_v3 = vmul.f32 %v5960_v0, %v3105_v51 }
 0x2f2   : > { %v3211_v40 = vadd.f32 %v5970_v53, %v3174_v20 }
 0x2f3   : > { %v3210_v7 = vadd.f32 %v5970_v53, %v3173_v3 }
 0x2f4   : > { %v3243_v21 = vmax.f32 %v3211_v40, 0.0 }
 0x2f5   : > { %v3242_v39 = vmax.f32 %v3210_v7, 0.0 }
 0x2f6   : > { %3275 = vst.msk [vmem:[%s5992_s12 + $0xc8] sm:$0xff] %vm231_vm1, %v3243_v21 }
 0x2f7   : > { %3274 = vst.msk [vmem:[%s5992_s12 + $0xc0] sm:$0xff] %vm231_vm1, %v3242_v39 }
 0x303   : > { %v3590_v29 = vpop.f32.mrb[26].mxu1 }
 0x304   : > { %v3176_v48 = vmul.f32 %v3590_v29, %v5960_v0  ;;  %v3115_v14 = vpop.f32.mrb[27].mxu1 }
 0x305   : > { %v3175_v23 = vmul.f32 %v5960_v0, %v3115_v14 }
 0x306   : > { %v3213_v38 = vadd.f32 %v5970_v53, %v3176_v48 }
 0x307   : > { %v3212_v60 = vadd.f32 %v5970_v53, %v3175_v23 }
 0x308   : > { %v3245_v44 = vmax.f32 %v3213_v38, 0.0 }
 0x309   : > { %v3244_v36 = vmax.f32 %v3212_v60, 0.0 }
 0x30a   : > { %3277 = vst.msk [vmem:[%s5992_s12 + $0xd8] sm:$0xff] %vm231_vm1, %v3245_v44 }
 0x30b   : > { %3276 = vst.msk [vmem:[%s5992_s12 + $0xd0] sm:$0xff] %vm231_vm1, %v3244_v36 }
 0x317   : > { %v3593_v54 = vpop.f32.mrb[28].mxu1 }
 0x318   : > { %v3178_v59 = vmul.f32 %v3593_v54, %v5960_v0  ;;  %v3125_v37 = vpop.f32.mrb[29].mxu1 }
 0x319   : > { %v3177_v41 = vmul.f32 %v5960_v0, %v3125_v37 }
 0x31a   : > { %v3215_v52 = vadd.f32 %v5970_v53, %v3178_v59 }
 0x31b   : > { %v3214_v4 = vadd.f32 %v5970_v53, %v3177_v41 }
 0x31c   : > { %v3247_v45 = vmax.f32 %v3215_v52, 0.0 }
 0x31d   : > { %v3246_v26 = vmax.f32 %v3214_v4, 0.0 }
 0x31e   : > { %3279 = vst.msk [vmem:[%s5992_s12 + $0xe8] sm:$0xff] %vm231_vm1, %v3247_v45 }
 0x31f   : > { %3278 = vst.msk [vmem:[%s5992_s12 + $0xe0] sm:$0xff] %vm231_vm1, %v3246_v26 }
 0x32a   : > { %v3596_v11 = vpop.f32.mrb[30].mxu1 }
 0x32b   : > { %v3180_v10 = vmul.f32 %v3596_v11, %v5960_v0  ;;  %v3135_v49 = vpop.f32.mrb[31].mxu1 }
 0x32c   : > { %v3179_v25 = vmul.f32 %v5960_v0, %v3135_v49 }
 0x32d   : > { %v3217_v57 = vadd.f32 %v5970_v53, %v3180_v10 }
 0x32e   : > { %v3216_v34 = vadd.f32 %v5970_v53, %v3179_v25 }
 0x32f   : > { %v3249_v27 = vmax.f32 %v3217_v57, 0.0 }
 0x330   : > { %v3248_v50 = vmax.f32 %v3216_v34, 0.0 }
 0x331   : > { %3281 = vst.msk [vmem:[%s5992_s12 + $0xf8] sm:$0xff] %vm231_vm1, %v3249_v27 }
 0x332   : > { %3280 = vst.msk [vmem:[%s5992_s12 + $0xf0] sm:$0xff] %vm231_vm1, %v3248_v50 }
 0x333 PF: > { %s14_s15 = sadd.s32 1, %s3637_s15  }
 0x334   : > { %p11_p4 = scmp.ge.s32.totalorder %s14_s15, 4  }
 0x336   :  { %13 = sbr.rel (!%p11_p4) target bundleno = 1 (0x1), region = 67 }

</bundles_post_ra>
